<compile_context>
chip_gen: v7x
topology: tpu7x:2x2x1
jax: 0.10.0
libtpu: 0.0.40
codegen_flags: <defaults>
</compile_context>

<pallas_src>
import functools

import numpy as np

import jax
import jax.numpy as jnp
from jax.experimental import pallas as pl
from jax.experimental.pallas import tpu as pltpu

# ---- model hyper-parameters (match the PyTorch module) ----------------------
L_POSMAP = 7                  # PositionalMapping(L=7)
H_DIM = 128                   # hidden width
PI_F32 = 3.1415927410125732   # exact constant used in the PyTorch code
LEAK = 0.2                    # LeakyReLU negative slope


def _leaky_relu(v):
    return jnp.where(v > 0, v, LEAK * v)


def _round_up(n, m):
    return ((n + m - 1) // m) * m


# ----------------------------- Pallas kernel ---------------------------------
def mlp_kernel(x_ref, freq_ref, w_ref, b_ref, o_ref, *, num_freq_blocks, n_zero_pad):
    """Fused PositionalMapping + 4-layer MLP for a (TB, D) tile of independent states."""
    x = x_ref[...]                                          # (TB, D) f32
    tb = x.shape[0]

    # Positional mapping, lane-vectorized: one sin and one cos over a (TB, L*D)
    # slab instead of 2*L tiny trig launches and a 15-way concat.
    xt = jnp.concatenate([x] * num_freq_blocks, axis=-1)    # (TB, L*D)
    phase = xt * freq_ref[...]                              # freq_ref: (1, L*D)
    sin_p = jnp.sin(phase)
    cos_p = jnp.cos(phase)

    # Lane-dense mapped vector padded to 128 lanes; the final lane is 1.0 so the
    # layer-1 bias (stored as the last row of the packed W1) folds into the dot.
    pieces = [x, sin_p, cos_p]
    if n_zero_pad > 0:
        pieces.append(jnp.zeros((tb, n_zero_pad), jnp.float32))
    pieces.append(jnp.ones((tb, 1), jnp.float32))
    m = jnp.concatenate(pieces, axis=-1)                    # (TB, 128)

    h = _leaky_relu(jnp.dot(m, w_ref[0], preferred_element_type=jnp.float32))
    h = _leaky_relu(jnp.dot(h, w_ref[1], preferred_element_type=jnp.float32) + b_ref[1])
    h = _leaky_relu(jnp.dot(h, w_ref[2], preferred_element_type=jnp.float32) + b_ref[2])
    o_ref[...] = jnp.dot(h, w_ref[3], preferred_element_type=jnp.float32) + b_ref[3]


# ----------------------------- parameter handling ----------------------------
def init_mlp_params(key, input_dim, output_dim):
    """PyTorch-Linear-like init (U(-1/sqrt(fan_in), 1/sqrt(fan_in))), weights as (in, out)."""
    map_dim = input_dim * (2 * L_POSMAP + 1)
    dims = [(map_dim, H_DIM), (H_DIM, H_DIM), (H_DIM, H_DIM), (H_DIM, output_dim)]
    params = []
    for fan_in, fan_out in dims:
        key, kw, kb = jax.random.split(key, 3)
        bound = 1.0 / (fan_in ** 0.5)
        w = jax.random.uniform(kw, (fan_in, fan_out), jnp.float32, -bound, bound)
        b = jax.random.uniform(kb, (1, fan_out), jnp.float32, -bound, bound)
        params += [w, b]
    return params, key


def pack_params(params, input_dim, output_dim):
    """Pack the 8 weight/bias arrays into 2 aligned VMEM buffers + a tiny freq row."""
    w1, b1, w2, b2, w3, b3, w4, b4 = params
    D, L = input_dim, L_POSMAP
    map_dim = D * (2 * L + 1)
    assert map_dim + 1 <= H_DIM, "kernel assumes mapped dim (+ bias lane) fits in 128"

    # Row permutation of W1 so the in-kernel mapped vector can be laid out as
    # [x | sin_0..sin_{L-1} | cos_0..cos_{L-1} | zeros | 1].
    perm = (list(range(D))
            + [D * (1 + 2 * i) + d for i in range(L) for d in range(D)]
            + [D * (2 + 2 * i) + d for i in range(L) for d in range(D)])
    w1p = w1[np.asarray(perm, dtype=np.int32), :]

    w1_aug = jnp.zeros((H_DIM, H_DIM), jnp.float32)
    w1_aug = w1_aug.at[:map_dim, :].set(w1p)
    w1_aug = w1_aug.at[H_DIM - 1, :].set(b1[0])             # bias folded via the 1.0 lane

    w4_pad = jnp.zeros((H_DIM, H_DIM), jnp.float32).at[:, :output_dim].set(w4)
    b4_pad = jnp.zeros((1, H_DIM), jnp.float32).at[:, :output_dim].set(b4)

    w_packed = jnp.stack([w1_aug, w2, w3, w4_pad])          # (4, 128, 128)
    b_packed = jnp.stack(
        [jnp.zeros((1, H_DIM), jnp.float32), b2, b3, b4_pad])  # (4, 1, 128); slot 0 unused

    freqs = jnp.asarray(
        np.repeat(np.asarray([(2.0 ** i) * PI_F32 for i in range(L)], np.float32), D)[None, :])
    return w_packed, b_packed, freqs                        # freqs: (1, L*D)


# ----------------------------- wrapper ---------------------------------------
def mlp_forward(x, params, output_dim, *, tile_b=128):
    """x: (B, input_dim) f32; each row is an independent state (PyTorch x.view([1,-1])).
    Returns (B, output_dim) f32."""
    B, D = x.shape
    w_packed, b_packed, freqs = pack_params(params, D, output_dim)

    TB = min(tile_b, _round_up(B, 8))
    B_pad = _round_up(B, TB)
    if B_pad != B:
        x = jnp.pad(x, ((0, B_pad - B), (0, 0)))

    map_dim = D * (2 * L_POSMAP + 1)
    kernel = functools.partial(
        mlp_kernel, num_freq_blocks=L_POSMAP, n_zero_pad=H_DIM - map_dim - 1)

    out = pl.pallas_call(
        kernel,
        out_shape=jax.ShapeDtypeStruct((B_pad, H_DIM), jnp.float32),
        grid=(B_pad // TB,),
        in_specs=[
            pl.BlockSpec((TB, D), lambda b: (b, 0)),                  # states (tiled over batch)
            pl.BlockSpec((1, L_POSMAP * D), lambda b: (0, 0)),        # freq row (whole array)
            pl.BlockSpec((4, H_DIM, H_DIM), lambda b: (0, 0, 0)),     # packed weights
            pl.BlockSpec((4, 1, H_DIM), lambda b: (0, 0, 0)),         # packed biases
        ],
        out_specs=pl.BlockSpec((TB, H_DIM), lambda b: (b, 0)),        # lane-dense output slab
        compiler_params=pltpu.CompilerParams(dimension_semantics=("parallel",)),
    )(x, freqs, w_packed, b_packed)
    return out[:B, :output_dim]


# ----------------------------- pure-JAX reference ----------------------------
def _positional_mapping_ref(x):
    h = [x]
    for i in range(L_POSMAP):
        arg = (2.0 ** i) * PI_F32 * x
        h.append(jnp.sin(arg))
        h.append(jnp.cos(arg))
    return jnp.concatenate(h, axis=-1)


def reference_forward(x, params):
    w1, b1, w2, b2, w3, b3, w4, b4 = params
    m = _positional_mapping_ref(x)
    h = _leaky_relu(m @ w1 + b1)
    h = _leaky_relu(h @ w2 + b2)
    h = _leaky_relu(h @ w3 + b3)
    return h @ w4 + b4


if __name__ == "__main__":
    input_dim = 8      # rocket state dimension
    output_dim = 9     # number of discrete actions

    key = jax.random.PRNGKey(0)
    key, kx = jax.random.split(key)
    batch = 256        # batch of states: fills MXU rows and exercises the "parallel" grid
    x = jax.random.normal(kx, (batch, input_dim), dtype=jnp.float32)

    params, key = init_mlp_params(key, input_dim, output_dim)

    y = mlp_forward(x, params, output_dim)
    y = jax.block_until_ready(y)

    y_ref = reference_forward(x, params)

    assert y.shape == (batch, output_dim)
    assert jnp.allclose(y, y_ref, atol=1e-4, rtol=1e-4), float(jnp.max(jnp.abs(y - y_ref)))

    # Single-state path (the exact PyTorch `x.view([1, -1])` usage) also works.
    y1 = jax.block_until_ready(mlp_forward(x[:1], params, output_dim))
    assert y1.shape == (1, output_dim)
    assert jnp.allclose(y1, y_ref[:1], atol=1e-4, rtol=1e-4)

    print("KERNEL_OK")
</pallas_src>

<mosaic_0001>
module attributes {stable_mosaic.version = 11 : i64} {
  func.func @mlp_kernel(%arg0: i32, %arg1: memref<128x8xf32, #tpu.memory_space<vmem>>, %arg2: memref<1x56xf32, #tpu.memory_space<vmem>>, %arg3: memref<4x128x128xf32, #tpu.memory_space<vmem>>, %arg4: memref<4x1x128xf32, #tpu.memory_space<vmem>>, %arg5: memref<128x128xf32, #tpu.memory_space<vmem>>) attributes {dimension_semantics = [#tpu.dimension_semantics<parallel>], iteration_bounds = array<i64: 2>, scalar_prefetch = 0 : i64, scratch_operands = 0 : i64, tpu.core_type = #tpu.core_type<tc>, window_params = [{transform_indices = @transform_0, window_bounds = array<i64: 128, 8>}, {pipeline_mode = #tpu.pipeline_mode<synchronous>, transform_indices = @transform_1, window_bounds = array<i64: 1, 56>}, {pipeline_mode = #tpu.pipeline_mode<synchronous>, transform_indices = @transform_2, window_bounds = array<i64: 4, 128, 128>}, {pipeline_mode = #tpu.pipeline_mode<synchronous>, transform_indices = @transform_3, window_bounds = array<i64: 4, 1, 128>}, {transform_indices = @transform_4, window_bounds = array<i64: 128, 128>}]} {
    %c0 = arith.constant 0 : index
    %c0_0 = arith.constant 0 : index
    %0 = vector.load %arg1[%c0, %c0_0] : memref<128x8xf32, #tpu.memory_space<vmem>>, vector<128x8xf32>
    %1 = tpu.concatenate %0, %0, %0, %0, %0, %0, %0 in 1 : vector<128x8xf32>, vector<128x8xf32>, vector<128x8xf32>, vector<128x8xf32>, vector<128x8xf32>, vector<128x8xf32>, vector<128x8xf32> -> vector<128x56xf32>
    %c0_1 = arith.constant 0 : index
    %c0_2 = arith.constant 0 : index
    %2 = vector.load %arg2[%c0_1, %c0_2] : memref<1x56xf32, #tpu.memory_space<vmem>>, vector<1x56xf32>
    %3 = vector.broadcast %2 : vector<1x56xf32> to vector<128x56xf32>
    %4 = arith.mulf %1, %3 : vector<128x56xf32>
    %5 = math.sin %4 : vector<128x56xf32>
    %6 = math.cos %4 : vector<128x56xf32>
    %cst = arith.constant 0.000000e+00 : f32
    %7 = vector.broadcast %cst : f32 to vector<128x7xf32>
    %cst_3 = arith.constant 1.000000e+00 : f32
    %8 = vector.broadcast %cst_3 : f32 to vector<128x1xf32>
    %9 = tpu.concatenate %0, %5, %6, %7, %8 in 1 : vector<128x8xf32>, vector<128x56xf32>, vector<128x56xf32>, vector<128x7xf32>, vector<128x1xf32> -> vector<128x128xf32>
    %c0_4 = arith.constant 0 : index
    %c0_5 = arith.constant 0 : index
    %c0_6 = arith.constant 0 : index
    %10 = vector.load %arg3[%c0_4, %c0_5, %c0_6] : memref<4x128x128xf32, #tpu.memory_space<vmem>>, vector<1x128x128xf32>
    %11 = vector.shape_cast %10 : vector<1x128x128xf32> to vector<128x128xf32>
    %cst_7 = arith.constant dense<0.000000e+00> : vector<128x128xf32>
    %12 = tpu.matmul %9, %11, %cst_7 {dimension_numbers = #tpu.dot_dimension_numbers<[1], [0], [0], [1], [0, 0, 1, 1], [], []>} : vector<128x128xf32>, vector<128x128xf32>, vector<128x128xf32> -> vector<128x128xf32>
    %cst_8 = arith.constant 0.000000e+00 : f32
    %13 = vector.broadcast %cst_8 : f32 to vector<128x128xf32>
    %14 = arith.cmpf ogt, %12, %13 : vector<128x128xf32>
    %cst_9 = arith.constant 2.000000e-01 : f32
    %15 = vector.broadcast %cst_9 : f32 to vector<128x128xf32>
    %16 = arith.mulf %15, %12 : vector<128x128xf32>
    %17 = arith.select %14, %12, %16 : vector<128x128xi1>, vector<128x128xf32>
    %c1 = arith.constant 1 : index
    %c0_10 = arith.constant 0 : index
    %c0_11 = arith.constant 0 : index
    %18 = vector.load %arg3[%c1, %c0_10, %c0_11] : memref<4x128x128xf32, #tpu.memory_space<vmem>>, vector<1x128x128xf32>
    %19 = vector.shape_cast %18 : vector<1x128x128xf32> to vector<128x128xf32>
    %cst_12 = arith.constant dense<0.000000e+00> : vector<128x128xf32>
    %20 = tpu.matmul %17, %19, %cst_12 {dimension_numbers = #tpu.dot_dimension_numbers<[1], [0], [0], [1], [0, 0, 1, 1], [], []>} : vector<128x128xf32>, vector<128x128xf32>, vector<128x128xf32> -> vector<128x128xf32>
    %c1_13 = arith.constant 1 : index
    %c0_14 = arith.constant 0 : index
    %c0_15 = arith.constant 0 : index
    %21 = vector.load %arg4[%c1_13, %c0_14, %c0_15] : memref<4x1x128xf32, #tpu.memory_space<vmem>>, vector<1x1x128xf32>
    %22 = vector.shape_cast %21 : vector<1x1x128xf32> to vector<1x128xf32>
    %23 = vector.broadcast %22 : vector<1x128xf32> to vector<128x128xf32>
    %24 = arith.addf %20, %23 : vector<128x128xf32>
    %cst_16 = arith.constant 0.000000e+00 : f32
    %25 = vector.broadcast %cst_16 : f32 to vector<128x128xf32>
    %26 = arith.cmpf ogt, %24, %25 : vector<128x128xf32>
    %cst_17 = arith.constant 2.000000e-01 : f32
    %27 = vector.broadcast %cst_17 : f32 to vector<128x128xf32>
    %28 = arith.mulf %27, %24 : vector<128x128xf32>
    %29 = arith.select %26, %24, %28 : vector<128x128xi1>, vector<128x128xf32>
    %c2 = arith.constant 2 : index
    %c0_18 = arith.constant 0 : index
    %c0_19 = arith.constant 0 : index
    %30 = vector.load %arg3[%c2, %c0_18, %c0_19] : memref<4x128x128xf32, #tpu.memory_space<vmem>>, vector<1x128x128xf32>
    %31 = vector.shape_cast %30 : vector<1x128x128xf32> to vector<128x128xf32>
    %cst_20 = arith.constant dense<0.000000e+00> : vector<128x128xf32>
    %32 = tpu.matmul %29, %31, %cst_20 {dimension_numbers = #tpu.dot_dimension_numbers<[1], [0], [0], [1], [0, 0, 1, 1], [], []>} : vector<128x128xf32>, vector<128x128xf32>, vector<128x128xf32> -> vector<128x128xf32>
    %c2_21 = arith.constant 2 : index
    %c0_22 = arith.constant 0 : index
    %c0_23 = arith.constant 0 : index
    %33 = vector.load %arg4[%c2_21, %c0_22, %c0_23] : memref<4x1x128xf32, #tpu.memory_space<vmem>>, vector<1x1x128xf32>
    %34 = vector.shape_cast %33 : vector<1x1x128xf32> to vector<1x128xf32>
    %35 = vector.broadcast %34 : vector<1x128xf32> to vector<128x128xf32>
    %36 = arith.addf %32, %35 : vector<128x128xf32>
    %cst_24 = arith.constant 0.000000e+00 : f32
    %37 = vector.broadcast %cst_24 : f32 to vector<128x128xf32>
    %38 = arith.cmpf ogt, %36, %37 : vector<128x128xf32>
    %cst_25 = arith.constant 2.000000e-01 : f32
    %39 = vector.broadcast %cst_25 : f32 to vector<128x128xf32>
    %40 = arith.mulf %39, %36 : vector<128x128xf32>
    %41 = arith.select %38, %36, %40 : vector<128x128xi1>, vector<128x128xf32>
    %c3 = arith.constant 3 : index
    %c0_26 = arith.constant 0 : index
    %c0_27 = arith.constant 0 : index
    %42 = vector.load %arg3[%c3, %c0_26, %c0_27] : memref<4x128x128xf32, #tpu.memory_space<vmem>>, vector<1x128x128xf32>
    %43 = vector.shape_cast %42 : vector<1x128x128xf32> to vector<128x128xf32>
    %cst_28 = arith.constant dense<0.000000e+00> : vector<128x128xf32>
    %44 = tpu.matmul %41, %43, %cst_28 {dimension_numbers = #tpu.dot_dimension_numbers<[1], [0], [0], [1], [0, 0, 1, 1], [], []>} : vector<128x128xf32>, vector<128x128xf32>, vector<128x128xf32> -> vector<128x128xf32>
    %c3_29 = arith.constant 3 : index
    %c0_30 = arith.constant 0 : index
    %c0_31 = arith.constant 0 : index
    %45 = vector.load %arg4[%c3_29, %c0_30, %c0_31] : memref<4x1x128xf32, #tpu.memory_space<vmem>>, vector<1x1x128xf32>
    %46 = vector.shape_cast %45 : vector<1x1x128xf32> to vector<1x128xf32>
    %47 = vector.broadcast %46 : vector<1x128xf32> to vector<128x128xf32>
    %48 = arith.addf %44, %47 : vector<128x128xf32>
    %c0_32 = arith.constant 0 : index
    %c0_33 = arith.constant 0 : index
    %49 = vector.load %arg5[%c0_32, %c0_33] : memref<128x128xf32, #tpu.memory_space<vmem>>, vector<128x128xf32>
    tpu.vector_store %arg5[%c0_32, %c0_33], %48 {strides = array<i32>} : memref<128x128xf32, #tpu.memory_space<vmem>>, vector<128x128xf32>,
    return
  }
  func.func @transform_0(%arg0: i32) -> (i32, i32) {
    %c0_i32 = arith.constant 0 : i32
    %c0_i32_0 = arith.constant 0 : i32
    return %arg0, %c0_i32 : i32, i32
  }
  func.func @transform_1(%arg0: i32) -> (i32, i32) {
    %c0_i32 = arith.constant 0 : i32
    %c0_i32_0 = arith.constant 0 : i32
    %c0_i32_1 = arith.constant 0 : i32
    return %c0_i32, %c0_i32_0 : i32, i32
  }
  func.func @transform_2(%arg0: i32) -> (i32, i32, i32) {
    %c0_i32 = arith.constant 0 : i32
    %c0_i32_0 = arith.constant 0 : i32
    %c0_i32_1 = arith.constant 0 : i32
    %c0_i32_2 = arith.constant 0 : i32
    return %c0_i32, %c0_i32_0, %c0_i32_1 : i32, i32, i32
  }
  func.func @transform_3(%arg0: i32) -> (i32, i32, i32) {
    %c0_i32 = arith.constant 0 : i32
    %c0_i32_0 = arith.constant 0 : i32
    %c0_i32_1 = arith.constant 0 : i32
    %c0_i32_2 = arith.constant 0 : i32
    return %c0_i32, %c0_i32_0, %c0_i32_1 : i32, i32, i32
  }
  func.func @transform_4(%arg0: i32) -> (i32, i32) {
    %c0_i32 = arith.constant 0 : i32
    %c0_i32_0 = arith.constant 0 : i32
    return %arg0, %c0_i32 : i32, i32
  }
}

</mosaic_0001>

<bundles_post_ra>
// kernel: tpu_custom_call.1
= control target key start
LH: loop header
LB: loop body
LE: loop exit
PB: predicated region body
PF: predicated region fallthrough
CT: control target
= control target key end

     0   :  { %9 = vsyncpa [#allocation3], 0  ;;  %s8565_s0 = inlined_call_operand.vmem [shape: f32[256,8], index: 0, kind: input, shape index: {}]   ;;  %s8566_s1 = inlined_call_operand.vmem [shape: f32[1,56], index: 1, kind: input, shape index: {}]   ;;  %s8567_s2 = inlined_call_operand.hbm [shape: f32[4,128,128], index: 2, kind: input, shape index: {}]   ;;  %s8568_s3 = inlined_call_operand.vmem [shape: f32[4,1,128], index: 3, kind: input, shape index: {}]   ;;  %s8569_s4 = inlined_call_operand.hbm [shape: f32[256,128], index: 4, kind: output, shape index: {}]  }
   0x1   :  { %10 = vsyncpa [#allocation4], 0 }
   0x2   :  { %12 = vsyncpa [#allocation4 + $0x1], 0  ;;  %s6154_s15 = smov 0   ;;  %s6156_s16 = smov 0  }
   0x3   :  { %s6158_s17 = smov 0   ;;  %s6160_s18 = smov 0  }
   0x4 LB: > { %s6175_s19 = sadd.s32 4294967295, %s6109_s18   ;;  %s5085_s20 = sadd.s32 4294967294, %s6109_s18   ;;  %s6109_s18 = sphi %s6160_s18, %s8791_s18   ;;  %s6105_s17 = sphi %s6158_s17, %s8790_s17   ;;  %s6101_s16 = sphi %s6156_s16, %s8789_s16   ;;  %s6097_s15 = sphi %s6154_s15, %s8788_s15  }
   0x5   : > { %s6179_s21 = sadd.s32 1, %s6109_s18   ;;  %s114_s22 = sadd.s32 1, %s6105_s17 }
   0x6   : > { %s111_s23 = ssub.s32 %s6109_s18, %s6179_s21  ;;  %p124_p0 = scmp.ne.s32.totalorder %s6105_s17, %s6101_s16 }
   0x7   : > { %p112_p1 = scmp.eq.s32.totalorder %s111_s23, 0  ;;  %p125_p2 = scmp.eq.s32.totalorder %s6175_s19, 1 }
   0x8   : > { %p130_p3 = scmp.ne.s32.totalorder %s6101_s16, %s6097_s15  ;;  %p131_p4 = scmp.eq.s32.totalorder %s5085_s20, 1 }
   0x9   : > { %s6190_s24 = scalar_select %p112_p1, %s6105_s17, %s114_s22  }
   0xa   : > { %p6192_p5 = por %p125_p2, %p124_p0  ;;  %p6196_p6 = por %p131_p4, %p130_p3 }
   0xb   : > { %p5086_p7 = scmp.ge.s32.totalorder %s6109_s18, 1  ;;  %p138_p8 = scmp.lt.s32.totalorder %s6109_s18, 3 }
   0xc   : > { %s8619_s25 = scalar_select %p6192_p5, 1, 0 }
   0xd   : > { %s8620_s26 = scalar_select %p6196_p6, 1, 0 }
   0xe   : > { %p8570_p9 = scmp.eq.s32.totalorder %s6175_s19, 0  ;;  %p6203_p10 = pnand %p5086_p7, %p138_p8 }
   0xf   : > { %s6111_s28 = smov [#allocation2]   ;;  %s6015_s7 = scalar_lea.hbm %s8567_s2, 8192 }
  0x10   : > { %s8621_s27 = scalar_select %p6203_p10, 1, 0 }
  0x11   : > { %s153_s29 = sshll.u32 %s6111_s28, 4  ;;  %p5785_p11 = pneg %p6203_p10  ;;  %s154_s29 = int_to_ptr.vmem [resolvable:$true] %s153_s29 }
  0x12   : > { %p6016_p13 = scmp.ne.s32.totalorder %s8567_s2, %s6015_s7  ;;  %p6022_p3 = scmp.lt.u32.totalorder %s6015_s7, %s8567_s2 }
  0x13   : > { %p6211_p12 = pnand %p8570_p9, %p5785_p11 }
  0x15   : > { %p6017_p0 = pneg %p6211_p12 }
  0x17   : > { %p6018_p1 = pnand %p6017_p0, %p6016_p13 }
  0x19   : > { %p6019_p2 = pneg %p6018_p1 }
  0x1b   : > { %p6024_p4 = pnand %p6022_p3, %p6019_p2 }
  0x1d   : > { %6027 = shalt.err (!%p6024_p4)
}
  0x1e   : > { %s6028_s12 = scalar_lea.vmem %s154_s29, 8192  ;;  %p6036_p9 = scmp.lt.s32.totalorder %s154_s29, %s154_s29 }
  0x1f   : > { %p6029_p7 = scmp.ne.s32.totalorder %s154_s29, %s6028_s12  ;;  %p6037_p6 = scmp.lt.s32.totalorder %s6028_s12, %s6028_s12 }
  0x21   : > { %p6031_p8 = pnand %p6029_p7, %p6017_p0  ;;  %p6038_p5 = por %p6037_p6, %p6036_p9 }
  0x23   : > { %p6032_p11 = pneg %p6031_p8 }
  0x25   : > { %p6039_p10 = pnand %p6038_p5, %p6032_p11 }
  0x27   : > { %6042 = shalt.err (!%p6039_p10)
}
  0x28   : > { %s6112_s13 = smov 128   ;;  %s6113_s14 = smov 8  }
  0x29   : > { %5788 = dma.hbm_to_vmem [thread:$0]  (!%p6211_p12), %s8567_s2, 8192, %s154_s29, [#allocation3], %s6112_s13, %s6112_s13, %s6113_s14  }
  0x2a   : > { %p8623_p13 = scmp.ne.s32.totalorder %s8621_s27, 0 }
  0x2c   : > { %181 = sbr.rel (%p8623_p13) target bundleno = 1699 (0x6a3), region = 36 }
  0x33   : > { %p8624_p1 = scmp.eq.s32.totalorder %s6175_s19, 0 }
  0x35   : > { %6088 = dma.done.wait (%p8624_p1), [#allocation3], 8192   ;;  %p8625_p0 = pmov %p8624_p1 }
  0x36   : > { %s5092_s23 = sshll.u32 %s6175_s19, 4  ;;  %s6114_s27 = smov 16   ;;  %vm8593_vm0 = vcmask 64512   ;;  %vm8595_vm1 = vcmask 130048   ;;  %vm8590_vm2 = vcmask 195584   ;;  %vm8597_vm3 = vcmask 261120  }
  0x37   : > { %6090 = vsyncadd (%p8625_p0), [#allocation3], 4294959104  ;;  %p208_p5 = scmp.lt.s32.totalorder %s5092_s23, 31  ;;  %s6115_s29 = smov 8   ;;  %vm8596_vm4 = vcmask 326656   ;;  %vm8594_vm5 = vcmask 392192  }
  0x38   : > { %s6116_s7 = smov 24   ;;  %s6117_s8 = smov 32   ;;  %v6409_v29 = vld [vmem:[%s8566_s1] ss:$0 sm:$0xff] }
  0x39   : > { %s8793_s23 = smov (!%p208_p5, %s5092_s23), 31  ;;  %s6118_s9 = smov 40  }
  0x3a   : > { %s5093_s28 = sshll.u32 %s8793_s23, 3  ;;  %s6119_s10 = smov 48  }
  0x3b   : > { %s6241_s6 = scalar_lea.vmem %s8565_s0, %s5093_s28  ;;  %s6126_s20 = smov 64  }
  0x3c   : > { %v6244_v0 = vld [vmem:[%s6241_s6] sm:$0xff]  ;;  %v6251_v1 = vld [vmem:[%s6241_s6 + $0x8] sm:$0xff]  ;;  %v6262_v2 = vld [vmem:[%s6241_s6 + $0x10] sm:$0xff]  ;;  %s5234_s11 = sshll.u32 %s6175_s19, 11  ;;  %p8786_p9 = scmp.ne.s32.totalorder %s8619_s25, 0 }
  0x3d   : > { %294 = vrot.lane.b32.xlu1 %v6244_v0, %s6114_s27  ;;  %246 = vrot.lane.b32.xlu0 %v6244_v0, %s6115_s29  ;;  %v6273_v3 = vld [vmem:[%s6241_s6 + $0x18] sm:$0xff]  ;;  %v6292_v4 = vld [vmem:[%s6241_s6 + $0x20] sm:$0xff]  ;;  %s6127_s23 = smov [#allocation5]  }
  0x3e   : > { %v6303_v5 = vld [vmem:[%s6241_s6 + $0x28] sm:$0xff]  ;;  %v6322_v6 = vld [vmem:[%s6241_s6 + $0x30] sm:$0xff]  ;;  %v6333_v7 = vld [vmem:[%s6241_s6 + $0x38] sm:$0xff]  ;;  %s6047_s28 = sshll.u32 %s6127_s23, 4  ;;  %s6048_s28 = int_to_ptr.vmem [resolvable:$false] %s6047_s28 }
  0x3f   : > { %v222_v8 = vld [vmem:[%s6241_s6 + $0x40] sm:$0xff]  ;;  %v223_v9 = vld [vmem:[%s6241_s6 + $0x48] sm:$0xff]  ;;  %v224_v10 = vld [vmem:[%s6241_s6 + $0x50] sm:$0xff]  ;;  %s6049_s5 = scalar_lea.vmem %s6048_s28, 4096 }
  0x40   : > { %v6377_v11 = vld [vmem:[%s6241_s6 + $0x58] sm:$0xff]  ;;  %v6391_v20 = vld [vmem:[%s6241_s6 + $0x60] sm:$0xff]  ;;  %v6412_v30 = vld [vmem:[%s6241_s6 + $0x68] sm:$0xff] }
  0x41   : > { %296 = vrot.lane.b32.xlu1 %v6251_v1, %s6114_s27  ;;  %248 = vrot.lane.b32.xlu0 %v6251_v1, %s6115_s29 }
  0x45   : > { %344 = vrot.lane.b32.xlu1 %v6251_v1, %s6116_s7  ;;  %342 = vrot.lane.b32.xlu0 %v6244_v0, %s6116_s7 }
  0x49   : > { %250 = vrot.lane.b32.xlu1 %v6262_v2, %s6115_s29  ;;  %390 = vrot.lane.b32.xlu0 %v6244_v0, %s6117_s8 }
  0x4d   : > { %438 = vrot.lane.b32.xlu1 %v6244_v0, %s6118_s9  ;;  %392 = vrot.lane.b32.xlu0 %v6251_v1, %s6117_s8 }
  0x51   : > { %298 = vrot.lane.b32.xlu1 %v6262_v2, %s6114_s27  ;;  %252 = vrot.lane.b32.xlu0 %v6273_v3, %s6115_s29 }
  0x55   : > { %486 = vrot.lane.b32.xlu1 %v6244_v0, %s6119_s10  ;;  %440 = vrot.lane.b32.xlu0 %v6251_v1, %s6118_s9 }
  0x59   : > { %346 = vrot.lane.b32.xlu1 %v6262_v2, %s6116_s7  ;;  %300 = vrot.lane.b32.xlu0 %v6273_v3, %s6114_s27 }
  0x5d   : > { %348 = vrot.lane.b32.xlu1 %v6273_v3, %s6116_s7  ;;  %488 = vrot.lane.b32.xlu0 %v6251_v1, %s6119_s10 }
  0x61   : > { %254 = vrot.lane.b32.xlu1 %v6292_v4, %s6115_s29  ;;  %394 = vrot.lane.b32.xlu0 %v6262_v2, %s6117_s8 }
  0x65   : > { %442 = vrot.lane.b32.xlu1 %v6262_v2, %s6118_s9  ;;  %396 = vrot.lane.b32.xlu0 %v6273_v3, %s6117_s8 }
  0x69   : > { %302 = vrot.lane.b32.xlu1 %v6292_v4, %s6114_s27  ;;  %256 = vrot.lane.b32.xlu0 %v6303_v5, %s6115_s29 }
  0x6d   : > { %490 = vrot.lane.b32.xlu1 %v6262_v2, %s6119_s10  ;;  %444 = vrot.lane.b32.xlu0 %v6273_v3, %s6118_s9 }
  0x71   : > { %350 = vrot.lane.b32.xlu1 %v6292_v4, %s6116_s7  ;;  %304 = vrot.lane.b32.xlu0 %v6303_v5, %s6114_s27 }
  0x75   : > { %352 = vrot.lane.b32.xlu1 %v6303_v5, %s6116_s7  ;;  %492 = vrot.lane.b32.xlu0 %v6273_v3, %s6119_s10 }
  0x79   : > { %258 = vrot.lane.b32.xlu1 %v6322_v6, %s6115_s29  ;;  %398 = vrot.lane.b32.xlu0 %v6292_v4, %s6117_s8 }
  0x7d   : > { %446 = vrot.lane.b32.xlu1 %v6292_v4, %s6118_s9  ;;  %400 = vrot.lane.b32.xlu0 %v6303_v5, %s6117_s8 }
  0x81   : > { %306 = vrot.lane.b32.xlu1 %v6322_v6, %s6114_s27  ;;  %260 = vrot.lane.b32.xlu0 %v6333_v7, %s6115_s29 }
  0x85   : > { %494 = vrot.lane.b32.xlu1 %v6292_v4, %s6119_s10  ;;  %448 = vrot.lane.b32.xlu0 %v6303_v5, %s6118_s9 }
  0x89   : > { %354 = vrot.lane.b32.xlu1 %v6322_v6, %s6116_s7  ;;  %308 = vrot.lane.b32.xlu0 %v6333_v7, %s6114_s27 }
  0x8d   : > { %356 = vrot.lane.b32.xlu1 %v6333_v7, %s6116_s7  ;;  %496 = vrot.lane.b32.xlu0 %v6303_v5, %s6119_s10 }
  0x91   : > { %262 = vrot.lane.b32.xlu1 %v222_v8, %s6115_s29  ;;  %402 = vrot.lane.b32.xlu0 %v6322_v6, %s6117_s8 }
  0x95   : > { %450 = vrot.lane.b32.xlu1 %v6322_v6, %s6118_s9  ;;  %404 = vrot.lane.b32.xlu0 %v6333_v7, %s6117_s8 }
  0x99   : > { %310 = vrot.lane.b32.xlu1 %v222_v8, %s6114_s27  ;;  %264 = vrot.lane.b32.xlu0 %v223_v9, %s6115_s29 }
  0x9d   : > { %498 = vrot.lane.b32.xlu1 %v6322_v6, %s6119_s10  ;;  %452 = vrot.lane.b32.xlu0 %v6333_v7, %s6118_s9 }
  0xa1   : > { %358 = vrot.lane.b32.xlu1 %v222_v8, %s6116_s7  ;;  %312 = vrot.lane.b32.xlu0 %v223_v9, %s6114_s27 }
  0xa5   : > { %360 = vrot.lane.b32.xlu1 %v223_v9, %s6116_s7  ;;  %500 = vrot.lane.b32.xlu0 %v6333_v7, %s6119_s10 }
  0xa9   : > { %266 = vrot.lane.b32.xlu1 %v224_v10, %s6115_s29  ;;  %406 = vrot.lane.b32.xlu0 %v222_v8, %s6117_s8 }
  0xad   : > { %454 = vrot.lane.b32.xlu1 %v222_v8, %s6118_s9  ;;  %408 = vrot.lane.b32.xlu0 %v223_v9, %s6117_s8 }
  0xaf   : > { %v295_v12 = vpop.permute.xlu1 %294  ;;  %v247_v13 = vpop.permute.xlu0 %246 }
  0xb0   : > { %v535_v23 = vsel %vm8593_vm0, %v6244_v0, %v247_v13 }
  0xb1   : > { %314 = vrot.lane.b32.xlu1 %v224_v10, %s6114_s27  ;;  %268 = vrot.lane.b32.xlu0 %v6377_v11, %s6115_s29  ;;  %v552_v26 = vsel %vm8595_vm1, %v535_v23, %v295_v12 }
  0xb3   : > { %v297_v14 = vpop.permute.xlu1 %296  ;;  %v249_v15 = vpop.permute.xlu0 %248 }
  0xb4   : > { %v536_v35 = vsel %vm8593_vm0, %v6251_v1, %v249_v15  ;;  %v6463_v1 = vld [vmem:[%s6241_s6 + $0x70] sm:$0xff]  ;;  %v8581_v15 = vmov 2475754826  }
  0xb5   : > { %502 = vrot.lane.b32.xlu1 %v222_v8, %s6119_s10  ;;  %456 = vrot.lane.b32.xlu0 %v223_v9, %s6118_s9  ;;  %v553_v41 = vsel %vm8595_vm1, %v536_v35, %v297_v14  ;;  %v8584_v14 = vmov 683565275  }
  0xb7   : > { %v345_v16 = vpop.permute.xlu1 %344  ;;  %v343_v17 = vpop.permute.xlu0 %342 }
  0xb8   : > { %v569_v27 = vsel %vm8590_vm2, %v552_v26, %v343_v17  ;;  %v570_v42 = vsel %vm8590_vm2, %v553_v41, %v345_v16  ;;  %v8579_v17 = vmov 2131351028   ;;  %v8588_v26 = vmov 920167782  }
  0xb9   : > { %362 = vrot.lane.b32.xlu1 %v224_v10, %s6116_s7  ;;  %316 = vrot.lane.b32.xlu0 %v6377_v11, %s6114_s27 }
  0xbb   : > { %v251_v18 = vpop.permute.xlu1 %250  ;;  %v391_v19 = vpop.permute.xlu0 %390 }
  0xbc   : > { %v586_v28 = vsel %vm8597_vm3, %v569_v27, %v391_v19  ;;  %v537_v58 = vsel %vm8593_vm0, %v6262_v2, %v251_v18  ;;  %v8577_v19 = vmov 2102212464  }
  0xbd   : > { %364 = vrot.lane.b32.xlu1 %v6377_v11, %s6116_s7  ;;  %504 = vrot.lane.b32.xlu0 %v223_v9, %s6119_s10 }
  0xbf   : > { %v439_v21 = vpop.permute.xlu1 %438  ;;  %v393_v22 = vpop.permute.xlu0 %392 }
  0xc0   : > { %v603_v31 = vsel %vm8596_vm4, %v586_v28, %v439_v21  ;;  %v587_v44 = vsel %vm8597_vm3, %v570_v42, %v393_v22 }
  0xc1   : > { %270 = vrot.lane.b32.xlu1 %v6391_v20, %s6115_s29  ;;  %410 = vrot.lane.b32.xlu0 %v224_v10, %s6117_s8 }
  0xc3   : > { %v299_v24 = vpop.permute.xlu1 %298  ;;  %v6398_v25 = vpop.permute.xlu0 %252 }
  0xc4   : > { %v554_v60 = vsel %vm8595_vm1, %v537_v58, %v299_v24 }
  0xc5   : > { %458 = vrot.lane.b32.xlu1 %v224_v10, %s6118_s9  ;;  %412 = vrot.lane.b32.xlu0 %v6377_v11, %s6117_s8 }
  0xc7   : > { %v487_v32 = vpop.permute.xlu1 %486  ;;  %v441_v33 = vpop.permute.xlu0 %440 }
  0xc8   : > { %v620_v34 = vsel %vm8594_vm5, %v603_v31, %v487_v32  ;;  %v604_v47 = vsel %vm8596_vm4, %v587_v44, %v441_v33  ;;  %v8591_v32 = vmov 1326507024  }
  0xc9   : > { %v6419_v36 = vmul.f32 %v6409_v29, %v620_v34  ;;  %318 = vrot.lane.b32.xlu1 %v6391_v20, %s6114_s27  ;;  %272 = vrot.lane.b32.xlu0 %v6412_v30, %s6115_s29 }
  0xcb   : > { %v659_v37 = vand.u32 2147483647, %v6419_v36  ;;  %v662_v38 = vand.u32 2139095040, %v6419_v36  ;;  %v347_v39 = vpop.permute.xlu1 %346  ;;  %v6427_v40 = vpop.permute.xlu0 %300 }
  0xcc   : > { %v571_v0 = vsel %vm8590_vm2, %v554_v60, %v347_v39 }
  0xcd   : > { %v663_v43 = vshrl.u32 %v662_v38, 23  ;;  %506 = vrot.lane.b32.xlu1 %v224_v10, %s6119_s10  ;;  %460 = vrot.lane.b32.xlu0 %v6377_v11, %s6118_s9  ;;  %v666_v45 = vand.u32 8388607, %v659_v37 }
  0xcf   : > { %v5095_v46 = vadd.s32 4294967169, %v663_v43  ;;  %v6438_v48 = vpop.permute.xlu1 %348  ;;  %v489_v49 = vpop.permute.xlu0 %488  ;;  %v667_v53 = vor.u32 8388608, %v666_v45 }
  0xd0   : > { %v621_v50 = vsel %vm8594_vm5, %v604_v47, %v489_v49 }
  0xd1   : > { %v669_v51 = vadd.s32 1, %v5095_v46  ;;  %v6442_v52 = vmul.f32 %v6409_v29, %v621_v50  ;;  %366 = vrot.lane.b32.xlu1 %v6391_v20, %s6116_s7  ;;  %320 = vrot.lane.b32.xlu0 %v6412_v30, %s6114_s27  ;;  %v6459_v63 = vshll.u32 %v667_v53, 8 }
  0xd3   : > { %vm670_vm6 = vcmp.gt.s32.totalorder %v669_v51, 0  ;;  %v8575_v54 = vand.u32 2147483647, %v6442_v52  ;;  %v766_v55 = vand.u32 2139095040, %v6442_v52  ;;  %v6450_v56 = vpop.permute.xlu1 %254  ;;  %v395_v57 = vpop.permute.xlu0 %394 }
  0xd4   : > { %v671_v59 = vsel %vm670_vm6, %v669_v51, 0  ;;  %v588_v10 = vsel %vm8597_vm3, %v571_v0, %v395_v57 }
  0xd5   : > { %v673_v61 = vand.u32 31, %v671_v59  ;;  %368 = vrot.lane.b32.xlu1 %v6412_v30, %s6116_s7  ;;  %508 = vrot.lane.b32.xlu0 %v6377_v11, %s6119_s10  ;;  %v672_v62 = vshrl.u32 %v671_v59, 5  ;;  %v767_v9 = vshrl.u32 %v766_v55, 23  ;;  %v6467_v2 = vand.u32 8388607, %v8575_v54 }
  0xd7   : > { %v674_v8 = vsub.s32 32, %v673_v61  ;;  %v443_v12 = vpop.permute.xlu1 %442  ;;  %v6470_v13 = vpop.permute.xlu0 %396  ;;  %v676_v11 = vshll.u32 %v8584_v14, %v673_v61  ;;  %v679_v16 = vshll.u32 %v8581_v15, %v673_v61  ;;  %v682_v18 = vshll.u32 %v8579_v17, %v673_v61 }
  0xd8   : > { %v685_v21 = vshll.u32 %v8577_v19, %v673_v61  ;;  %v688_v27 = vshll.u32 %v8588_v26, %v673_v61  ;;  %vm691_vm7 = vcmp.lt.s32.totalorder %v672_v62, 1  ;;  %v5099_v39 = vadd.s32 4294967169, %v767_v9  ;;  %v6497_v61 = vld [vmem:[%s6241_s6 + $0x78] sm:$0xff] }
  0xd9   : > { %v677_v22 = vshrl.u32 %v8581_v15, %v674_v8  ;;  %v680_v23 = vshrl.u32 %v8579_v17, %v674_v8  ;;  %v683_v24 = vshrl.u32 %v8577_v19, %v674_v8  ;;  %274 = vrot.lane.b32.xlu1 %v6463_v1, %s6115_s29  ;;  %v675_v28 = vshrl.u32 %v8584_v14, %v674_v8 }
  0xda   : > { %v686_v31 = vshrl.u32 %v8588_v26, %v674_v8  ;;  %v689_v33 = vshrl.u32 %v8591_v32, %v674_v8  ;;  %414 = vrot.lane.b32.xlu0 %v6391_v20, %s6117_s8  ;;  %vm693_vm8 = vcmp.lt.s32.totalorder %v672_v62, 3  ;;  %vm694_vm9 = vcmp.lt.s32.totalorder %v672_v62, 4 }
  0xdb   : > { %v678_v34 = vor.u32 %v677_v22, %v676_v11  ;;  %v681_v35 = vor.u32 %v680_v23, %v679_v16  ;;  %v684_v38 = vor.u32 %v683_v24, %v682_v18  ;;  %v6487_v41 = vpop.permute.xlu1 %302  ;;  %v6489_v42 = vpop.permute.xlu0 %256  ;;  %v773_v55 = vadd.s32 1, %v5099_v39 }
  0xdc   : > { %v687_v43 = vor.u32 %v686_v31, %v685_v21  ;;  %v690_v44 = vor.u32 %v689_v33, %v688_v27  ;;  %vm692_vm10 = vcmp.lt.s32.totalorder %v672_v62, 2  ;;  %v771_v59 = vor.u32 8388608, %v6467_v2 }
  0xdd   : > { %v695_v45 = vsel %vm691_vm7, %v675_v28, %v678_v34  ;;  %v696_v46 = vsel %vm694_vm9, %v684_v38, 2102212464  ;;  %v699_v47 = vsel %vm691_vm7, %v678_v34, %v681_v35  ;;  %v703_v49 = vsel %vm691_vm7, %v681_v35, %v684_v38  ;;  %462 = vrot.lane.b32.xlu1 %v6391_v20, %s6118_s9 }
  0xde   : > { %v697_v50 = vsel %vm693_vm8, %v681_v35, %v696_v46  ;;  %v700_v51 = vsel %vm694_vm9, %v687_v43, 920167782  ;;  %v704_v53 = vsel %vm694_vm9, %v690_v44, 1326507024  ;;  %416 = vrot.lane.b32.xlu0 %v6412_v30, %s6117_s8  ;;  %vm774_vm11 = vcmp.gt.s32.totalorder %v773_v55, 0 }
  0xdf   : > { %v701_v57 = vsel %vm693_vm8, %v684_v38, %v700_v51  ;;  %v705_v58 = vsel %vm693_vm8, %v687_v43, %v704_v53  ;;  %v491_v60 = vpop.permute.xlu1 %490  ;;  %v698_v0 = vsel %vm692_vm10, %v695_v45, %v697_v50  ;;  %v6499_v11 = vpop.permute.xlu0 %444  ;;  %v775_v2 = vsel %vm774_vm11, %v773_v55, 0 }
  0xe0   : > { %v702_v8 = vsel %vm692_vm10, %v699_v47, %v701_v57  ;;  %v706_v9 = vsel %vm692_vm10, %v703_v49, %v705_v58  ;;  %v605_v22 = vsel %vm8596_vm4, %v588_v10, %v443_v12  ;;  %v777_v23 = vand.u32 31, %v775_v2 }
  0xe1   : > { %v6502_v16 = vmul.u32.u64.low %v6459_v63, %v706_v9  ;;  %v6503_v18 = vmul.u32.u64.high %v6459_v63, %v706_v9, %v6502_v16  ;;  %v6506_v21 = vmul.u32.u64.low %v6459_v63, %v702_v8  ;;  %v6507_v62 = vmul.u32.u64.high %v6459_v63, %v702_v8, %v6506_v21  ;;  %322 = vrot.lane.b32.xlu1 %v6463_v1, %s6114_s27 }
  0xe2   : > { %276 = vrot.lane.b32.xlu0 %v6497_v61, %s6115_s29  ;;  %v622_v24 = vsel %vm8594_vm5, %v605_v22, %v491_v60  ;;  %v714_v28 = vmul.u32 %v6459_v63, %v698_v0  ;;  %v6519_v31 = vshll.u32 %v771_v59, 8  ;;  %v776_v34 = vshrl.u32 %v775_v2, 5 }
  0xe3   : > { %v6516_v27 = vpop.permute.xlu1 %350  ;;  %vm716_vm12 = vc.u32 %v6503_v18, %v6506_v21  ;;  %v717_v33 = vadd.s32 1, %v6507_v62  ;;  %v778_v35 = vsub.s32 32, %v777_v23  ;;  %v780_v10 = vshll.u32 %v8584_v14, %v777_v23  ;;  %v6532_v39 = vpop.permute.xlu0 %304 }
  0xe4   : > { %v783_v12 = vshll.u32 %v8581_v15, %v777_v23  ;;  %v786_v38 = vshll.u32 %v8579_v17, %v777_v23  ;;  %v6530_v63 = vmul.f32 %v6409_v29, %v622_v24  ;;  %v789_v45 = vshll.u32 %v8577_v19, %v777_v23 }
  0xe5   : > { %510 = vrot.lane.b32.xlu1 %v6391_v20, %s6119_s10  ;;  %v718_v43 = vsel %vm716_vm12, %v717_v33, %v6507_v62  ;;  %v781_v44 = vshrl.u32 %v8581_v15, %v778_v35  ;;  %v784_v20 = vshrl.u32 %v8579_v17, %v778_v35  ;;  %v779_v49 = vshrl.u32 %v8584_v14, %v778_v35 }
  0xe6   : > { %8626 = vst [vmem:[#allocation8_spill] sm:$0xff] %v6530_v63  ;;  %464 = vrot.lane.b32.xlu0 %v6412_v30, %s6118_s9  ;;  %v719_v47 = vadd.s32 %v718_v43, %v714_v28  ;;  %v787_v50 = vshrl.u32 %v8577_v19, %v778_v35  ;;  %v790_v51 = vshrl.u32 %v8588_v26, %v778_v35  ;;  %vm795_vm13 = vcmp.lt.s32.totalorder %v776_v34, 1 }
  0xe7   : > { %v6540_v46 = vpop.permute.xlu1 %352  ;;  %v782_v53 = vor.u32 %v781_v44, %v780_v10  ;;  %v785_v55 = vor.u32 %v784_v20, %v783_v12  ;;  %v792_v57 = vshll.u32 %v8588_v26, %v777_v23  ;;  %v793_v58 = vshrl.u32 %v8591_v32, %v778_v35  ;;  %v493_v23 = vpop.permute.xlu0 %492 }
  0xe8   : > { %v720_v59 = vadd.s32 536870912, %v719_v47  ;;  %v788_v60 = vor.u32 %v787_v50, %v786_v38  ;;  %v791_v0 = vor.u32 %v790_v51, %v789_v45  ;;  %vm796_vm14 = vcmp.lt.s32.totalorder %v776_v34, 2 }
  0xe9   : > { %370 = vrot.lane.b32.xlu1 %v6463_v1, %s6116_s7  ;;  %v794_v8 = vor.u32 %v793_v58, %v792_v57  ;;  %vm797_vm15 = vcmp.lt.s32.totalorder %v776_v34, 3  ;;  %vm798_vm6 = vcmp.lt.s32.totalorder %v776_v34, 4  ;;  %v803_v2 = vsel %vm795_vm13, %v782_v53, %v785_v55 }
  0xea   : > { %324 = vrot.lane.b32.xlu0 %v6497_v61, %s6114_s27  ;;  %v6551_v16 = vshrl.u32 %v720_v59, 30  ;;  %v800_v62 = vsel %vm798_vm6, %v788_v60, 2102212464  ;;  %v804_v22 = vsel %vm798_vm6, %v791_v0, 920167782  ;;  %v799_v24 = vsel %vm795_vm13, %v779_v49, %v782_v53  ;;  %s204_s27 = sand.u32 1, %s6101_s16  }
  0xeb   : > { %v259_v9 = vpop.permute.xlu1 %258  ;;  %v805_v28 = vsel %vm797_vm15, %v788_v60, %v804_v22  ;;  %v807_v33 = vsel %vm795_vm13, %v785_v55, %v788_v60  ;;  %v808_v35 = vsel %vm798_vm6, %v794_v8, 1326507024  ;;  %v801_v12 = vsel %vm797_vm15, %v785_v55, %v800_v62  ;;  %v6586_v59 = vpop.permute.xlu0 %398  ;;  %s8523_s22 = scalar_lea.sflag [#allocation4], %s204_s27 }
  0xec   : > { %v722_v10 = vshll.u32 %v6551_v16, 30  ;;  %v806_v38 = vsel %vm796_vm14, %v803_v2, %v805_v28  ;;  %v809_v43 = vsel %vm797_vm15, %v791_v0, %v808_v35  ;;  %v538_v55 = vsel %vm8593_vm0, %v6273_v3, %v6398_v25 }
  0xed   : > { %372 = vrot.lane.b32.xlu1 %v6497_v61, %s6116_s7  ;;  %v810_v44 = vsel %vm796_vm14, %v807_v33, %v809_v43  ;;  %v6564_v20 = vmul.u32.u64.low %v6519_v31, %v806_v38  ;;  %v6565_v45 = vmul.u32.u64.high %v6519_v31, %v806_v38, %v6564_v20  ;;  %v870_v57 = vand.u32 2139095040, %v6530_v63  ;;  %s5091_s7 = sshll.u32 %s204_s27, 7 }
  0xee   : > { %512 = vrot.lane.b32.xlu0 %v6412_v30, %s6119_s10  ;;  %v6568_v49 = vsub.s32 %v719_v47, %v722_v10  ;;  %v6571_v50 = vmul.u32.u64.low %v6519_v31, %v810_v44  ;;  %v6572_v51 = vmul.u32.u64.high %v6519_v31, %v810_v44, %v6571_v50  ;;  %v802_v30 = vsel %vm796_vm14, %v799_v24, %v801_v12 }
  0xef   : > { %v6574_v53 = vpop.permute.xlu1 %446  ;;  %v555_v58 = vsel %vm8595_vm1, %v538_v55, %v6427_v40  ;;  %v821_v25 = vadd.s32 1, %v6565_v45  ;;  %v871_v34 = vshrl.u32 %v870_v57, 23  ;;  %v818_v0 = vmul.u32 %v6519_v31, %v802_v30  ;;  %v6610_v10 = vpop.permute.xlu0 %400 }
  0xf0   : > { %v725_v47 = vsub.s32 0, %v6568_v49  ;;  %v572_v3 = vsel %vm8590_vm2, %v555_v58, %v6438_v48  ;;  %vm820_vm7 = vc.u32 %v6572_v51, %v6564_v20  ;;  %v867_v62 = vand.u32 2147483647, %v6530_v63 }
  0xf1   : > { %420 = vrot.lane.b32.xlu1 %v6497_v61, %s6117_s8  ;;  %v589_v40 = vsel %vm8597_vm3, %v572_v3, %v6470_v13  ;;  %v822_v8 = vsel %vm820_vm7, %v821_v25, %v6565_v45  ;;  %v5103_v2 = vadd.s32 4294967169, %v871_v34  ;;  %v541_v35 = vsel %vm8593_vm0, %v6322_v6, %v259_v9 }
  0xf2   : > { %418 = vrot.lane.b32.xlu0 %v6463_v1, %s6117_s8  ;;  %v5096_v60 = vmin.u32 %v725_v47, %v6568_v49  ;;  %v606_v48 = vsel %vm8596_vm4, %v589_v40, %v6499_v11  ;;  %v823_v24 = vadd.s32 %v822_v8, %v818_v0  ;;  %v874_v11 = vand.u32 8388607, %v867_v62 }
  0xf3   : > { %v623_v31 = vsel %vm8594_vm5, %v606_v48, %v493_v23  ;;  %v307_v28 = vpop.permute.xlu1 %306  ;;  %v877_v13 = vadd.s32 1, %v5103_v2  ;;  %v539_v6 = vsel %vm8593_vm0, %v6292_v4, %v6450_v56  ;;  %v261_v58 = vpop.permute.xlu0 %260 }
  0xf4   : > { %v727_v22 = vclz %v5096_v60  ;;  %v824_v33 = vadd.s32 536870912, %v823_v24  ;;  %v6615_v12 = vmul.f32 %v6409_v29, %v623_v31  ;;  %v6618_v23 = vsel %vm8595_vm1, %v541_v35, %v307_v28 }
  0xf5   : > { %468 = vrot.lane.b32.xlu1 %v6497_v61, %s6118_s9  ;;  %vm878_vm8 = vcmp.gt.s32.totalorder %v877_v13, 0  ;;  %v556_v44 = vsel %vm8595_vm1, %v539_v6, %v6487_v41  ;;  %v875_v30 = vor.u32 8388608, %v874_v11 }
  0xf6   : > { %466 = vrot.lane.b32.xlu0 %v6463_v1, %s6118_s9  ;;  %8627 = vst [vmem:[#allocation9_spill] sm:$0xff] %v6615_v12  ;;  %v5097_v38 = vadd.s32 4294967294, %v727_v22  ;;  %v6622_v43 = vshrl.u32 %v824_v33, 30  ;;  %v879_v9 = vsel %vm878_vm8, %v877_v13, 0  ;;  %v6637_v55 = vsel %vm8590_vm2, %v556_v44, %v6516_v27 }
  0xf7   : > { %v881_v45 = vand.u32 31, %v879_v9  ;;  %v971_v56 = vand.u32 2147483647, %v6615_v12  ;;  %v880_v41 = vshrl.u32 %v879_v9, 5  ;;  %v6652_v2 = vshll.u32 %v875_v30, 8 }
  0xf8   : > { %v826_v50 = vshll.u32 %v6622_v43, 30  ;;  %vm5098_vm9 = vcmp.lt.s32.totalorder %v5097_v38, 0 }
  0xf9   : > { %516 = vrot.lane.b32.xlu1 %v6497_v61, %s6119_s10  ;;  %v540_v61 = vsel %vm8593_vm0, %v6303_v5, %v6489_v42  ;;  %v882_v4 = vsub.s32 32, %v881_v45  ;;  %v884_v47 = vshll.u32 %v8584_v14, %v881_v45  ;;  %v887_v5 = vshll.u32 %v8581_v15, %v881_v45 }
  0xfa   : > { %514 = vrot.lane.b32.xlu0 %v6463_v1, %s6119_s10  ;;  %v974_v1 = vand.u32 2139095040, %v6615_v12  ;;  %v6641_v57 = vsub.s32 %v823_v24, %v826_v50  ;;  %v890_v34 = vshll.u32 %v8579_v17, %v881_v45  ;;  %v893_v60 = vshll.u32 %v8577_v19, %v881_v45  ;;  %s8494_s10 = scalar_lea.vmem [#allocation5], %s5091_s7 }
  0xfb   : > { %v885_v3 = vshrl.u32 %v8581_v15, %v882_v4  ;;  %v888_v42 = vshrl.u32 %v8579_v17, %v882_v4  ;;  %v891_v27 = vshrl.u32 %v8577_v19, %v882_v4  ;;  %v894_v0 = vshrl.u32 %v8588_v26, %v882_v4  ;;  %s5011_s12 = sshll.u32 %s8494_s10, 4  ;;  %s8517_s12 = int_to_ptr.vmem [resolvable:$true] %s5011_s12 }
  0xfc   : > { %v829_v25 = vsub.s32 0, %v6641_v57  ;;  %v557_v48 = vsel %vm8595_vm1, %v540_v61, %v6532_v39  ;;  %v978_v28 = vand.u32 8388607, %v971_v56  ;;  %v6660_v13 = vsel %vm5098_vm9, 0, %v5097_v38  ;;  %v6665_v39 = vpop.permute.xlu0 %448  ;;  %s6043_s19 = scalar_lea.vmem %s8517_s12, 2048  ;;  %p6050_p2 = scmp.lt.s32.totalorder %s8517_s12, %s6048_s28 }
  0xfd   : > { %v886_v40 = vor.u32 %v885_v3, %v884_v47  ;;  %v889_v8 = vor.u32 %v888_v42, %v887_v5  ;;  %v892_v24 = vor.u32 %v891_v27, %v890_v34  ;;  %v895_v31 = vor.u32 %v894_v0, %v893_v60  ;;  %p6044_p6 = scmp.ne.s32.totalorder %s8517_s12, %s6043_s19  ;;  %p6051_p3 = scmp.lt.s32.totalorder %s6049_s5, %s6043_s19 }
  0xfe   : > { %v5100_v22 = vmin.u32 %v829_v25, %v6641_v57  ;;  %v896_v33 = vshll.u32 %v8588_v26, %v881_v45  ;;  %v897_v35 = vshrl.u32 %v8591_v32, %v882_v4  ;;  %v975_v11 = vshrl.u32 %v974_v1, 23 }
  0xff   : > { %v883_v9 = vshrl.u32 %v8584_v14, %v882_v4  ;;  %vm899_vm10 = vcmp.lt.s32.totalorder %v880_v41, 1  ;;  %vm902_vm11 = vcmp.lt.s32.totalorder %v880_v41, 4  ;;  %vm901_vm12 = vcmp.lt.s32.totalorder %v880_v41, 3  ;;  %p6045_p10 = pnand %p6044_p6, %p8786_p9  ;;  %p6052_p4 = por %p6051_p3, %p6050_p2 }
 0x100   : > { %v831_v6 = vclz %v5100_v22  ;;  %v898_v44 = vor.u32 %v897_v35, %v896_v33  ;;  %v907_v50 = vsel %vm899_vm10, %v886_v40, %v889_v8  ;;  %v908_v61 = vsel %vm902_vm11, %v895_v31, 920167782 }
 0x101   : > { %vm900_vm13 = vcmp.lt.s32.totalorder %v880_v41, 2  ;;  %v904_v38 = vsel %vm902_vm11, %v892_v24, 2102212464  ;;  %v909_v47 = vsel %vm901_vm12, %v892_v24, %v908_v61  ;;  %v911_v1 = vsel %vm899_vm10, %v889_v8, %v892_v24  ;;  %v495_v61 = vpop.permute.xlu1 %494  ;;  %p6046_p12 = pneg %p6045_p10 }
 0x102   : > { %v5101_v30 = vadd.s32 4294967294, %v831_v6  ;;  %v910_v45 = vsel %vm900_vm13, %v907_v50, %v909_v47  ;;  %v912_v3 = vsel %vm902_vm11, %v898_v44, 1326507024  ;;  %v5107_v5 = vadd.s32 4294967169, %v975_v11 }
 0x103   : > { %v735_v4 = vsub.s32 4294967266, %v6660_v13  ;;  %v903_v42 = vsel %vm899_vm10, %v883_v9, %v886_v40  ;;  %v913_v27 = vsel %vm901_vm12, %v895_v31, %v912_v3  ;;  %v905_v25 = vsel %vm901_vm12, %v889_v8, %v904_v38  ;;  %v309_v40 = vpop.permute.xlu0 %308  ;;  %p6053_p7 = pnand %p6052_p4, %p6046_p12 }
 0x104   : > { %vm5102_vm14 = vcmp.lt.s32.totalorder %v5101_v30, 0  ;;  %v914_v34 = vsel %vm900_vm13, %v911_v1, %v913_v27  ;;  %v6674_v60 = vmul.u32.u64.low %v6652_v2, %v910_v45  ;;  %v6675_v0 = vmul.u32.u64.high %v6652_v2, %v910_v45, %v6674_v60 }
 0x105   : > { %v715_v22 = vadd.s32 %v6506_v21, %v6503_v18  ;;  %v6680_v24 = vsel %vm5102_vm14, 0, %v5101_v30  ;;  %v6684_v33 = vsel %vm8590_vm2, %v557_v48, %v6540_v46  ;;  %v979_v35 = vor.u32 8388608, %v978_v28 }
 0x106   : > { %v6687_v8 = vmul.u32.u64.low %v6652_v2, %v914_v34  ;;  %v6688_v31 = vmul.u32.u64.high %v6652_v2, %v914_v34, %v6687_v8  ;;  %v981_v11 = vadd.s32 1, %v5107_v5  ;;  %v590_v6 = vsel %vm8597_vm3, %v6637_v55, %v6586_v59 }
 0x107   : > { %v731_v9 = vsub.s32 32, %v6660_v13  ;;  %v736_v18 = vadd.s32 127, %v735_v4  ;;  %v906_v21 = vsel %vm900_vm13, %v903_v42, %v905_v25  ;;  %v542_v46 = vsel %vm8593_vm0, %v6333_v7, %v261_v58 }
 0x108   : > { %v839_v48 = vsub.s32 4294967266, %v6680_v24  ;;  %v925_v28 = vadd.s32 1, %v6675_v0  ;;  %vm982_vm15 = vcmp.gt.s32.totalorder %v981_v11, 0  ;;  %v6700_v44 = vsel %vm8595_vm1, %v542_v46, %v309_v40 }
 0x109   : > { %v819_v50 = vadd.s32 %v6564_v20, %v6572_v51  ;;  %v983_v59 = vsel %vm982_vm15, %v981_v11, 0  ;;  %v6704_v55 = vshll.u32 %v979_v35, 8  ;;  %v607_v41 = vsel %vm8596_vm4, %v590_v6, %v6574_v53 }
 0x10a   : > { %v732_v7 = vshll.u32 %v6568_v49, %v6660_v13  ;;  %v922_v58 = vmul.u32 %v6652_v2, %v906_v21  ;;  %vm924_vm6 = vc.u32 %v6688_v31, %v6674_v60  ;;  %v985_v30 = vand.u32 31, %v983_v59 }
 0x10b   : > { %v733_v38 = vshrl.u32 %v715_v22, %v731_v9  ;;  %v737_v47 = vshll.u32 %v736_v18, 23  ;;  %v835_v20 = vsub.s32 32, %v6680_v24  ;;  %v926_v51 = vsel %vm924_vm6, %v925_v28, %v6675_v0 }
 0x10c   : > { %v840_v45 = vadd.s32 127, %v839_v48  ;;  %v927_v1 = vadd.s32 %v926_v51, %v922_v58  ;;  %v986_v3 = vsub.s32 32, %v985_v30  ;;  %v624_v53 = vsel %vm8594_vm5, %v607_v41, %v495_v61 }
 0x10d   : > { %v984_v5 = vshrl.u32 %v983_v59, 5  ;;  %v988_v49 = vshll.u32 %v8584_v14, %v985_v30  ;;  %v991_v2 = vshll.u32 %v8581_v15, %v985_v30  ;;  %v994_v13 = vshll.u32 %v8579_v17, %v985_v30 }
 0x10e   : > { %v928_v4 = vadd.s32 536870912, %v927_v1  ;;  %v989_v42 = vshrl.u32 %v8581_v15, %v986_v3  ;;  %v992_v27 = vshrl.u32 %v8579_v17, %v986_v3  ;;  %v997_v25 = vshll.u32 %v8577_v19, %v985_v30 }
 0x10f   : > { %v995_v34 = vshrl.u32 %v8577_v19, %v986_v3  ;;  %v998_v0 = vshrl.u32 %v8588_v26, %v986_v3  ;;  %v1000_v22 = vshll.u32 %v8588_v26, %v985_v30  ;;  %v1001_v35 = vshrl.u32 %v8591_v32, %v986_v3 }
 0x110   : > { %v6726_v40 = vor.u32 4788187, %v737_v47  ;;  %v6728_v8 = vshrl.u32 %v928_v4, 30  ;;  %v990_v11 = vor.u32 %v989_v42, %v988_v49  ;;  %v993_v6 = vor.u32 %v992_v27, %v991_v2  ;;  %v355_v27 = vpop.permute.xlu1 %354 }
 0x111   : > { %v837_v9 = vshrl.u32 %v819_v50, %v835_v20  ;;  %v996_v18 = vor.u32 %v995_v34, %v994_v13  ;;  %v999_v21 = vor.u32 %v998_v0, %v997_v25  ;;  %v1002_v46 = vor.u32 %v1001_v35, %v1000_v22  ;;  %v497_v35 = vpop.permute.xlu0 %496 }
 0x112   : > { %v841_v48 = vshll.u32 %v840_v45, 23  ;;  %v930_v28 = vshll.u32 %v6728_v8, 30  ;;  %vm1003_vm7 = vcmp.lt.s32.totalorder %v984_v5, 1  ;;  %v6732_v59 = vmul.f32 %v6409_v29, %v624_v53 }
 0x113   : > { %v987_v41 = vshrl.u32 %v8584_v14, %v986_v3  ;;  %vm1004_vm8 = vcmp.lt.s32.totalorder %v984_v5, 2  ;;  %vm1006_vm9 = vcmp.lt.s32.totalorder %v984_v5, 4  ;;  %v1011_v61 = vsel %vm1003_vm7, %v990_v11, %v993_v6 }
 0x114   : > { %8628 = vst [vmem:[#allocation10_spill] sm:$0xff] %v6732_v59  ;;  %v6735_v58 = vsub.s32 %v927_v1, %v930_v28  ;;  %vm1005_vm10 = vcmp.lt.s32.totalorder %v984_v5, 3  ;;  %v1008_v30 = vsel %vm1006_vm9, %v996_v18, 2102212464  ;;  %v1012_v50 = vsel %vm1006_vm9, %v999_v21, 920167782 }
 0x115   : > { %v1007_v47 = vsel %vm1003_vm7, %v987_v41, %v990_v11  ;;  %v1013_v20 = vsel %vm1005_vm10, %v996_v18, %v1012_v50  ;;  %v1015_v51 = vsel %vm1003_vm7, %v993_v6, %v996_v18  ;;  %v1016_v45 = vsel %vm1006_vm9, %v1002_v46, 1326507024 }
 0x116   : > { %v933_v49 = vsub.s32 0, %v6735_v58  ;;  %v1009_v2 = vsel %vm1005_vm10, %v993_v6, %v1008_v30  ;;  %v1014_v53 = vsel %vm1004_vm8, %v1011_v61, %v1013_v20  ;;  %v1017_v13 = vsel %vm1005_vm10, %v999_v21, %v1016_v45  ;;  %v6767_v30 = vpop.permute.xlu1 %356 }
 0x117   : > { %v836_v3 = vshll.u32 %v6641_v57, %v6680_v24  ;;  %v1018_v4 = vsel %vm1004_vm8, %v1015_v51, %v1017_v13  ;;  %v6743_v1 = vmul.u32.u64.low %v6704_v55, %v1014_v53  ;;  %v6744_v42 = vmul.u32.u64.high %v6704_v55, %v1014_v53, %v6743_v1 }
 0x118   : > { %v842_v25 = vor.u32 4788187, %v841_v48  ;;  %v5104_v34 = vmin.u32 %v933_v49, %v6735_v58  ;;  %v6749_v0 = vmul.u32.u64.low %v6704_v55, %v1018_v4  ;;  %v6750_v22 = vmul.u32.u64.high %v6704_v55, %v1018_v4, %v6749_v0 }
 0x119   : > { %v734_v11 = vor.u32 %v733_v38, %v732_v7  ;;  %v1010_v6 = vsel %vm1004_vm8, %v1007_v47, %v1009_v2  ;;  %v591_v57 = vsel %vm8597_vm3, %v6684_v33, %v6610_v10  ;;  %v1078_v24 = vand.u32 2139095040, %v6732_v59 }
 0x11a   : > { %v739_v18 = vand.u32 2147483647, %v6726_v40  ;;  %v838_v21 = vor.u32 %v837_v9, %v836_v3  ;;  %v935_v46 = vclz %v5104_v34  ;;  %v608_v48 = vsel %vm8596_vm4, %v591_v57, %v6665_v39  ;;  %v6789_v34 = vpop.permute.xlu1 %262 }
 0x11b   : > { %v1029_v28 = vadd.s32 1, %v6744_v42  ;;  %v8573_v41 = vand.u32 2147483647, %v6732_v59  ;;  %v1079_v7 = vshrl.u32 %v1078_v24, 23  ;;  %v625_v38 = vsel %vm8594_vm5, %v608_v48, %v497_v35 }
 0x11c   : > { %v843_v5 = vand.u32 2147483647, %v842_v25  ;;  %v5105_v61 = vadd.s32 4294967294, %v935_v46  ;;  %v1026_v10 = vmul.u32 %v6704_v55, %v1010_v6  ;;  %vm1028_vm11 = vc.u32 %v6750_v22, %v6743_v1 }
 0x11d   : > { %v741_v33 = vcvt.s32.f32 %v734_v11  ;;  %v1030_v40 = vsel %vm1028_vm11, %v1029_v28, %v6744_v42  ;;  %v5111_v9 = vadd.s32 4294967169, %v1079_v7  ;;  %v845_v39 = vcvt.s32.f32 %v838_v21 }
 0x11e   : > { %vm5106_vm12 = vcmp.lt.s32.totalorder %v5105_v61, 0  ;;  %v1031_v50 = vadd.s32 %v1030_v40, %v1026_v10  ;;  %v6770_v47 = vmul.f32 %v6409_v29, %v625_v38  ;;  %v1082_v2 = vand.u32 8388607, %v8573_v41  ;;  %v403_v38 = vpop.permute.xlu0 %402 }
 0x11f   : > { %v6772_v20 = vmul.f32 %v741_v33, %v739_v18  ;;  %v6774_v51 = vsel %vm5106_vm12, 0, %v5105_v61  ;;  %v1085_v55 = vadd.s32 1, %v5111_v9  ;;  %v6776_v45 = vmul.f32 %v845_v39, %v843_v5 }
 0x120   : > { %8629 = vst [vmem:[#allocation11_spill] sm:$0xff] %v6770_v47  ;;  %v1032_v49 = vadd.s32 536870912, %v1031_v50  ;;  %v943_v53 = vsub.s32 4294967266, %v6774_v51  ;;  %v1182_v29 = vand.u32 2139095040, %v6770_v47  ;;  %v6787_v25 = vsel %vm8590_vm2, %v6618_v23, %v355_v27 }
 0x121   : > { %vm1086_vm13 = vcmp.gt.s32.totalorder %v1085_v55, 0  ;;  %v743_v4 = vxor.u32 2147483648, %v6772_v20  ;;  %v847_v0 = vxor.u32 2147483648, %v6776_v45  ;;  %v923_v35 = vadd.s32 %v6674_v60, %v6688_v31 }
 0x122   : > { %v6781_v13 = vshrl.u32 %v1032_v49, 30  ;;  %v1087_v3 = vsel %vm1086_vm13, %v1085_v55, 0  ;;  %v1083_v6 = vor.u32 8388608, %v1082_v2  ;;  %v939_v57 = vsub.s32 32, %v6774_v51  ;;  %v451_v55 = vpop.permute.xlu1 %450 }
 0x123   : > { %v1089_v42 = vand.u32 31, %v1087_v3  ;;  %v944_v24 = vadd.s32 127, %v943_v53  ;;  %v8574_v21 = vand.u32 2147483647, %v6770_v47  ;;  %v1183_v48 = vshrl.u32 %v1182_v29, 23 }
 0x124   : > { %v1034_v11 = vshll.u32 %v6781_v13, 30  ;;  %v1088_v61 = vshrl.u32 %v1087_v3, 5  ;;  %v1027_v3 = vadd.s32 %v6743_v1, %v6750_v22  ;;  %v6813_v41 = vshll.u32 %v1083_v6, 8 }
 0x125   : > { %v1090_v18 = vsub.s32 32, %v1089_v42  ;;  %v1092_v23 = vshll.u32 %v8584_v14, %v1089_v42  ;;  %v1095_v27 = vshll.u32 %v8581_v15, %v1089_v42  ;;  %v1098_v31 = vshll.u32 %v8579_v17, %v1089_v42 }
 0x126   : > { %v6797_v46 = vsub.s32 %v1031_v50, %v1034_v11  ;;  %v1101_v10 = vshll.u32 %v8577_v19, %v1089_v42  ;;  %v945_v40 = vshll.u32 %v944_v24, 23  ;;  %v1104_v53 = vshll.u32 %v8588_v26, %v1089_v42 }
 0x127   : > { %v1093_v28 = vshrl.u32 %v8581_v15, %v1090_v18  ;;  %v1096_v60 = vshrl.u32 %v8579_v17, %v1090_v18  ;;  %v1099_v7 = vshrl.u32 %v8577_v19, %v1090_v18  ;;  %v1102_v33 = vshrl.u32 %v8588_v26, %v1090_v18 }
 0x128   : > { %v1037_v5 = vsub.s32 0, %v6797_v46  ;;  %v1105_v29 = vshrl.u32 %v8591_v32, %v1090_v18  ;;  %v941_v11 = vshrl.u32 %v923_v35, %v939_v57  ;;  %v6817_v24 = vand.u32 8388607, %v8574_v21 }
 0x129   : > { %v1094_v9 = vor.u32 %v1093_v28, %v1092_v23  ;;  %v1097_v39 = vor.u32 %v1096_v60, %v1095_v27  ;;  %v1100_v50 = vor.u32 %v1099_v7, %v1098_v31  ;;  %v1103_v2 = vor.u32 %v1102_v33, %v1101_v10  ;;  %v6820_v31 = vpop.permute.xlu0 %404  ;;  %v6826_v10 = vpop.permute.xlu1 %310 }
 0x12a   : > { %v5108_v49 = vmin.u32 %v1037_v5, %v6797_v46  ;;  %v1106_v27 = vor.u32 %v1105_v29, %v1104_v53  ;;  %vm1107_vm14 = vcmp.lt.s32.totalorder %v1088_v61, 1  ;;  %vm1110_vm15 = vcmp.lt.s32.totalorder %v1088_v61, 4 }
 0x12b   : > { %vm1109_vm6 = vcmp.lt.s32.totalorder %v1088_v61, 3  ;;  %v1115_v28 = vsel %vm1107_vm14, %v1094_v9, %v1097_v39  ;;  %v1116_v42 = vsel %vm1110_vm15, %v1103_v2, 920167782  ;;  %v5115_v60 = vadd.s32 4294967169, %v1183_v48 }
 0x12c   : > { %v1039_v23 = vclz %v5108_v49  ;;  %v946_v35 = vor.u32 4788187, %v945_v40  ;;  %v1117_v1 = vsel %vm1109_vm6, %v1100_v50, %v1116_v42  ;;  %v1119_v22 = vsel %vm1107_vm14, %v1097_v39, %v1100_v50 }
 0x12d   : > { %v940_v6 = vshll.u32 %v6735_v58, %v6774_v51  ;;  %vm1108_vm7 = vcmp.lt.s32.totalorder %v1088_v61, 2  ;;  %v1112_v7 = vsel %vm1110_vm15, %v1100_v50, 2102212464  ;;  %v1120_v5 = vsel %vm1110_vm15, %v1106_v27, 1326507024 }
 0x12e   : > { %v5109_v57 = vadd.s32 4294967294, %v1039_v23  ;;  %v1091_v33 = vshrl.u32 %v8584_v14, %v1090_v18  ;;  %v1118_v48 = vsel %vm1108_vm7, %v1115_v28, %v1117_v1  ;;  %v1121_v40 = vsel %vm1109_vm6, %v1103_v2, %v1120_v5  ;;  %v6843_v2 = vpop.permute.xlu0 %264 }
 0x12f   : > { %v942_v49 = vor.u32 %v941_v11, %v940_v6  ;;  %v1122_v29 = vsel %vm1108_vm7, %v1119_v22, %v1121_v40  ;;  %v1189_v23 = vadd.s32 1, %v5115_v60  ;;  %v1113_v51 = vsel %vm1109_vm6, %v1097_v39, %v1112_v7  ;;  %v499_v6 = vpop.permute.xlu1 %498 }
 0x130   : > { %vm5110_vm8 = vcmp.lt.s32.totalorder %v5109_v57, 0  ;;  %v1111_v58 = vsel %vm1107_vm14, %v1091_v33, %v1094_v9  ;;  %v6835_v50 = vmul.u32.u64.low %v6813_v41, %v1122_v29  ;;  %v6836_v27 = vmul.u32.u64.high %v6813_v41, %v1122_v29, %v6835_v50 }
 0x131   : > { %v1042_v53 = vsel %vm5110_vm8, 0, %v5109_v57  ;;  %v6839_v18 = vmul.u32.u64.low %v6813_v41, %v1118_v48  ;;  %v6840_v28 = vmul.u32.u64.high %v6813_v41, %v1118_v48, %v6839_v18  ;;  %v947_v11 = vand.u32 2147483647, %v946_v35 }
 0x132   : > { %v1043_v42 = vsub.s32 32, %v1042_v53  ;;  %v1047_v21 = vsub.s32 4294967266, %v1042_v53  ;;  %v576_v60 = vsel %vm8590_vm2, %v6700_v44, %v6767_v30  ;;  %vm1190_vm9 = vcmp.gt.s32.totalorder %v1189_v23, 0 }
 0x133   : > { %v1114_v39 = vsel %vm1108_vm7, %v1111_v58, %v1113_v51  ;;  %v1191_v1 = vsel %vm1190_vm9, %v1189_v23, 0  ;;  %v592_v22 = vsel %vm8597_vm3, %v6787_v25, %v403_v38  ;;  %v949_v7 = vcvt.s32.f32 %v942_v49 }
 0x134   : > { %v1048_v57 = vadd.s32 127, %v1047_v21  ;;  %v1045_v9 = vshrl.u32 %v1027_v3, %v1043_v42  ;;  %v1193_v33 = vand.u32 31, %v1191_v1  ;;  %v609_v48 = vsel %vm8596_vm4, %v592_v22, %v451_v55 }
 0x135   : > { %v1044_v21 = vshll.u32 %v6797_v46, %v1042_v53  ;;  %vm1132_vm10 = vc.u32 %v6836_v27, %v6839_v18  ;;  %v1133_v44 = vadd.s32 1, %v6840_v28  ;;  %v1187_v30 = vor.u32 8388608, %v6817_v24  ;;  %v6861_v46 = vpop.permute.xlu0 %452 }
 0x136   : > { %v1049_v5 = vshll.u32 %v1048_v57, 23  ;;  %v950_v61 = vmul.f32 %v949_v7, %v947_v11  ;;  %v1130_v3 = vmul.u32 %v6813_v41, %v1114_v39  ;;  %v1194_v35 = vsub.s32 32, %v1193_v33 }
 0x137   : > { %v626_v25 = vsel %vm8594_vm5, %v609_v48, %v499_v6  ;;  %v1046_v38 = vor.u32 %v1045_v9, %v1044_v21  ;;  %v1134_v49 = vsel %vm1132_vm10, %v1133_v44, %v6840_v28  ;;  %v1196_v55 = vshll.u32 %v8584_v14, %v1193_v33 }
 0x138   : > { %v1050_v40 = vor.u32 4788187, %v1049_v5  ;;  %v1135_v53 = vadd.s32 %v1134_v49, %v1130_v3  ;;  %v1197_v29 = vshrl.u32 %v8581_v15, %v1194_v35  ;;  %v1199_v23 = vshll.u32 %v8581_v15, %v1193_v33 }
 0x139   : > { %v1202_v24 = vshll.u32 %v8579_v17, %v1193_v33  ;;  %v1200_v41 = vshrl.u32 %v8579_v17, %v1194_v35  ;;  %v1203_v42 = vshrl.u32 %v8577_v19, %v1194_v35  ;;  %v1205_v58 = vshll.u32 %v8577_v19, %v1193_v33 }
 0x13a   : > { %v1206_v51 = vshrl.u32 %v8588_v26, %v1194_v35  ;;  %vm869_vm11 = vcmp.lt.s32.totalorder %v6530_v63, 0  ;;  %v1136_v50 = vadd.s32 536870912, %v1135_v53  ;;  %v1192_v28 = vshrl.u32 %v1191_v1, 5 }
 0x13b   : > { %v1208_v11 = vshll.u32 %v8588_v26, %v1193_v33  ;;  %v1209_v57 = vshrl.u32 %v8591_v32, %v1194_v35  ;;  %v1198_v9 = vor.u32 %v1197_v29, %v1196_v55  ;;  %v1201_v39 = vor.u32 %v1200_v41, %v1199_v23  ;;  %v6882_v33 = vld [vmem:[%s8566_s1] ss:$0 sm:$0xff]  ;;  %v6887_v55 = vpop.permute.xlu0 %312 }
 0x13c   : > { %v1204_v22 = vor.u32 %v1203_v42, %v1202_v24  ;;  %v1207_v6 = vor.u32 %v1206_v51, %v1205_v58  ;;  %v953_v7 = vsub.s32 4, %v6728_v8  ;;  %v1051_v5 = vand.u32 2147483647, %v1050_v40 }
 0x13d   : > { %v6874_v48 = vshrl.u32 %v1136_v50, 30  ;;  %v593_v21 = vsel %vm8597_vm3, %v576_v60, %v6820_v31  ;;  %vm661_vm12 = vcmp.lt.s32.totalorder %v6419_v36, 0  ;;  %v951_v44 = vxor.u32 2147483648, %v950_v61 }
 0x13e   : > { %v1210_v1 = vor.u32 %v1209_v57, %v1208_v11  ;;  %v1227_v3 = vshll.u32 %v1187_v30, 8  ;;  %v6885_v49 = vmul.f32 %v6882_v33, %v626_v25  ;;  %vm765_vm13 = vcmp.lt.s32.totalorder %v6442_v52, 0 }
 0x13f   : > { %vm6892_vm14 = vcmp.le.f32.partialorder %v867_v62, 0.7853982  ;;  %v1053_v60 = vcvt.s32.f32 %v1046_v38  ;;  %v1138_v30 = vshll.u32 %v6874_v48, 30  ;;  %vm1211_vm15 = vcmp.lt.s32.totalorder %v1192_v28, 1 }
 0x140   : > { %vm1214_vm6 = vcmp.lt.s32.totalorder %v1192_v28, 4  ;;  %v1195_v40 = vshrl.u32 %v8584_v14, %v1194_v35  ;;  %v1219_v25 = vsel %vm1211_vm15, %v1198_v9, %v1201_v39  ;;  %vm973_vm7 = vcmp.lt.s32.totalorder %v6615_v12, 0 }
 0x141   : > { %v1216_v29 = vsel %vm1214_vm6, %v1204_v22, 2102212464  ;;  %v1220_v23 = vsel %vm1214_vm6, %v1207_v6, 920167782  ;;  %v1054_v24 = vmul.f32 %v1053_v60, %v1051_v5  ;;  %v6899_v41 = vsub.s32 %v1135_v53, %v1138_v30  ;;  %v501_v60 = vpop.permute.xlu0 %500 }
 0x142   : > { %vm1213_vm8 = vcmp.lt.s32.totalorder %v1192_v28, 3  ;;  %v1223_v62 = vsel %vm1211_vm15, %v1201_v39, %v1204_v22  ;;  %vm1212_vm9 = vcmp.lt.s32.totalorder %v1192_v28, 2  ;;  %v1215_v42 = vsel %vm1211_vm15, %v1195_v40, %v1198_v9 }
 0x143   : > { %v1221_v58 = vsel %vm1213_vm8, %v1204_v22, %v1220_v23  ;;  %v1224_v38 = vsel %vm1214_vm6, %v1210_v1, 1326507024  ;;  %v1141_v51 = vsub.s32 0, %v6899_v41  ;;  %v1217_v50 = vsel %vm1213_vm8, %v1201_v39, %v1216_v29 }
 0x144   : > { %v1222_v11 = vsel %vm1212_vm9, %v1219_v25, %v1221_v58  ;;  %v1225_v35 = vsel %vm1213_vm8, %v1207_v6, %v1224_v38  ;;  %v952_v57 = vsel %vm869_vm11, %v951_v44, %v950_v61  ;;  %v1286_v39 = vand.u32 2139095040, %v6885_v49 }
 0x145   : > { %v1226_v54 = vsel %vm1212_vm9, %v1223_v62, %v1225_v35  ;;  %v6906_v5 = vmul.u32.u64.low %v1227_v3, %v1222_v11  ;;  %v6907_v53 = vmul.u32.u64.high %v1227_v3, %v1222_v11, %v6906_v5  ;;  %v5112_v9 = vmin.u32 %v1141_v51, %v6899_v41  ;;  %v359_v35 = vpop.permute.xlu1 %358 }
 0x146   : > { %v6911_v22 = vmul.u32.u64.low %v1227_v3, %v1226_v54  ;;  %v6912_v1 = vmul.u32.u64.high %v1227_v3, %v1226_v54, %v6911_v22  ;;  %vm6917_vm10 = vcmp.le.f32.partialorder %v971_v56, 0.7853982  ;;  %v1055_v61 = vxor.u32 2147483648, %v1054_v24 }
 0x147   : > { %v1218_v44 = vsel %vm1212_vm9, %v1215_v42, %v1217_v50  ;;  %v610_v30 = vsel %vm8596_vm4, %v593_v21, %v6861_v46  ;;  %v6929_v54 = vsel %vm661_vm12, %v743_v4, %v6772_v20  ;;  %v1143_v40 = vclz %v5112_v9  ;;  %v5990_v42 = vld [vmem:[%s6241_s6 + $0x40] sm:$0xff]  ;;  %v5991_v9 = vld [vmem:[%s6241_s6 + $0x48] sm:$0xff] }
 0x148   : > { %v1287_v29 = vshrl.u32 %v1286_v39, 23  ;;  %v627_v56 = vsel %vm8594_vm5, %v610_v30, %v501_v60  ;;  %v6937_v28 = vsel %vm765_vm13, %v847_v0, %v6776_v45  ;;  %v6942_v46 = vsel %vm869_vm11, %v953_v7, %v6728_v8 }
 0x149   : > { %v955_v20 = vsel %vm6892_vm14, %v6530_v63, %v952_v57  ;;  %v1237_v4 = vadd.s32 1, %v6907_v53  ;;  %v5113_v21 = vadd.s32 4294967294, %v1143_v40  ;;  %v1234_v25 = vmul.u32 %v1227_v3, %v1218_v44 }
 0x14a   : > { %vm1236_vm15 = vc.u32 %v6912_v1, %v6906_v5  ;;  %v5119_v23 = vadd.s32 4294967169, %v1287_v29  ;;  %v1056_v45 = vsel %vm973_vm7, %v1055_v61, %v1054_v24  ;;  %v1057_v0 = vsub.s32 4, %v6781_v13 }
 0x14b   : > { %v1238_v8 = vsel %vm1236_vm15, %v1237_v4, %v6907_v53  ;;  %v6955_v7 = vmul.f32 %v6882_v33, %v627_v56  ;;  %vm5114_vm11 = vcmp.lt.s32.totalorder %v5113_v21, 0  ;;  %v543_v3 = vsel %vm8593_vm0, %v5990_v42, %v6789_v34 }
 0x14c   : > { %v1239_v62 = vadd.s32 %v1238_v8, %v1234_v25  ;;  %v1293_v58 = vadd.s32 1, %v5119_v23  ;;  %5925 = vcosq.f32 %v955_v20  ;;  %vm1077_vm6 = vcmp.lt.s32.totalorder %v6732_v59, 0 }
 0x14d   : > { %v6961_v38 = vsel %vm5114_vm11, 0, %v5113_v21  ;;  %v560_v24 = vsel %vm8595_vm1, %v543_v3, %v6826_v10  ;;  %v6968_v51 = vsel %vm6917_vm10, %v6615_v12, %v1056_v45  ;;  %v1161_v50 = vsub.s32 4, %v6874_v48 }
 0x14e   : > { %v1240_v11 = vadd.s32 536870912, %v1239_v62  ;;  %v8576_v34 = vand.u32 2147483647, %v6885_v49  ;;  %5927 = vsinq.f32 %v955_v20  ;;  %v6975_v57 = vsel %vm973_vm7, %v1057_v0, %v6781_v13 }
 0x14f   : > { %vm1294_vm8 = vcmp.gt.s32.totalorder %v1293_v58, 0  ;;  %v1390_v10 = vand.u32 2139095040, %v6955_v7  ;;  %v1151_v53 = vsub.s32 4294967266, %v6961_v38  ;;  %v544_v22 = vsel %vm8593_vm0, %v5991_v9, %v6843_v2 }
 0x150   : > { %v6979_v60 = vshrl.u32 %v1240_v11, 30  ;;  %v1295_v39 = vsel %vm1294_vm8, %v1293_v58, 0  ;;  %5929 = vcosq.f32 %v6968_v51  ;;  %v1131_v61 = vadd.s32 %v6839_v18, %v6836_v27 }
 0x151   : > { %v1297_v44 = vand.u32 31, %v1295_v39  ;;  %v6988_v13 = vsel %vm8590_vm2, %v560_v24, %v359_v35  ;;  %v6993_v30 = vsel %vm1077_vm6, %v1161_v50, %v6874_v48  ;;  %v1290_v2 = vand.u32 8388607, %v8576_v34 }
 0x152   : > { %8634 = vst [vmem:[#allocation12_spill] sm:$0xff] %v6993_v30  ;;  %v1242_v40 = vshll.u32 %v6979_v60, 30  ;;  %v7000_v29 = vsel %vm8595_vm1, %v544_v22, %v6887_v55  ;;  %v1147_v27 = vsub.s32 32, %v6961_v38  ;;  %v8583_v56 = vand.u32 2147483647, %v6955_v7 }
 0x153   : > { %v1298_v18 = vsub.s32 32, %v1297_v44  ;;  %v1391_v20 = vshrl.u32 %v1390_v10, 23  ;;  %v1152_v4 = vadd.s32 127, %v1151_v53  ;;  %v1300_v48 = vshll.u32 %v8584_v14, %v1297_v44 }
 0x154   : > { %v7004_v21 = vsub.s32 %v1239_v62, %v1242_v40  ;;  %v1303_v25 = vshll.u32 %v8581_v15, %v1297_v44  ;;  %v1306_v55 = vshll.u32 %v8579_v17, %v1297_v44  ;;  %v1296_v42 = vshrl.u32 %v1295_v39, 5 }
 0x155   : > { %v1301_v23 = vshrl.u32 %v8581_v15, %v1298_v18  ;;  %v1304_v45 = vshrl.u32 %v8579_v17, %v1298_v18  ;;  %v1307_v0 = vshrl.u32 %v8577_v19, %v1298_v18  ;;  %v1309_v3 = vshll.u32 %v8577_v19, %v1297_v44 }
 0x156   : > { %v1245_v8 = vsub.s32 0, %v7004_v21  ;;  %v1310_v62 = vshrl.u32 %v8588_v26, %v1298_v18  ;;  %v7015_v58 = vpop.eup %5925  ;;  %v1291_v24 = vor.u32 8388608, %v1290_v2  ;;  %v1312_v9 = vshll.u32 %v8588_v26, %v1297_v44 }
 0x157   : > { %v1302_v50 = vor.u32 %v1301_v23, %v1300_v48  ;;  %v1305_v11 = vor.u32 %v1304_v45, %v1303_v25  ;;  %v1308_v35 = vor.u32 %v1307_v0, %v1306_v55  ;;  %v1313_v22 = vshrl.u32 %v8591_v32, %v1298_v18  ;;  %v361_v48 = vpop.permute.xlu1 %360 }
 0x158   : > { %v5116_v10 = vmin.u32 %v1245_v8, %v7004_v21  ;;  %v1311_v53 = vor.u32 %v1310_v62, %v1309_v3  ;;  %v7020_v40 = vpop.eup %5927  ;;  %v1149_v39 = vshrl.u32 %v1131_v61, %v1147_v27  ;;  %v1153_v34 = vshll.u32 %v1152_v4, 23 }
 0x159   : > { %v5123_v19 = vadd.s32 4294967169, %v1391_v20  ;;  %v1394_v17 = vand.u32 8388607, %v8583_v56  ;;  %v1314_v2 = vor.u32 %v1313_v22, %v1312_v9  ;;  %vm1315_vm7 = vcmp.lt.s32.totalorder %v1296_v42, 1 }
 0x15a   : > { %v1247_v15 = vclz %v5116_v10  ;;  %vm1318_vm9 = vcmp.lt.s32.totalorder %v1296_v42, 4  ;;  %v7024_v25 = vpop.eup %5929  ;;  %v1299_v23 = vshrl.u32 %v8584_v14, %v1298_v18  ;;  %vm1317_vm15 = vcmp.lt.s32.totalorder %v1296_v42, 3 }
 0x15b   : > { %8635 = vst [vmem:[#allocation13_spill] sm:$0xff] %v7024_v25  ;;  %v1323_v44 = vsel %vm1315_vm7, %v1302_v50, %v1305_v11  ;;  %v1324_v45 = vsel %vm1318_vm9, %v1311_v53, 920167782  ;;  %v1320_v61 = vsel %vm1318_vm9, %v1308_v35, 2102212464  ;;  %v1327_v20 = vsel %vm1315_vm7, %v1305_v11, %v1308_v35 }
 0x15c   : > { %v5117_v55 = vadd.s32 4294967294, %v1247_v15  ;;  %v1325_v27 = vsel %vm1317_vm15, %v1308_v35, %v1324_v45  ;;  %v1148_v4 = vshll.u32 %v6899_v41, %v6961_v38  ;;  %vm1316_vm11 = vcmp.lt.s32.totalorder %v1296_v42, 2 }
 0x15d   : > { %v1328_v0 = vsel %vm1318_vm9, %v1314_v2, 1326507024  ;;  %v1331_v8 = vshll.u32 %v1291_v24, 8  ;;  %v1319_v3 = vsel %vm1315_vm7, %v1299_v23, %v1302_v50  ;;  %v1326_v18 = vsel %vm1316_vm11, %v1323_v44, %v1325_v27  ;;  %v267_v2 = vpop.permute.xlu1 %266 }
 0x15e   : > { %vm5118_vm8 = vcmp.lt.s32.totalorder %v5117_v55, 0  ;;  %v1329_v62 = vsel %vm1317_vm15, %v1311_v53, %v1328_v0  ;;  %v1321_v15 = vsel %vm1317_vm15, %v1305_v11, %v1320_v61  ;;  %v1397_v35 = vadd.s32 1, %v5123_v19 }
 0x15f   : > { %v7035_v10 = vsel %vm5118_vm8, 0, %v5117_v55  ;;  %v1330_v9 = vsel %vm1316_vm11, %v1327_v20, %v1329_v62  ;;  %v1150_v22 = vor.u32 %v1149_v39, %v1148_v4  ;;  %v1154_v41 = vor.u32 4788187, %v1153_v34  ;;  %v5992_v34 = vld [vmem:[%s6241_s6 + $0x50] sm:$0xff] }
 0x160   : > { %v1255_v38 = vsub.s32 4294967266, %v7035_v10  ;;  %v1395_v24 = vor.u32 8388608, %v1394_v17  ;;  %v7040_v45 = vmul.u32.u64.low %v1331_v8, %v1330_v9  ;;  %v7041_v50 = vmul.u32.u64.high %v1331_v8, %v1330_v9, %v7040_v45 }
 0x161   : > { %v7043_v23 = vmul.u32.u64.low %v1331_v8, %v1326_v18  ;;  %v7044_v44 = vmul.u32.u64.high %v1331_v8, %v1326_v18, %v7043_v23  ;;  %v1251_v53 = vsub.s32 32, %v7035_v10  ;;  %v1322_v55 = vsel %vm1316_vm11, %v1319_v3, %v1321_v15 }
 0x162   : > { %v1256_v11 = vadd.s32 127, %v1255_v38  ;;  %vm1398_vm7 = vcmp.gt.s32.totalorder %v1397_v35, 0  ;;  %5931 = vsinq.f32 %v6968_v51  ;;  %v7052_v19 = vsel %vm8590_vm2, %v7000_v29, %v361_v48 }
 0x163   : > { %v1399_v17 = vsel %vm1398_vm7, %v1397_v35, 0  ;;  %v7056_v39 = vsel %vm8593_vm0, %v5992_v34, %v267_v2  ;;  %vm7060_vm9 = vcmp.le.f32.partialorder %v659_v37, 0.7853982  ;;  %v1157_v42 = vcvt.s32.f32 %v1150_v22 }
 0x164   : > { %v1235_v27 = vadd.s32 %v6906_v5, %v6912_v1  ;;  %v1401_v51 = vand.u32 31, %v1399_v17  ;;  %v7066_v20 = vshll.u32 %v1395_v24, 8  ;;  %v8638_v29 = vand.u32 2147483647, %v6442_v52 }
 0x165   : > { %v1155_v4 = vand.u32 2147483647, %v1154_v41  ;;  %v1338_v0 = vmul.u32 %v1331_v8, %v1322_v55  ;;  %vm1340_vm11 = vc.u32 %v7041_v50, %v7043_v23  ;;  %v1341_v37 = vadd.s32 1, %v7044_v44 }
 0x166   : > { %vm7070_vm15 = vcmp.le.f32.partialorder %v8638_v29, 0.7853982  ;;  %v1252_v3 = vshll.u32 %v7004_v21, %v7035_v10  ;;  %v1253_v5 = vshrl.u32 %v1235_v27, %v1251_v53  ;;  %v1257_v1 = vshll.u32 %v1256_v11, 23  ;;  %v407_v27 = vpop.permute.xlu0 %406 }
 0x167   : > { %v1402_v18 = vsub.s32 32, %v1401_v51  ;;  %v1342_v62 = vsel %vm1340_vm11, %v1341_v37, %v7044_v44  ;;  %v1400_v15 = vshrl.u32 %v1399_v17, 5  ;;  %v1404_v9 = vshll.u32 %v8584_v14, %v1401_v51 }
 0x168   : > { %v745_v35 = vsub.s32 4, %v6551_v16  ;;  %v1343_v22 = vadd.s32 %v1342_v62, %v1338_v0  ;;  %v8641_v8 = vmov 2475754826   ;;  %v8642_v24 = vmov 2131351028  }
 0x169   : > { %v1405_v41 = vshrl.u32 %v8641_v8, %v1402_v18  ;;  %v1407_v38 = vshll.u32 %v8641_v8, %v1401_v51  ;;  %v1410_v2 = vshll.u32 %v8642_v24, %v1401_v51  ;;  %v1408_v45 = vshrl.u32 %v8642_v24, %v1402_v18 }
 0x16a   : > { %v8643_v21 = vmov 2102212464   ;;  %v1414_v44 = vshrl.u32 %v8588_v26, %v1402_v18  ;;  %v1258_v11 = vor.u32 4788187, %v1257_v1  ;;  %v1344_v55 = vadd.s32 536870912, %v1343_v22 }
 0x16b   : > { %v1411_v10 = vshrl.u32 %v8643_v21, %v1402_v18  ;;  %v1413_v53 = vshll.u32 %v8643_v21, %v1401_v51  ;;  %v1416_v17 = vshll.u32 %v8588_v26, %v1401_v51  ;;  %v1417_v34 = vshrl.u32 %v8591_v32, %v1402_v18 }
 0x16c   : > { %v1406_v29 = vor.u32 %v1405_v41, %v1404_v9  ;;  %v1409_v0 = vor.u32 %v1408_v45, %v1407_v38  ;;  %v1158_v56 = vmul.f32 %v1157_v42, %v1155_v4  ;;  %v7091_v14 = vshrl.u32 %v1344_v55, 30  ;;  %v7098_v12 = vpop.eup %5931  ;;  %v455_v41 = vpop.permute.xlu1 %454 }
 0x16d   : > { %v1412_v37 = vor.u32 %v1411_v10, %v1410_v2  ;;  %v1415_v62 = vor.u32 %v1414_v44, %v1413_v53  ;;  %v747_v30 = vsel %vm7060_vm9, %v6419_v36, %v6929_v54  ;;  %v849_v1 = vsub.s32 4, %v6622_v43  ;;  %v7113_v53 = vpop.permute.xlu0 %408 }
 0x16e   : > { %v1254_v51 = vor.u32 %v1253_v5, %v1252_v3  ;;  %v1418_v26 = vor.u32 %v1417_v34, %v1416_v17  ;;  %vm1422_vm8 = vcmp.lt.s32.totalorder %v1400_v15, 4  ;;  %v851_v9 = vsel %vm7070_vm15, %v6442_v52, %v6937_v28 }
 0x16f   : > { %v1346_v42 = vshll.u32 %v7091_v14, 30  ;;  %vm1419_vm7 = vcmp.lt.s32.totalorder %v1400_v15, 1  ;;  %v1424_v4 = vsel %vm1422_vm8, %v1412_v37, 2102212464  ;;  %v746_v54 = vsel %vm661_vm12, %v745_v35, %v6551_v16 }
 0x170   : > { %v1259_v38 = vand.u32 2147483647, %v1258_v11  ;;  %v8644_v2 = vmov 683565275   ;;  %v1427_v5 = vsel %vm1419_vm7, %v1406_v29, %v1409_v0  ;;  %v1428_v45 = vsel %vm1422_vm8, %v1415_v62, 920167782 }
 0x171   : > { %v1403_v3 = vshrl.u32 %v8644_v2, %v1402_v18  ;;  %v7111_v10 = vsub.s32 %v1343_v22, %v1346_v42  ;;  %vm1420_vm11 = vcmp.lt.s32.totalorder %v1400_v15, 2  ;;  %vm1421_vm2 = vcmp.lt.s32.totalorder %v1400_v15, 3 }
 0x172   : > { %v1431_v28 = vsel %vm1419_vm7, %v1409_v0, %v1412_v37  ;;  %v1425_v55 = vsel %vm1421_vm2, %v1409_v0, %v1424_v4  ;;  %v1429_v17 = vsel %vm1421_vm2, %v1412_v37, %v1428_v45  ;;  %v1432_v34 = vsel %vm1422_vm8, %v1418_v26, 1326507024  ;;  %v7131_v37 = vpop.permute.xlu1 %314 }
 0x173   : > { %v1423_v44 = vsel %vm1419_vm7, %v1403_v3, %v1406_v29  ;;  %v1349_v16 = vsub.s32 0, %v7111_v10  ;;  %v1430_v35 = vsel %vm1420_vm11, %v1427_v5, %v1429_v17  ;;  %v1433_v18 = vsel %vm1421_vm2, %v1415_v62, %v1432_v34  ;;  %v7137_v5 = vpop.permute.xlu0 %268 }
 0x174   : > { %v748_v11 = vsel %vm7060_vm9, 0, %v746_v54  ;;  %v1434_v22 = vsel %vm1420_vm11, %v1431_v28, %v1433_v18  ;;  %v7122_v42 = vmul.u32.u64.low %v7066_v20, %v1430_v35  ;;  %v7123_v32 = vmul.u32.u64.high %v7066_v20, %v1430_v35, %v7122_v42 }
 0x175   : > { %5933 = vcosq.f32 %v747_v30  ;;  %v5120_v29 = vmin.u32 %v1349_v16, %v7111_v10  ;;  %v7128_v26 = vmul.u32.u64.low %v7066_v20, %v1434_v22  ;;  %v7129_v0 = vmul.u32.u64.high %v7066_v20, %v1434_v22, %v7128_v26 }
 0x176   : > { %5935 = vsinq.f32 %v747_v30  ;;  %v1261_v62 = vcvt.s32.f32 %v1254_v51  ;;  %v1426_v61 = vsel %vm1420_vm11, %v1423_v44, %v1425_v55  ;;  %v850_v4 = vsel %vm765_vm13, %v849_v1, %v6622_v43  ;;  %v503_v34 = vpop.permute.xlu1 %502 }
 0x177   : > { %5937 = vcosq.f32 %v851_v9  ;;  %v1159_v54 = vxor.u32 2147483648, %v1158_v56  ;;  %v1351_v3 = vclz %v5120_v29  ;;  %v852_v45 = vsel %vm7070_vm15, 0, %v850_v4 }
 0x178   : > { %5939 = vsinq.f32 %v851_v9  ;;  %v7141_v28 = vmul.f32 %v1261_v62, %v1259_v38  ;;  %v1445_v30 = vadd.s32 1, %v7123_v32  ;;  %v594_v15 = vsel %vm8597_vm3, %v6988_v13, %v407_v27 }
 0x179   : > { %v752_v51 = vadd.s32 3, %v748_v11  ;;  %v5121_v44 = vadd.s32 4294967294, %v1351_v3  ;;  %v1442_v43 = vmul.u32 %v7066_v20, %v1426_v61  ;;  %vm1444_vm2 = vc.u32 %v7129_v0, %v7122_v42 }
 0x17a   : > { %v2416_v1 = vand.u32 3, %v748_v11  ;;  %v1446_v48 = vsel %vm1444_vm2, %v1445_v30, %v7123_v32  ;;  %v611_v9 = vsel %vm8596_vm4, %v594_v15, %v455_v41  ;;  %v2519_v38 = vand.u32 3, %v852_v45 }
 0x17b   : > { %v7154_v17 = vsel %vm1077_vm6, %v1159_v54, %v1158_v56  ;;  %vm5122_vm12 = vcmp.lt.s32.totalorder %v5121_v44, 0  ;;  %v1447_v13 = vadd.s32 %v1446_v48, %v1442_v43  ;;  %v856_v27 = vadd.s32 3, %v852_v45  ;;  %v7164_v56 = vpop.permute.xlu0 %456 }
 0x17c   : > { %v1339_v16 = vadd.s32 %v7043_v23, %v7041_v50  ;;  %v7159_v35 = vsel %vm5122_vm12, 0, %v5121_v44  ;;  %vm751_vm13 = vweird.f32 %v6419_v36  ;;  %v753_v32 = vand.u32 3, %v752_v51 }
 0x17d   : > { %v1359_v41 = vsub.s32 4294967266, %v7159_v35  ;;  %v1448_v18 = vadd.s32 536870912, %v1447_v13  ;;  %vm855_vm6 = vweird.f32 %v6442_v52  ;;  %vm2417_vm9 = vcmp.lt.s32.totalorder %v2416_v1, 2 }
 0x17e   : > { %vm2418_vm15 = vcmp.eq.s32.totalorder %v2416_v1, 0  ;;  %v1355_v22 = vsub.s32 32, %v7159_v35  ;;  %vm2421_vm8 = vcmp.eq.s32.totalorder %v2416_v1, 2  ;;  %vm2520_vm7 = vcmp.lt.s32.totalorder %v2519_v38, 2 }
 0x17f   : > { %v5934_v11 = vpop.eup %5933  ;;  %v628_v50 = vsel %vm8594_vm5, %v611_v9, %v503_v34  ;;  %v1360_v29 = vadd.s32 127, %v1359_v41  ;;  %v7168_v26 = vshrl.u32 %v1448_v18, 30  ;;  %v857_v61 = vand.u32 3, %v856_v27  ;;  %v7185_v18 = vpop.permute.xlu0 %316 }
 0x180   : > { %v5936_v23 = vpop.eup %5935  ;;  %v759_v62 = vxor.u32 2147483648, %v5934_v11  ;;  %vm2521_vm11 = vcmp.eq.s32.totalorder %v2519_v38, 0  ;;  %vm2524_vm2 = vcmp.eq.s32.totalorder %v2519_v38, 2  ;;  %vm754_vm12 = vcmp.lt.s32.totalorder %v753_v32, 2 }
 0x181   : > { %v5938_v4 = vpop.eup %5937  ;;  %v756_v54 = vxor.u32 2147483648, %v5936_v23  ;;  %v8645_v45 = vand.u32 2147483647, %v6732_v59  ;;  %v1450_v15 = vshll.u32 %v7168_v26, 30  ;;  %vm755_vm5 = vcmp.eq.s32.totalorder %v753_v32, 0 }
 0x182   : > { %v5940_v3 = vpop.eup %5939  ;;  %vm758_vm1 = vcmp.eq.s32.totalorder %v753_v32, 2  ;;  %v7178_v51 = vmul.f32 %v6882_v33, %v628_v50  ;;  %vm1181_vm4 = vcmp.lt.s32.totalorder %v6770_v47, 0  ;;  %v863_v43 = vxor.u32 2147483648, %v5938_v4 }
 0x183   : > { %vm7172_vm0 = vcmp.le.f32.partialorder %v8645_v45, 0.7853982  ;;  %v860_v44 = vxor.u32 2147483648, %v5940_v3  ;;  %v2420_v48 = vsel %vm2418_vm15, %v5934_v11, %v756_v54  ;;  %v2423_v9 = vsel %vm2421_vm8, %v759_v62, %v5936_v23  ;;  %v505_v32 = vpop.permute.xlu0 %504 }
 0x184   : > { %8648 = vst [vmem:[#allocation14_spill] sm:$0xff] %v7178_v51  ;;  %v1357_v27 = vshrl.u32 %v1339_v16, %v1355_v22  ;;  %v1361_v34 = vshll.u32 %v1360_v29, 23  ;;  %v7183_v41 = vsub.s32 %v1447_v13, %v1450_v15  ;;  %vm859_vm3 = vcmp.eq.s32.totalorder %v857_v61, 0 }
 0x185   : > { %v2424_v45 = vsel %vm2417_vm9, %v2420_v48, %v2423_v9  ;;  %v2523_v50 = vsel %vm2521_vm11, %v5938_v4, %v860_v44  ;;  %v2526_v55 = vsel %vm2524_vm2, %v863_v43, %v5940_v3  ;;  %v757_v20 = vsel %vm755_vm5, %v5934_v11, %v756_v54 }
 0x186   : > { %v8649_v63 = vand.u32 2147483647, %v6770_v47  ;;  %v1453_v13 = vsub.s32 0, %v7183_v41  ;;  %v2425_v16 = vsel %vm751_vm13, nan, %v2424_v45  ;;  %v2527_v1 = vsel %vm2520_vm7, %v2523_v50, %v2526_v55 }
 0x187   : > { %vm862_vm9 = vcmp.eq.s32.totalorder %v857_v61, 2  ;;  %v2528_v22 = vsel %vm855_vm6, nan, %v2527_v1  ;;  %v760_v29 = vsel %vm758_vm1, %v759_v62, %v5936_v23  ;;  %v861_v11 = vsel %vm859_vm3, %v5938_v4, %v860_v44 }
 0x188   : > { %vm7193_vm15 = vcmp.le.f32.partialorder %v8649_v63, 0.7853982  ;;  %v864_v54 = vsel %vm862_vm9, %v863_v43, %v5940_v3  ;;  %v5124_v63 = vmin.u32 %v1453_v13, %v7183_v41  ;;  %v5850_v15 = vpack.i.bf16 %v2528_v22, %v2425_v16  ;;  %v7245_v13 = vpop.permute.xlu1 %362 }
 0x189   : > { %v761_v48 = vsel %vm754_vm12, %v757_v20, %v760_v29  ;;  %vm858_vm5 = vcmp.lt.s32.totalorder %v857_v61, 2  ;;  %v1356_v9 = vshll.u32 %v7111_v10, %v7159_v35  ;;  %v1362_v45 = vor.u32 4788187, %v1361_v34 }
 0x18a   : > { %v865_v38 = vsel %vm858_vm5, %v861_v11, %v864_v54  ;;  %v8602_v55 = vand.u32 2147483647, %v7178_v51  ;;  %v1455_v50 = vclz %v5124_v63  ;;  %5851 = vrot.lane.b32.xlu1 %v5850_v15, %s6126_s20  ;;  %v762_v23 = vsel %vm751_vm13, nan, %v761_v48 }
 0x18b   : > { %v866_v62 = vsel %vm855_vm6, nan, %v865_v38  ;;  %v1494_v20 = vand.u32 2139095040, %v7178_v51  ;;  %v1163_v10 = vsel %vm7172_vm0, %v6732_v59, %v7154_v17  ;;  %v1358_v35 = vor.u32 %v1357_v27, %v1356_v9  ;;  %v5993_v38 = vld [vmem:[%s6241_s6 + $0x58] sm:$0xff] }
 0x18c   : > { %vm8652_vm1 = vcmask 261120   ;;  %v5845_v4 = vpack.i.bf16 %v866_v62, %v762_v23  ;;  %v8653_v36 = vxor.u32 2147483648, %v7141_v28  ;;  %v5125_v3 = vadd.s32 4294967294, %v1455_v50 }
 0x18d   : > { %v595_v61 = vsel %vm8652_vm1, %v7052_v19, %v7113_v53  ;;  %v1495_v44 = vshrl.u32 %v1494_v20, 23  ;;  %vm8654_vm3 = vcmask 326656   ;;  %v1363_v34 = vand.u32 2147483647, %v1362_v45 }
 0x18e   : > { %v1264_v52 = vsel %vm1181_vm4, %v8653_v36, %v7141_v28  ;;  %v612_v43 = vsel %vm8654_vm3, %v595_v61, %v7164_v56  ;;  %vm8655_vm13 = vcmask 130048   ;;  %5846 = vrot.lane.b32.xlu0 %v5845_v4, %s6115_s29  ;;  %v1498_v19 = vand.u32 8388607, %v8602_v55 }
 0x18f   : > { %v7232_v17 = vsel %vm8655_vm13, %v7056_v39, %v7131_v37  ;;  %vm8656_vm6 = vcmask 392192   ;;  %v8657_v28 = vsub.s32 4, %v6979_v60  ;;  %vm5126_vm8 = vcmp.lt.s32.totalorder %v5125_v3, 0 }
 0x190   : > { %v629_v53 = vsel %vm8656_vm6, %v612_v43, %v505_v32  ;;  %v5127_v56 = vadd.s32 4294967169, %v1495_v44  ;;  %5941 = vcosq.f32 %v1163_v10  ;;  %v7253_v37 = vsel %vm7193_vm15, %v6770_v47, %v1264_v52  ;;  %v7268_v32 = vpop.permute.xlu1 %364 }
 0x191   : > { %v7243_v27 = vsel %vm1181_vm4, %v8657_v28, %v6979_v60  ;;  %v7248_v39 = vmul.f32 %v6882_v33, %v629_v53  ;;  %v1365_v16 = vcvt.s32.f32 %v1358_v35  ;;  %v1458_v1 = vsel %vm5126_vm8, 0, %v5125_v3 }
 0x192   : > { %v1443_v60 = vadd.s32 %v7122_v42, %v7129_v0  ;;  %v1459_v22 = vsub.s32 32, %v1458_v1  ;;  %v1463_v29 = vsub.s32 4294967266, %v1458_v1  ;;  %v1501_v11 = vadd.s32 1, %v5127_v56 }
 0x193   : > { %v7257_v54 = vmul.f32 %v1365_v16, %v1363_v34  ;;  %v1460_v33 = vshll.u32 %v7183_v41, %v1458_v1  ;;  %v1499_v63 = vor.u32 8388608, %v1498_v19  ;;  %v1598_v15 = vand.u32 2139095040, %v7248_v39 }
 0x194   : > { %v1461_v48 = vshrl.u32 %v1443_v60, %v1459_v22  ;;  %v1464_v9 = vadd.s32 127, %v1463_v29  ;;  %vm1502_vm4 = vcmp.gt.s32.totalorder %v1501_v11, 0  ;;  %v8601_v45 = vand.u32 2147483647, %v7248_v39 }
 0x195   : > { %5943 = vsinq.f32 %v1163_v10  ;;  %vm8658_vm7 = vcmask 64512   ;;  %v1503_v0 = vsel %vm1502_vm4, %v1501_v11, 0  ;;  %v1599_v50 = vshrl.u32 %v1598_v15, 23 }
 0x196   : > { %v7265_v42 = vsel %vm8658_vm7, %v5993_v38, %v7137_v5  ;;  %v1462_v62 = vor.u32 %v1461_v48, %v1460_v33  ;;  %v1465_v41 = vshll.u32 %v1464_v9, 23  ;;  %v1505_v20 = vand.u32 31, %v1503_v0 }
 0x197   : > { %5945 = vcosq.f32 %v7253_v37  ;;  %v1367_v35 = vxor.u32 2147483648, %v7257_v54  ;;  %v1473_v10 = vsub.s32 4, %v7168_v26  ;;  %v7273_v61 = vshll.u32 %v1499_v63, 8 }
 0x198   : > { %v1466_v4 = vor.u32 4788187, %v1465_v41  ;;  %v1504_v5 = vshrl.u32 %v1503_v0, 5  ;;  %v1506_v36 = vsub.s32 32, %v1505_v20  ;;  %v7277_v52 = vand.u32 8388607, %v8601_v45 }
 0x199   : > { %vm1285_vm11 = vcmp.lt.s32.totalorder %v6885_v49, 0  ;;  %v1469_v3 = vcvt.s32.f32 %v1462_v62  ;;  %v1508_v44 = vshll.u32 %v8644_v2, %v1505_v20  ;;  %v1511_v43 = vshll.u32 %v8641_v8, %v1505_v20 }
 0x19a   : > { %v5131_v34 = vadd.s32 4294967169, %v1599_v50  ;;  %v1509_v19 = vshrl.u32 %v8641_v8, %v1506_v36  ;;  %v1512_v53 = vshrl.u32 %v8642_v24, %v1506_v36  ;;  %v1514_v28 = vshll.u32 %v8642_v24, %v1505_v20  ;;  %v7286_v16 = vpop.eup %5941  ;;  %v7300_v50 = vpop.permute.xlu1 %270 }
 0x19b   : > { %v1517_v56 = vshll.u32 %v8643_v21, %v1505_v20  ;;  %vm1389_vm2 = vcmp.lt.s32.totalorder %v6955_v7, 0  ;;  %v1515_v1 = vshrl.u32 %v8643_v21, %v1506_v36  ;;  %v8659_v60 = vmov 920167782  }
 0x19c   : > { %v1518_v22 = vshrl.u32 %v8659_v60, %v1506_v36  ;;  %v1520_v29 = vshll.u32 %v8659_v60, %v1505_v20  ;;  %v8660_v11 = vmov 1326507024   ;;  %v8661_v63 = vand.u32 2147483647, %v6885_v49 }
 0x19d   : > { %v1521_v33 = vshrl.u32 %v8660_v11, %v1506_v36  ;;  %v1467_v48 = vand.u32 2147483647, %v1466_v4  ;;  %v1507_v9 = vshrl.u32 %v8644_v2, %v1506_v36  ;;  %v1510_v38 = vor.u32 %v1509_v19, %v1508_v44 }
 0x19e   : > { %vm7295_vm12 = vcmp.le.f32.partialorder %v8661_v63, 0.7853982  ;;  %v1513_v0 = vor.u32 %v1512_v53, %v1511_v43  ;;  %v1516_v62 = vor.u32 %v1515_v1, %v1514_v28  ;;  %v1519_v41 = vor.u32 %v1518_v22, %v1517_v56  ;;  %v411_v22 = vpop.permute.xlu0 %410 }
 0x19f   : > { %v1522_v45 = vor.u32 %v1521_v33, %v1520_v29  ;;  %vm1523_vm9 = vcmp.lt.s32.totalorder %v1504_v5, 1  ;;  %vm1524_vm5 = vcmp.lt.s32.totalorder %v1504_v5, 2  ;;  %vm1525_vm1 = vcmp.lt.s32.totalorder %v1504_v5, 3  ;;  %v7302_v55 = vpop.eup %5943  ;;  %v459_v33 = vpop.permute.xlu1 %458 }
 0x1a0   : > { %vm1526_vm3 = vcmp.lt.s32.totalorder %v1504_v5, 4  ;;  %v1531_v20 = vsel %vm1523_vm9, %v1510_v38, %v1513_v0  ;;  %v1535_v47 = vsel %vm1523_vm9, %v1513_v0, %v1516_v62  ;;  %v1527_v59 = vsel %vm1523_vm9, %v1507_v9, %v1510_v38 }
 0x1a1   : > { %v1528_v63 = vsel %vm1526_vm3, %v1516_v62, 2102212464  ;;  %v1532_v23 = vsel %vm1526_vm3, %v1519_v41, 920167782  ;;  %v1536_v4 = vsel %vm1526_vm3, %v1522_v45, 1326507024  ;;  %v7304_v19 = vpop.eup %5945  ;;  %v7306_v53 = vmul.f32 %v1469_v3, %v1467_v48 }
 0x1a2   : > { %v1529_v36 = vsel %vm1525_vm1, %v1513_v0, %v1528_v63  ;;  %v1533_v44 = vsel %vm1525_vm1, %v1516_v62, %v1532_v23  ;;  %v1537_v43 = vsel %vm1525_vm1, %v1519_v41, %v1536_v4  ;;  %vm8664_vm13 = vcmask 195584   ;;  %v8668_v4 = vld [vmem:[#allocation13_spill] sm:$0xff] }
 0x1a3   : > { %v1534_v28 = vsel %vm1524_vm5, %v1531_v20, %v1533_v44  ;;  %v1538_v56 = vsel %vm1524_vm5, %v1535_v47, %v1537_v43  ;;  %v579_v1 = vsel %vm8664_vm13, %v7232_v17, %v7245_v13  ;;  %v1368_v45 = vsel %vm1285_vm11, %v1367_v35, %v7257_v54 }
 0x1a4   : > { %v7317_v23 = vmul.u32.u64.low %v7273_v61, %v1538_v56  ;;  %v7318_v29 = vmul.u32.u64.high %v7273_v61, %v1538_v56, %v7317_v23  ;;  %v1603_v3 = vor.u32 8388608, %v7277_v52  ;;  %v1530_v48 = vsel %vm1524_vm5, %v1527_v59, %v1529_v36 }
 0x1a5   : > { %v7323_v47 = vmul.u32.u64.low %v7273_v61, %v1534_v28  ;;  %v7324_v9 = vmul.u32.u64.high %v7273_v61, %v1534_v28, %v7323_v47  ;;  %v1605_v17 = vadd.s32 1, %v5131_v34  ;;  %5947 = vsinq.f32 %v7253_v37  ;;  %v7378_v23 = vpop.permute.xlu0 %412 }
 0x1a6   : > { %v8665_v13 = vsub.s32 4, %v7091_v14  ;;  %v7338_v35 = vsel %vm1389_vm2, %v1473_v10, %v7168_v26  ;;  %vm8666_vm6 = vcmask 261120   ;;  %v7344_v5 = vsel %vm7295_vm12, %v6885_v49, %v1368_v45 }
 0x1a7   : > { %v596_v59 = vsel %vm8666_vm6, %v579_v1, %v411_v22  ;;  %vm1606_vm8 = vcmp.gt.s32.totalorder %v1605_v17, 0  ;;  %vm8667_vm4 = vcmask 326656   ;;  %vm1548_vm7 = vc.u32 %v7318_v29, %v7323_v47 }
 0x1a8   : > { %v7333_v54 = vsel %vm1285_vm11, %v8665_v13, %v7091_v14  ;;  %v7348_v52 = vsel %vm8667_vm4, %v596_v59, %v459_v33  ;;  %v1546_v14 = vmul.u32 %v7273_v61, %v1530_v48  ;;  %v1607_v26 = vsel %vm1606_vm8, %v1605_v17, 0 }
 0x1a9   : > { %v956_v10 = vsel %vm6892_vm14, 0, %v6942_v46  ;;  %v1549_v34 = vadd.s32 1, %v7324_v9  ;;  %v1609_v38 = vand.u32 31, %v1607_v26  ;;  %v7357_v0 = vshll.u32 %v1603_v3, 8 }
 0x1aa   : > { %v7360_v41 = vshrl.u32 %v1607_v26, 5  ;;  %v7366_v61 = vsel %vm6917_vm10, 0, %v6975_v57  ;;  %v2622_v44 = vand.u32 3, %v956_v10  ;;  %5949 = vcosq.f32 %v7344_v5 }
 0x1ab   : > { %v1550_v31 = vsel %vm1548_vm7, %v1549_v34, %v7324_v9  ;;  %v1610_v46 = vsub.s32 32, %v1609_v38  ;;  %v1612_v28 = vshll.u32 %v8644_v2, %v1609_v38  ;;  %v1615_v56 = vshll.u32 %v8641_v8, %v1609_v38 }
 0x1ac   : > { %v1551_v43 = vadd.s32 %v1550_v31, %v1546_v14  ;;  %v1618_v1 = vshll.u32 %v8642_v24, %v1609_v38  ;;  %v1621_v45 = vshll.u32 %v8643_v21, %v1609_v38  ;;  %v1624_v48 = vshll.u32 %v8659_v60, %v1609_v38 }
 0x1ad   : > { %v1613_v22 = vshrl.u32 %v8641_v8, %v1610_v46  ;;  %v1616_v6 = vshrl.u32 %v8642_v24, %v1610_v46  ;;  %v1619_v57 = vshrl.u32 %v8643_v21, %v1610_v46  ;;  %v1622_v33 = vshrl.u32 %v8659_v60, %v1610_v46 }
 0x1ae   : > { %v1552_v3 = vadd.s32 536870912, %v1551_v43  ;;  %v1625_v9 = vshrl.u32 %v8660_v11, %v1610_v46  ;;  %v2725_v14 = vand.u32 3, %v7366_v61  ;;  %vm1627_vm14 = vcmp.lt.s32.totalorder %v7360_v41, 1 }
 0x1af   : > { %v1614_v17 = vor.u32 %v1613_v22, %v1612_v28  ;;  %v1617_v13 = vor.u32 %v1616_v6, %v1615_v56  ;;  %v1620_v59 = vor.u32 %v1619_v57, %v1618_v1  ;;  %v7384_v26 = vpop.eup %5947  ;;  %v1623_v31 = vor.u32 %v1622_v33, %v1621_v45  ;;  %v8669_v6 = vld [vmem:[#allocation8_spill] sm:$0xff]  ;;  %v7401_v33 = vpop.permute.xlu0 %272 }
 0x1b0   : > { %v7386_v34 = vshrl.u32 %v1552_v3, 30  ;;  %v1626_v37 = vor.u32 %v1625_v9, %v1624_v48  ;;  %v1611_v36 = vshrl.u32 %v8644_v2, %v1610_v46  ;;  %vm1630_vm10 = vcmp.lt.s32.totalorder %v7360_v41, 4  ;;  %v7399_v3 = vpop.permute.xlu1 %318 }
 0x1b1   : > { %v1635_v38 = vsel %vm1627_vm14, %v1614_v17, %v1617_v13  ;;  %v960_v28 = vadd.s32 3, %v956_v10  ;;  %vm1629_vm11 = vcmp.lt.s32.totalorder %v7360_v41, 3  ;;  %v1632_v1 = vsel %vm1630_vm10, %v1620_v59, 2102212464  ;;  %v8670_v10 = vld [vmem:[#allocation9_spill] sm:$0xff] }
 0x1b2   : > { %v1554_v56 = vshll.u32 %v7386_v34, 30  ;;  %v1636_v22 = vsel %vm1630_vm10, %v1623_v31, 920167782  ;;  %vm959_vm9 = vweird.f32 %v8669_v6  ;;  %vm1628_vm5 = vcmp.lt.s32.totalorder %v7360_v41, 2 }
 0x1b3   : > { %v1637_v57 = vsel %vm1629_vm11, %v1620_v59, %v1636_v22  ;;  %v1639_v46 = vsel %vm1627_vm14, %v1617_v13, %v1620_v59  ;;  %v1640_v45 = vsel %vm1630_vm10, %v1626_v37, 1326507024  ;;  %vm1063_vm1 = vweird.f32 %v8670_v10 }
 0x1b4   : > { %v7404_v48 = vsub.s32 %v1551_v43, %v1554_v56  ;;  %v1631_v9 = vsel %vm1627_vm14, %v1611_v36, %v1614_v17  ;;  %v1633_v63 = vsel %vm1629_vm11, %v1617_v13, %v1632_v1  ;;  %v1638_v20 = vsel %vm1628_vm5, %v1635_v38, %v1637_v57 }
 0x1b5   : > { %v1641_v22 = vsel %vm1629_vm11, %v1623_v31, %v1640_v45  ;;  %v7411_v62 = vmul.u32.u64.low %v7357_v0, %v1638_v20  ;;  %v7412_v59 = vmul.u32.u64.high %v7357_v0, %v1638_v20, %v7411_v62  ;;  %vm2623_vm3 = vcmp.lt.s32.totalorder %v2622_v44, 2 }
 0x1b6   : > { %v1557_v37 = vsub.s32 0, %v7404_v48  ;;  %v1642_v43 = vsel %vm1628_vm5, %v1639_v46, %v1641_v22  ;;  %vm2624_vm13 = vcmp.eq.s32.totalorder %v2622_v44, 0  ;;  %vm2627_vm6 = vcmp.eq.s32.totalorder %v2622_v44, 2  ;;  %v507_v22 = vpop.permute.xlu1 %506 }
 0x1b7   : > { %v7419_v36 = vmul.u32.u64.low %v7357_v0, %v1642_v43  ;;  %v7420_v17 = vmul.u32.u64.high %v7357_v0, %v1642_v43, %v7419_v36  ;;  %v8671_v13 = vxor.u32 2147483648, %v7020_v40  ;;  %v8672_v20 = vxor.u32 2147483648, %v7015_v58  ;;  %v7435_v43 = vpop.permute.xlu0 %460 }
 0x1b8   : > { %v5128_v56 = vmin.u32 %v1557_v37, %v7404_v48  ;;  %v1634_v1 = vsel %vm1628_vm5, %v1631_v9, %v1633_v63  ;;  %vm2727_vm8 = vcmp.eq.s32.totalorder %v2725_v14, 0  ;;  %v1653_v44 = vadd.s32 1, %v7412_v59 }
 0x1b9   : > { %v2626_v31 = vsel %vm2624_vm13, %v7015_v58, %v8671_v13  ;;  %v2629_v38 = vsel %vm2627_vm6, %v8672_v20, %v7020_v40  ;;  %vm2726_vm4 = vcmp.lt.s32.totalorder %v2725_v14, 2  ;;  %v8673_v46 = vxor.u32 2147483648, %v7098_v12 }
 0x1ba   : > { %v2630_v57 = vsel %vm2623_vm3, %v2626_v31, %v2629_v38  ;;  %vm2730_vm7 = vcmp.eq.s32.totalorder %v2725_v14, 2  ;;  %v1559_v36 = vclz %v5128_v56  ;;  %v8674_v37 = vxor.u32 2147483648, %v8668_v4 }
 0x1bb   : > { %v2729_v45 = vsel %vm2727_vm8, %v8668_v4, %v8673_v46  ;;  %v961_v41 = vand.u32 3, %v960_v28  ;;  %v1064_v63 = vadd.s32 3, %v7366_v61  ;;  %v1650_v9 = vmul.u32 %v7357_v0, %v1634_v1 }
 0x1bc   : > { %v2732_v13 = vsel %vm2730_vm7, %v8674_v37, %v7098_v12  ;;  %vm1652_vm14 = vc.u32 %v7420_v17, %v7411_v62  ;;  %v2631_v31 = vsel %vm959_vm9, nan, %v2630_v57  ;;  %v5129_v20 = vadd.s32 4294967294, %v1559_v36  ;;  %v7467_v37 = vld [vmem:[%s8566_s1] ss:$0 sm:$0xff] }
 0x1bd   : > { %v2733_v14 = vsel %vm2726_vm4, %v2729_v45, %v2732_v13  ;;  %v1654_v38 = vsel %vm1652_vm14, %v1653_v44, %v7412_v59  ;;  %vm8675_vm10 = vcmask 392192   ;;  %vm963_vm11 = vcmp.eq.s32.totalorder %v961_v41, 0 }
 0x1be   : > { %v2734_v56 = vsel %vm1063_vm1, nan, %v2733_v14  ;;  %v630_v28 = vsel %vm8675_vm10, %v7348_v52, %v507_v22  ;;  %v1655_v46 = vadd.s32 %v1654_v38, %v1650_v9  ;;  %vm966_vm5 = vcmp.eq.s32.totalorder %v961_v41, 2  ;;  %v7472_v9 = vpop.permute.xlu0 %320 }
 0x1bf   : > { %v5860_v61 = vpack.i.bf16 %v2734_v56, %v2631_v31  ;;  %v8676_v0 = vand.u32 2147483647, %v6955_v7  ;;  %vm5130_vm13 = vcmp.lt.s32.totalorder %v5129_v20, 0  ;;  %v8679_v57 = vxor.u32 2147483648, %v7020_v40 }
 0x1c0   : > { %v8680_v44 = vxor.u32 2147483648, %v7015_v58  ;;  %v1065_v52 = vand.u32 3, %v1064_v63  ;;  %v1562_v22 = vsel %vm5130_vm13, 0, %v5129_v20  ;;  %v1656_v36 = vadd.s32 536870912, %v1655_v46 }
 0x1c1   : > { %vm7453_vm3 = vcmp.le.f32.partialorder %v8676_v0, 0.7853982  ;;  %v965_v59 = vsel %vm963_vm11, %v7015_v58, %v8679_v57  ;;  %5861 = vrot.lane.b32.xlu1 %v5860_v61, %s6126_s20  ;;  %vm962_vm6 = vcmp.lt.s32.totalorder %v961_v41, 2  ;;  %v7470_v13 = vmul.f32 %v7467_v37, %v630_v28 }
 0x1c2   : > { %v968_v45 = vsel %vm966_vm5, %v8680_v44, %v7020_v40  ;;  %v1547_v58 = vadd.s32 %v7323_v47, %v7318_v29  ;;  %v1563_v40 = vsub.s32 32, %v1562_v22  ;;  %v1567_v63 = vsub.s32 4294967266, %v1562_v22 }
 0x1c3   : > { %v969_v31 = vsel %vm962_vm6, %v965_v59, %v968_v45  ;;  %v7476_v14 = vshrl.u32 %v1656_v36, 30  ;;  %vm1066_vm8 = vcmp.lt.s32.totalorder %v1065_v52, 2  ;;  %vm1067_vm4 = vcmp.eq.s32.totalorder %v1065_v52, 0 }
 0x1c4   : > { %vm1070_vm7 = vcmp.eq.s32.totalorder %v1065_v52, 2  ;;  %v1565_v41 = vshrl.u32 %v1547_v58, %v1563_v40  ;;  %v1568_v20 = vadd.s32 127, %v1567_v63  ;;  %v8681_v38 = vxor.u32 2147483648, %v7098_v12  ;;  %v367_v52 = vpop.permute.xlu1 %366  ;;  %v509_v40 = vpop.permute.xlu0 %508 }
 0x1c5   : > { %v8682_v28 = vxor.u32 2147483648, %v8668_v4  ;;  %vm1493_vm14 = vcmp.lt.s32.totalorder %v7178_v51, 0  ;;  %v1564_v29 = vshll.u32 %v7404_v48, %v1562_v22  ;;  %v1658_v47 = vshll.u32 %v7476_v14, 30 }
 0x1c6   : > { %v1069_v56 = vsel %vm1067_vm4, %v8668_v4, %v8681_v38  ;;  %v8607_v57 = vand.u32 2147483647, %v7470_v13  ;;  %v8683_v59 = vxor.u32 2147483648, %v7306_v53  ;;  %v1569_v45 = vshll.u32 %v1568_v20, 23 }
 0x1c7   : > { %v1072_v61 = vsel %vm1070_vm7, %v8682_v28, %v7098_v12  ;;  %v970_v4 = vsel %vm959_vm9, nan, %v969_v31  ;;  %v1566_v48 = vor.u32 %v1565_v41, %v1564_v29  ;;  %vm8684_vm10 = vcmask 130048   ;;  %v5995_v28 = vld [vmem:[%s6241_s6 + $0x60] sm:$0xff] }
 0x1c8   : > { %v1073_v0 = vsel %vm1066_vm8, %v1069_v56, %v1072_v61  ;;  %v1472_v44 = vsel %vm1389_vm2, %v8683_v59, %v7306_v53  ;;  %v563_v22 = vsel %vm8684_vm10, %v7265_v42, %v7185_v18  ;;  %v7500_v36 = vsub.s32 %v1655_v46, %v1658_v47  ;;  %vm8690_vm13 = vmmov %vm8684_vm10 }
 0x1c9   : > { %v1074_v12 = vsel %vm1063_vm1, nan, %v1073_v0  ;;  %v1570_v53 = vor.u32 4788187, %v1569_v45  ;;  %vm8685_vm2 = vcmask 195584   ;;  %v1702_v10 = vand.u32 2139095040, %v7470_v13  ;;  %v7526_v0 = vpop.permute.xlu1 %368  ;;  %vm8695_vm7 = vmmov %vm8684_vm10 }
 0x1ca   : > { %v5855_v58 = vpack.i.bf16 %v1074_v12, %v970_v4  ;;  %v580_v6 = vsel %vm8685_vm2, %v563_v22, %v7268_v32  ;;  %v1475_v63 = vsel %vm7453_vm3, %v6955_v7, %v1472_v44  ;;  %v1661_v31 = vsub.s32 0, %v7500_v36  ;;  %v415_v4 = vpop.permute.xlu0 %414  ;;  %vm8694_vm8 = vmmov %vm8685_vm2 }
 0x1cb   : > { %vm8686_vm9 = vcmask 261120   ;;  %v1706_v42 = vand.u32 8388607, %v8607_v57  ;;  %v1571_v46 = vand.u32 2147483647, %v1570_v53  ;;  %v1577_v41 = vsub.s32 4, %v7386_v34 }
 0x1cc   : > { %v597_v18 = vsel %vm8686_vm9, %v580_v6, %v7378_v23  ;;  %5856 = vrot.lane.b32.xlu0 %v5855_v58, %s6115_s29  ;;  %v1703_v32 = vshrl.u32 %v1702_v10, 23  ;;  %vm8687_vm1 = vcmask 326656   ;;  %v1573_v38 = vcvt.s32.f32 %v1566_v48  ;;  %vm8696_vm10 = vmmov %vm8686_vm9 }
 0x1cd   : > { %v614_v20 = vsel %vm8687_vm1, %v597_v18, %v7435_v43  ;;  %v5132_v56 = vmin.u32 %v1661_v31, %v7500_v36  ;;  %vm8688_vm11 = vcmask 64512   ;;  %vm8689_vm5 = vcmask 392192  }
 0x1ce   : > { %v547_v23 = vsel %vm8688_vm11, %v5995_v28, %v7300_v50  ;;  %v631_v61 = vsel %vm8689_vm5, %v614_v20, %v509_v40  ;;  %5951 = vsinq.f32 %v7344_v5  ;;  %v5135_v47 = vadd.s32 4294967169, %v1703_v32  ;;  %v5996_v5 = vld [vmem:[%s6241_s6 + $0x68] sm:$0xff]  ;;  %vm8693_vm6 = vmmov %vm8688_vm11 }
 0x1cf   : > { %v564_v29 = vsel %vm8690_vm13, %v547_v23, %v7399_v3  ;;  %v7529_v43 = vmul.f32 %v7467_v37, %v631_v61  ;;  %5953 = vcosq.f32 %v1475_v63  ;;  %v7531_v59 = vmul.f32 %v1573_v38, %v1571_v46 }
 0x1d0   : > { %v1663_v44 = vclz %v5132_v56  ;;  %v1707_v45 = vor.u32 8388608, %v1706_v42  ;;  %5955 = vsinq.f32 %v1475_v63  ;;  %v7536_v50 = vsel %vm1493_vm14, %v1577_v41, %v7386_v34  ;;  %v7559_v42 = vpop.permute.xlu1 %274 }
 0x1d1   : > { %8691 = vst [vmem:[#allocation13_spill] sm:$0xff] %v7529_v43  ;;  %8692 = vst [vmem:[#allocation8_spill] sm:$0xff] %v7536_v50  ;;  %v548_v3 = vsel %vm8693_vm6, %v5996_v5, %v7401_v33  ;;  %v1709_v12 = vadd.s32 1, %v5135_v47  ;;  %v1651_v48 = vadd.s32 %v7411_v62, %v7420_v17  ;;  %v581_v58 = vsel %vm8694_vm8, %v564_v29, %v367_v52  ;;  %v7556_v17 = vpop.eup %5949 }
 0x1d2   : > { %v5133_v22 = vadd.s32 4294967294, %v1663_v44  ;;  %v1806_v40 = vand.u32 2139095040, %v7529_v43  ;;  %v7548_v34 = vsel %vm8695_vm7, %v548_v3, %v7472_v9  ;;  %v7551_v6 = vsel %vm8696_vm10, %v581_v58, %v415_v4  ;;  %vm8707_vm7 = vmmov %vm8696_vm10 }
 0x1d3   : > { %vm1710_vm4 = vcmp.gt.s32.totalorder %v1709_v12, 0  ;;  %v1575_v33 = vxor.u32 2147483648, %v7531_v59  ;;  %v7554_v62 = vshll.u32 %v1707_v45, 8  ;;  %vm1597_vm9 = vcmp.lt.s32.totalorder %v7248_v39, 0 }
 0x1d4   : > { %vm5134_vm2 = vcmp.lt.s32.totalorder %v5133_v22, 0  ;;  %v1711_v10 = vsel %vm1710_vm4, %v1709_v12, 0  ;;  %v1807_v18 = vshrl.u32 %v1806_v40, 23  ;;  %v8698_v57 = vmov 0 }
 0x1d5   : > { %v1666_v52 = vsel %vm5134_vm2, 0, %v5133_v22  ;;  %v1713_v63 = vand.u32 31, %v1711_v10  ;;  %v1712_v32 = vshrl.u32 %v1711_v10, 5  ;;  %vm8706_vm4 = vcmask 326656  }
 0x1d6   : > { %v1667_v9 = vsub.s32 32, %v1666_v52  ;;  %v1668_v46 = vshll.u32 %v7500_v36, %v1666_v52  ;;  %v1671_v41 = vsub.s32 4294967266, %v1666_v52  ;;  %vm8708_vm10 = vcmask 130048  }
 0x1d7   : > { %v1714_v20 = vsub.s32 32, %v1713_v63  ;;  %v1716_v38 = vshll.u32 %v8644_v2, %v1713_v63  ;;  %v1719_v56 = vshll.u32 %v8641_v8, %v1713_v63  ;;  %v1722_v28 = vshll.u32 %v8642_v24, %v1713_v63 }
 0x1d8   : > { %v1669_v23 = vshrl.u32 %v1651_v48, %v1667_v9  ;;  %v1672_v61 = vadd.s32 127, %v1671_v41  ;;  %v1725_v29 = vshll.u32 %v8643_v21, %v1713_v63  ;;  %v1728_v47 = vshll.u32 %v8659_v60, %v1713_v63  ;;  %v7567_v44 = vpop.eup %5951  ;;  %v463_v9 = vpop.permute.xlu1 %462 }
 0x1d9   : > { %v1715_v45 = vshrl.u32 %v8644_v2, %v1714_v20  ;;  %v1717_v36 = vshrl.u32 %v8641_v8, %v1714_v20  ;;  %v1720_v4 = vshrl.u32 %v8642_v24, %v1714_v20  ;;  %v1723_v5 = vshrl.u32 %v8643_v21, %v1714_v20  ;;  %v7573_v3 = vpop.eup %5953 }
 0x1da   : > { %v1670_v12 = vor.u32 %v1669_v23, %v1668_v46  ;;  %v1673_v48 = vshll.u32 %v1672_v61, 23  ;;  %v1726_v22 = vshrl.u32 %v8659_v60, %v1714_v20  ;;  %v1729_v58 = vshrl.u32 %v8660_v11, %v1714_v20  ;;  %v7578_v40 = vpop.eup %5955 }
 0x1db   : > { %v1718_v10 = vor.u32 %v1717_v36, %v1716_v38  ;;  %v1721_v52 = vor.u32 %v1720_v4, %v1719_v56  ;;  %v1724_v63 = vor.u32 %v1723_v5, %v1722_v28  ;;  %vm1731_vm1 = vcmp.lt.s32.totalorder %v1712_v32, 1 }
 0x1dc   : > { %v8697_v41 = vand.u32 2147483647, %v7178_v51  ;;  %v1674_v53 = vor.u32 4788187, %v1673_v48  ;;  %v1677_v46 = vcvt.s32.f32 %v1670_v12  ;;  %v1727_v23 = vor.u32 %v1726_v22, %v1725_v29 }
 0x1dd   : > { %v1730_v61 = vor.u32 %v1729_v58, %v1728_v47  ;;  %vm1732_vm5 = vcmp.lt.s32.totalorder %v1712_v32, 2  ;;  %vm1733_vm13 = vcmp.lt.s32.totalorder %v1712_v32, 3  ;;  %vm1734_vm6 = vcmp.lt.s32.totalorder %v1712_v32, 4 }
 0x1de   : > { %vm7582_vm11 = vcmp.le.f32.partialorder %v8697_v41, 0.7853982  ;;  %v1735_v20 = vsel %vm1731_vm1, %v1715_v45, %v1718_v10  ;;  %v1675_v38 = vand.u32 2147483647, %v1674_v53  ;;  %v1736_v56 = vsel %vm1734_vm6, %v1724_v63, 2102212464 }
 0x1df   : > { %v8699_v57 = vsel %vm7582_vm11, 4294967295, %v8698_v57  ;;  %v1739_v28 = vsel %vm1731_vm1, %v1718_v10, %v1721_v52  ;;  %v1740_v36 = vsel %vm1734_vm6, %v1727_v23, 920167782  ;;  %v1737_v4 = vsel %vm1733_vm13, %v1721_v52, %v1736_v56  ;;  %v5997_v56 = vld [vmem:[%s6241_s6 + $0x70] sm:$0xff] }
 0x1e0   : > { %8700 = vst [vmem:[#allocation9_spill] sm:$0xff] %v8699_v57  ;;  %v1741_v5 = vsel %vm1733_vm13, %v1724_v63, %v1740_v36  ;;  %v1743_v41 = vsel %vm1731_vm1, %v1721_v52, %v1724_v63  ;;  %v1744_v31 = vsel %vm1734_vm6, %v1730_v61, 1326507024  ;;  %v1576_v29 = vsel %vm1493_vm14, %v1575_v33, %v7531_v59  ;;  %v417_v52 = vpop.permute.xlu0 %416  ;;  %v323_v63 = vpop.permute.xlu1 %322  ;;  %vm8704_vm14 = vmmov %vm8694_vm8 }
 0x1e1   : > { %v1742_v47 = vsel %vm1732_vm5, %v1739_v28, %v1741_v5  ;;  %v1745_v12 = vsel %vm1733_vm13, %v1727_v23, %v1744_v31  ;;  %v8701_v45 = vand.u32 2147483647, %v7529_v43  ;;  %v7595_v48 = vmul.f32 %v1677_v46, %v1675_v38 }
 0x1e2   : > { %v1746_v22 = vsel %vm1732_vm5, %v1743_v41, %v1745_v12  ;;  %v7599_v58 = vmul.u32.u64.low %v7554_v62, %v1742_v47  ;;  %v7600_v10 = vmul.u32.u64.high %v7554_v62, %v1742_v47, %v7599_v58  ;;  %v1738_v61 = vsel %vm1732_vm5, %v1735_v20, %v1737_v4  ;;  %v8709_v4 = vld [vmem:[#allocation12_spill] sm:$0xff] }
 0x1e3   : > { %v1810_v53 = vand.u32 8388607, %v8701_v45  ;;  %v7604_v59 = vmul.u32.u64.low %v7554_v62, %v1746_v22  ;;  %v7605_v33 = vmul.u32.u64.high %v7554_v62, %v1746_v22, %v7604_v59  ;;  %v5139_v31 = vadd.s32 4294967169, %v1807_v18 }
 0x1e4   : > { %v8702_v23 = vsub.s32 4, %v7476_v14  ;;  %v582_v38 = vsel %vm8704_vm14, %v7548_v34, %v7526_v0  ;;  %vm8705_vm8 = vcmask 64512   ;;  %v7622_v20 = vsel %vm8706_vm4, %v7551_v6, %v463_v9  ;;  %v511_v5 = vpop.permute.xlu1 %510 }
 0x1e5   : > { %v549_v32 = vsel %vm8705_vm8, %v5997_v56, %v7559_v42  ;;  %v1811_v18 = vor.u32 8388608, %v1810_v53  ;;  %v1813_v28 = vadd.s32 1, %v5139_v31  ;;  %v7625_v36 = vsel %vm8707_vm7, %v582_v38, %v417_v52 }
 0x1e6   : > { %v7612_v46 = vsel %vm1597_vm9, %v8702_v23, %v7476_v14  ;;  %v7628_v14 = vsel %vm8708_vm10, %v549_v32, %v323_v63  ;;  %v7633_v0 = vsel %vm7582_vm11, %v7178_v51, %v1576_v29  ;;  %v1754_v34 = vmul.u32 %v7554_v62, %v1738_v61 }
 0x1e7   : > { %8703 = vst [vmem:[#allocation15_spill] sm:$0xff] %v7612_v46  ;;  %v1757_v42 = vadd.s32 1, %v7600_v10  ;;  %v1164_v6 = vsel %vm7172_vm0, 0, %v8709_v4  ;;  %vm1756_vm2 = vc.u32 %v7605_v33, %v7599_v58  ;;  %vm1814_vm1 = vcmp.gt.s32.totalorder %v1813_v28, 0 }
 0x1e8   : > { %v1815_v47 = vsel %vm1814_vm1, %v1813_v28, 0  ;;  %v1268_v62 = vsel %vm7193_vm15, 0, %v7243_v27  ;;  %v7648_v30 = vshll.u32 %v1811_v18, 8  ;;  %v7652_v22 = vadd.s32 %v7599_v58, %v7605_v33  ;;  %v7668_v28 = vpop.permute.xlu0 %276 }
 0x1e9   : > { %v1758_v41 = vsel %vm1756_vm2, %v1757_v42, %v7600_v10  ;;  %v1817_v45 = vand.u32 31, %v1815_v47  ;;  %v1816_v52 = vshrl.u32 %v1815_v47, 5  ;;  %v7655_v10 = vand.u32 3, %v1164_v6 }
 0x1ea   : > { %v1759_v12 = vadd.s32 %v1758_v41, %v1754_v34  ;;  %v7657_v31 = vand.u32 3, %v1268_v62  ;;  %v1168_v25 = vadd.s32 3, %v1164_v6  ;;  %vm8712_vm8 = vcmask 392192  }
 0x1eb   : > { %v1818_v59 = vsub.s32 32, %v1817_v45  ;;  %v1820_v27 = vshll.u32 %v8644_v2, %v1817_v45  ;;  %v1823_v23 = vshll.u32 %v8641_v8, %v1817_v45  ;;  %v1826_v38 = vshll.u32 %v8642_v24, %v1817_v45 }
 0x1ec   : > { %v1760_v61 = vadd.s32 536870912, %v1759_v12  ;;  %v1829_v56 = vshll.u32 %v8643_v21, %v1817_v45  ;;  %v1832_v18 = vshll.u32 %v8659_v60, %v1817_v45  ;;  %vm1835_vm0 = vcmp.lt.s32.totalorder %v1816_v52, 1 }
 0x1ed   : > { %v1821_v33 = vshrl.u32 %v8641_v8, %v1818_v59  ;;  %v1824_v32 = vshrl.u32 %v8642_v24, %v1818_v59  ;;  %v1827_v34 = vshrl.u32 %v8643_v21, %v1818_v59  ;;  %v1830_v42 = vshrl.u32 %v8659_v60, %v1818_v59 }
 0x1ee   : > { %v7663_v58 = vshrl.u32 %v1760_v61, 30  ;;  %v1833_v4 = vshrl.u32 %v8660_v11, %v1818_v59  ;;  %v1819_v41 = vshrl.u32 %v8644_v2, %v1818_v59  ;;  %vm1836_vm15 = vcmp.lt.s32.totalorder %v1816_v52, 2  ;;  %v8710_v59 = vld [vmem:[#allocation10_spill] sm:$0xff] }
 0x1ef   : > { %v1822_v47 = vor.u32 %v1821_v33, %v1820_v27  ;;  %v1825_v61 = vor.u32 %v1824_v32, %v1823_v23  ;;  %v1828_v9 = vor.u32 %v1827_v34, %v1826_v38  ;;  %v1831_v63 = vor.u32 %v1830_v42, %v1829_v56  ;;  %v8711_v56 = vld [vmem:[#allocation11_spill] sm:$0xff]  ;;  %v7685_v33 = vpop.permute.xlu0 %464 }
 0x1f0   : > { %v1762_v6 = vshll.u32 %v7663_v58, 30  ;;  %v1834_v53 = vor.u32 %v1833_v4, %v1832_v18  ;;  %vm1837_vm5 = vcmp.lt.s32.totalorder %v1816_v52, 3  ;;  %vm1838_vm13 = vcmp.lt.s32.totalorder %v1816_v52, 4 }
 0x1f1   : > { %v1839_v29 = vsel %vm1835_vm0, %v1819_v41, %v1822_v47  ;;  %v1840_v46 = vsel %vm1838_vm13, %v1828_v9, 2102212464  ;;  %v1843_v51 = vsel %vm1835_vm0, %v1822_v47, %v1825_v61  ;;  %v1844_v57 = vsel %vm1838_vm13, %v1831_v63, 920167782 }
 0x1f2   : > { %v7675_v45 = vsub.s32 %v1759_v12, %v1762_v6  ;;  %v1847_v50 = vsel %vm1835_vm0, %v1825_v61, %v1828_v9  ;;  %vm1167_vm6 = vweird.f32 %v8710_v59  ;;  %v1841_v23 = vsel %vm1837_vm5, %v1825_v61, %v1840_v46 }
 0x1f3   : > { %v1845_v12 = vsel %vm1837_vm5, %v1828_v9, %v1844_v57  ;;  %v1848_v38 = vsel %vm1838_vm13, %v1834_v53, 1326507024  ;;  %vm1271_vm14 = vweird.f32 %v8711_v56  ;;  %v1272_v34 = vadd.s32 3, %v1268_v62 }
 0x1f4   : > { %v1765_v27 = vsub.s32 0, %v7675_v45  ;;  %v1846_v32 = vsel %vm1836_vm15, %v1843_v51, %v1845_v12  ;;  %v1849_v18 = vsel %vm1837_vm5, %v1831_v63, %v1848_v38  ;;  %v632_v42 = vsel %vm8712_vm8, %v7622_v20, %v511_v5 }
 0x1f5   : > { %v1850_v6 = vsel %vm1836_vm15, %v1847_v50, %v1849_v18  ;;  %v7694_v46 = vmul.u32.u64.low %v7648_v30, %v1846_v32  ;;  %v7695_v57 = vmul.u32.u64.high %v7648_v30, %v1846_v32, %v7694_v46  ;;  %v1842_v9 = vsel %vm1836_vm15, %v1839_v29, %v1841_v23  ;;  %v7718_v23 = vpop.permute.xlu0 %324 }
 0x1f6   : > { %v5136_v4 = vmin.u32 %v1765_v27, %v7675_v45  ;;  %v7700_v53 = vmul.u32.u64.low %v7648_v30, %v1850_v6  ;;  %v7701_v51 = vmul.u32.u64.high %v7648_v30, %v1850_v6, %v7700_v53  ;;  %vm2830_vm4 = vcmp.eq.s32.totalorder %v7655_v10, 0 }
 0x1f7   : > { %vm2829_vm7 = vcmp.lt.s32.totalorder %v7655_v10, 2  ;;  %v8713_v20 = vxor.u32 2147483648, %v7302_v55  ;;  %vm2833_vm10 = vcmp.eq.s32.totalorder %v7655_v10, 2  ;;  %v8714_v5 = vxor.u32 2147483648, %v7286_v16 }
 0x1f8   : > { %v1767_v62 = vclz %v5136_v4  ;;  %vm2933_vm2 = vcmp.eq.s32.totalorder %v7657_v31, 0  ;;  %vm2936_vm1 = vcmp.eq.s32.totalorder %v7657_v31, 2  ;;  %v1169_v29 = vand.u32 3, %v1168_v25 }
 0x1f9   : > { %v2832_v50 = vsel %vm2830_vm4, %v7286_v16, %v8713_v20  ;;  %v2835_v52 = vsel %vm2833_vm10, %v8714_v5, %v7302_v55  ;;  %v1861_v41 = vadd.s32 1, %v7695_v57  ;;  %v8715_v61 = vxor.u32 2147483648, %v7384_v26 }
 0x1fa   : > { %v5137_v63 = vadd.s32 4294967294, %v1767_v62  ;;  %v2836_v47 = vsel %vm2829_vm7, %v2832_v50, %v2835_v52  ;;  %v8716_v10 = vand.u32 2147483647, %v7248_v39  ;;  %v1858_v38 = vmul.u32 %v7648_v30, %v1842_v9 }
 0x1fb   : > { %v2935_v27 = vsel %vm2933_vm2, %v7304_v19, %v8715_v61  ;;  %vm1860_vm15 = vc.u32 %v7701_v51, %v7694_v46  ;;  %vm2932_vm5 = vcmp.lt.s32.totalorder %v7657_v31, 2  ;;  %v8719_v25 = vxor.u32 2147483648, %v7304_v19 }
 0x1fc   : > { %vm7722_vm0 = vcmp.le.f32.partialorder %v8716_v10, 0.7853982  ;;  %vm5138_vm13 = vcmp.lt.s32.totalorder %v5137_v63, 0  ;;  %v1862_v18 = vsel %vm1860_vm15, %v1861_v41, %v7695_v57  ;;  %v2837_v4 = vsel %vm1167_vm6, nan, %v2836_v47  ;;  %v7742_v47 = vpop.permute.xlu1 %370 }
 0x1fd   : > { %v2938_v32 = vsel %vm2936_vm1, %v8719_v25, %v7384_v26  ;;  %v1770_v53 = vsel %vm5138_vm13, 0, %v5137_v63  ;;  %v1863_v62 = vadd.s32 %v1862_v18, %v1858_v38  ;;  %vm1171_vm8 = vcmp.eq.s32.totalorder %v1169_v29, 0  ;;  %v513_v38 = vpop.permute.xlu0 %512 }
 0x1fe   : > { %v2939_v6 = vsel %vm2932_vm5, %v2935_v27, %v2938_v32  ;;  %v1771_v9 = vsub.s32 32, %v1770_v53  ;;  %v1772_v31 = vshll.u32 %v7675_v45, %v1770_v53  ;;  %v1775_v20 = vsub.s32 4294967266, %v1770_v53 }
 0x1ff   : > { %v2940_v30 = vsel %vm1271_vm14, nan, %v2939_v6  ;;  %v1864_v5 = vadd.s32 536870912, %v1863_v62  ;;  %v8720_v52 = vxor.u32 2147483648, %v7302_v55  ;;  %vm1174_vm4 = vcmp.eq.s32.totalorder %v1169_v29, 2 }
 0x200   : > { %v5870_v50 = vpack.i.bf16 %v2940_v30, %v2837_v4  ;;  %v1273_v41 = vand.u32 3, %v1272_v34  ;;  %v1773_v63 = vshrl.u32 %v7652_v22, %v1771_v9  ;;  %v1776_v61 = vadd.s32 127, %v1775_v20 }
 0x201   : > { %v1173_v57 = vsel %vm1171_vm8, %v7286_v16, %v8720_v52  ;;  %v8721_v27 = vxor.u32 2147483648, %v7286_v16  ;;  %v7750_v10 = vmul.f32 %v7467_v37, %v632_v42  ;;  %v8722_v25 = vxor.u32 2147483648, %v7595_v48 }
 0x202   : > { %5871 = vrot.lane.b32.xlu1 %v5870_v50, %s6126_s20  ;;  %v1865_v32 = vshrl.u32 %v1864_v5, 30  ;;  %vm1170_vm7 = vcmp.lt.s32.totalorder %v1169_v29, 2  ;;  %vm1275_vm10 = vcmp.eq.s32.totalorder %v1273_v41, 0  ;;  %vm1701_vm2 = vcmp.lt.s32.totalorder %v7470_v13, 0  ;;  %v373_v5 = vpop.permute.xlu1 %372 }
 0x203   : > { %v1176_v45 = vsel %vm1174_vm4, %v8721_v27, %v7302_v55  ;;  %v1680_v34 = vsel %vm1597_vm9, %v8722_v25, %v7595_v48  ;;  %v1774_v22 = vor.u32 %v1773_v63, %v1772_v31  ;;  %v1777_v18 = vshll.u32 %v1776_v61, 23 }
 0x204   : > { %vm1805_vm1 = vcmp.lt.s32.totalorder %v7529_v43, 0  ;;  %v1177_v55 = vsel %vm1170_vm7, %v1173_v57, %v1176_v45  ;;  %v8723_v16 = vxor.u32 2147483648, %v7384_v26  ;;  %5957 = vcosq.f32 %v7633_v0 }
 0x205   : > { %v1866_v4 = vshll.u32 %v1865_v32, 30  ;;  %vm1278_vm15 = vcmp.eq.s32.totalorder %v1273_v41, 2  ;;  %v8612_v48 = vand.u32 2147483647, %v7750_v10  ;;  %v1683_v29 = vsel %vm7722_vm0, %v7248_v39, %v1680_v34  ;;  %v5998_v34 = vld [vmem:[%s6241_s6 + $0x78] sm:$0xff] }
 0x206   : > { %v1277_v42 = vsel %vm1275_vm10, %v7304_v19, %v8723_v16  ;;  %v1778_v6 = vor.u32 4788187, %v1777_v18  ;;  %vm1274_vm9 = vcmp.lt.s32.totalorder %v1273_v41, 2  ;;  %v8724_v53 = vxor.u32 2147483648, %v7304_v19  ;;  %v419_v19 = vpop.permute.xlu0 %418 }
 0x207   : > { %v1781_v9 = vcvt.s32.f32 %v1774_v22  ;;  %v7770_v31 = vsub.s32 %v1863_v62, %v1866_v4  ;;  %v1178_v20 = vsel %vm1167_vm6, nan, %v1177_v55  ;;  %v1910_v63 = vand.u32 2139095040, %v7750_v10 }
 0x208   : > { %v1280_v30 = vsel %vm1278_vm15, %v8724_v53, %v7384_v26  ;;  %v1779_v52 = vand.u32 2147483647, %v1778_v6  ;;  %v1914_v41 = vand.u32 8388607, %v8612_v48  ;;  %v1785_v26 = vsub.s32 4, %v7663_v58 }
 0x209   : > { %v1281_v50 = vsel %vm1274_vm9, %v1277_v42, %v1280_v30  ;;  %v1869_v62 = vsub.s32 0, %v7770_v31  ;;  %v1889_v61 = vsub.s32 4, %v1865_v32  ;;  %5959 = vsinq.f32 %v7633_v0 }
 0x20a   : > { %v1282_v57 = vsel %vm1271_vm14, nan, %v1281_v50  ;;  %v1782_v27 = vmul.f32 %v1781_v9, %v1779_v52  ;;  %v1911_v45 = vshrl.u32 %v1910_v63, 23  ;;  %vm8725_vm6 = vcmask 326656   ;;  %v467_v30 = vpop.permute.xlu0 %466 }
 0x20b   : > { %v5865_v59 = vpack.i.bf16 %v1282_v57, %v1178_v20  ;;  %v616_v56 = vsel %vm8725_vm6, %v7625_v36, %v7685_v33  ;;  %5961 = vcosq.f32 %v1683_v29  ;;  %v5140_v25 = vmin.u32 %v1869_v62, %v7770_v31 }
 0x20c   : > { %vm8726_vm14 = vcmask 64512   ;;  %vm8727_vm5 = vcmask 392192   ;;  %5963 = vsinq.f32 %v1683_v29  ;;  %v5143_v55 = vadd.s32 4294967169, %v1911_v45 }
 0x20d   : > { %v550_v22 = vsel %vm8726_vm14, %v5998_v34, %v7668_v28  ;;  %5866 = vrot.lane.b32.xlu0 %v5865_v59, %s6115_s29  ;;  %v633_v18 = vsel %vm8727_vm5, %v616_v56, %v513_v38  ;;  %v1915_v0 = vor.u32 8388608, %v1914_v41  ;;  %v7797_v36 = vsel %vm1701_vm2, %v1785_v26, %v7663_v58  ;;  %v421_v38 = vpop.permute.xlu1 %420 }
 0x20e   : > { %v7792_v16 = vmul.f32 %v7467_v37, %v633_v18  ;;  %v1859_v33 = vadd.s32 %v7694_v46, %v7701_v51  ;;  %v1871_v42 = vclz %v5140_v25  ;;  %v7803_v28 = vsel %vm1805_vm1, %v1889_v61, %v1865_v32  ;;  %v7808_v9 = vpop.eup %5957 }
 0x20f   : > { %v1783_v4 = vxor.u32 2147483648, %v1782_v27  ;;  %v1917_v29 = vadd.s32 1, %v5143_v55  ;;  %vm8728_vm13 = vcmask 130048   ;;  %vm8729_vm8 = vcmask 195584  }
 0x210   : > { %v567_v6 = vsel %vm8728_vm13, %v550_v22, %v7718_v23  ;;  %v8611_v53 = vand.u32 2147483647, %v7792_v16  ;;  %v5141_v58 = vadd.s32 4294967294, %v1871_v42  ;;  %v583_v46 = vsel %vm8729_vm8, %v7628_v14, %v7742_v47  ;;  %vm8730_vm4 = vmmov %vm8729_vm8 }
 0x211   : > { %v584_v51 = vsel %vm8730_vm4, %v567_v6, %v373_v5  ;;  %v2014_v32 = vand.u32 2139095040, %v7792_v16  ;;  %vm1918_vm7 = vcmp.gt.s32.totalorder %v1917_v29, 0  ;;  %v7815_v20 = vshll.u32 %v1915_v0, 8 }
 0x212   : > { %vm8731_vm10 = vcmask 261120   ;;  %vm5142_vm9 = vcmp.lt.s32.totalorder %v5141_v58, 0  ;;  %v1919_v52 = vsel %vm1918_vm7, %v1917_v29, 0  ;;  %v7826_v14 = vsel %vm1701_vm2, %v1783_v4, %v1782_v27  ;;  %vm8739_vm7 = vmmov %vm8725_vm6 }
 0x213   : > { %v7818_v50 = vsel %vm8731_vm10, %v584_v51, %v421_v38  ;;  %vm8732_vm15 = vmmov %vm8731_vm10  ;;  %v2015_v57 = vshrl.u32 %v2014_v32, 23  ;;  %v1874_v47 = vsel %vm5142_vm9, 0, %v5141_v58  ;;  %v1921_v5 = vand.u32 31, %v1919_v52  ;;  %v7833_v59 = vpop.eup %5959  ;;  %v469_v32 = vpop.permute.xlu1 %468 }
 0x214   : > { %v600_v23 = vsel %vm8732_vm15, %v583_v46, %v419_v19  ;;  %v7830_v41 = vand.u32 8388607, %v8611_v53  ;;  %v1875_v26 = vsub.s32 32, %v1874_v47  ;;  %v1876_v62 = vshll.u32 %v7770_v31, %v1874_v47 }
 0x215   : > { %v7822_v63 = vsel %vm8725_vm6, %v600_v23, %v467_v30  ;;  %v1879_v19 = vsub.s32 4294967266, %v1874_v47  ;;  %v1920_v61 = vshrl.u32 %v1919_v52, 5  ;;  %v1922_v45 = vsub.s32 32, %v1921_v5  ;;  %v7837_v34 = vpop.eup %5961 }
 0x216   : > { %v1924_v56 = vshll.u32 %v8644_v2, %v1921_v5  ;;  %v1927_v25 = vshll.u32 %v8641_v8, %v1921_v5  ;;  %v5147_v27 = vadd.s32 4294967169, %v2015_v57  ;;  %v1877_v22 = vshrl.u32 %v1859_v33, %v1875_v26  ;;  %v7841_v42 = vpop.eup %5963 }
 0x217   : > { %v1880_v18 = vadd.s32 127, %v1879_v19  ;;  %v1930_v55 = vshll.u32 %v8642_v24, %v1921_v5  ;;  %v1933_v0 = vshll.u32 %v8643_v21, %v1921_v5  ;;  %v1925_v31 = vshrl.u32 %v8641_v8, %v1922_v45 }
 0x218   : > { %v1928_v38 = vshrl.u32 %v8642_v24, %v1922_v45  ;;  %v1931_v4 = vshrl.u32 %v8643_v21, %v1922_v45  ;;  %v1936_v29 = vshll.u32 %v8659_v60, %v1921_v5  ;;  %v8733_v6 = vand.u32 2147483647, %v7470_v13 }
 0x219   : > { %v1878_v33 = vor.u32 %v1877_v22, %v1876_v62  ;;  %v1881_v58 = vshll.u32 %v1880_v18, 23  ;;  %v1934_v46 = vshrl.u32 %v8659_v60, %v1922_v45  ;;  %v1937_v51 = vshrl.u32 %v8660_v11, %v1922_v45 }
 0x21a   : > { %vm7849_vm2 = vcmp.le.f32.partialorder %v8733_v6, 0.7853982  ;;  %v1923_v23 = vshrl.u32 %v8644_v2, %v1922_v45  ;;  %v1926_v52 = vor.u32 %v1925_v31, %v1924_v56  ;;  %v1929_v57 = vor.u32 %v1928_v38, %v1927_v25 }
 0x21b   : > { %v1932_v47 = vor.u32 %v1931_v4, %v1930_v55  ;;  %v8736_v5 = vand.u32 2147483647, %v7529_v43  ;;  %v1882_v19 = vor.u32 4788187, %v1881_v58  ;;  %v1935_v6 = vor.u32 %v1934_v46, %v1933_v0  ;;  %v517_v0 = vpop.permute.xlu1 %516 }
 0x21c   : > { %v1938_v62 = vor.u32 %v1937_v51, %v1936_v29  ;;  %vm1939_vm5 = vcmp.lt.s32.totalorder %v1920_v61, 1  ;;  %v1885_v22 = vcvt.s32.f32 %v1878_v33  ;;  %vm1940_vm13 = vcmp.lt.s32.totalorder %v1920_v61, 2 }
 0x21d   : > { %vm7858_vm14 = vcmp.le.f32.partialorder %v8736_v5, 0.7853982  ;;  %vm1941_vm8 = vcmp.lt.s32.totalorder %v1920_v61, 3  ;;  %vm1942_vm4 = vcmp.lt.s32.totalorder %v1920_v61, 4  ;;  %v1883_v18 = vand.u32 2147483647, %v1882_v19 }
 0x21e   : > { %v1944_v53 = vsel %vm1942_vm4, %v1932_v47, 2102212464  ;;  %v1947_v45 = vsel %vm1939_vm5, %v1926_v52, %v1929_v57  ;;  %v1948_v56 = vsel %vm1942_vm4, %v1935_v6, 920167782  ;;  %v1943_v25 = vsel %vm1939_vm5, %v1923_v23, %v1926_v52  ;;  %v515_v23 = vpop.permute.xlu0 %514 }
 0x21f   : > { %v1949_v55 = vsel %vm1941_vm8, %v1932_v47, %v1948_v56  ;;  %v1951_v31 = vsel %vm1939_vm5, %v1929_v57, %v1932_v47  ;;  %v1952_v38 = vsel %vm1942_vm4, %v1938_v62, 1326507024  ;;  %v1886_v4 = vmul.f32 %v1885_v22, %v1883_v18 }
 0x220   : > { %v1945_v5 = vsel %vm1941_vm8, %v1929_v57, %v1944_v53  ;;  %v1950_v48 = vsel %vm1940_vm13, %v1947_v45, %v1949_v55  ;;  %v1953_v58 = vsel %vm1941_vm8, %v1935_v6, %v1952_v38  ;;  %v618_v51 = vsel %vm8739_vm7, %v7818_v50, %v469_v32 }
 0x221   : > { %v1954_v29 = vsel %vm1940_vm13, %v1951_v31, %v1953_v58  ;;  %v7865_v33 = vmul.u32.u64.low %v7815_v20, %v1950_v48  ;;  %v7866_v46 = vmul.u32.u64.high %v7815_v20, %v1950_v48, %v7865_v33  ;;  %v1887_v52 = vxor.u32 2147483648, %v1886_v4 }
 0x222   : > { %v7872_v47 = vmul.u32.u64.low %v7815_v20, %v1954_v29  ;;  %v7873_v19 = vmul.u32.u64.high %v7815_v20, %v1954_v29, %v7872_v47  ;;  %v2021_v53 = vadd.s32 1, %v5147_v27  ;;  %v1787_v57 = vsel %vm7849_vm2, %v7470_v13, %v7826_v14 }
 0x223   : > { %v1946_v6 = vsel %vm1940_vm13, %v1943_v25, %v1945_v5  ;;  %v2019_v48 = vor.u32 8388608, %v7830_v41  ;;  %vm8740_vm10 = vcmask 392192   ;;  %v1888_v50 = vsel %vm1805_vm1, %v1887_v52, %v1886_v4 }
 0x224   : > { %v635_v62 = vsel %vm8740_vm10, %v618_v51, %v517_v0  ;;  %vm2022_vm15 = vcmp.gt.s32.totalorder %v2021_v53, 0  ;;  %vm8741_vm9 = vmmov %vm8740_vm10  ;;  %v7889_v27 = vsel %vm7295_vm12, 0, %v7333_v54  ;;  %v7894_v14 = vsel %vm7858_vm14, %v7529_v43, %v1888_v50 }
 0x225   : > { %v634_v32 = vsel %vm8741_vm9, %v7822_v63, %v515_v23  ;;  %v1965_v41 = vadd.s32 1, %v7866_v46  ;;  %v2023_v61 = vsel %vm2022_vm15, %v2021_v53, 0  ;;  %v7898_v22 = vmul.f32 %v7467_v37, %v635_v62 }
 0x226   : > { %5965 = vcosq.f32 %v1787_v57  ;;  %v1962_v18 = vmul.u32 %v7815_v20, %v1946_v6  ;;  %vm1964_vm1 = vc.u32 %v7873_v19, %v7865_v33  ;;  %v2024_v15 = vshrl.u32 %v2023_v61, 5 }
 0x227   : > { %5967 = vsinq.f32 %v1787_v57  ;;  %v1966_v54 = vsel %vm1964_vm1, %v1965_v41, %v7866_v46  ;;  %v2025_v63 = vand.u32 31, %v2023_v61  ;;  %v7904_v45 = vshll.u32 %v2019_v48, 8 }
 0x228   : > { %5969 = vcosq.f32 %v7894_v14  ;;  %v1967_v56 = vadd.s32 %v1966_v54, %v1962_v18  ;;  %v7908_v25 = vmul.f32 %v7467_v37, %v634_v32  ;;  %vm2043_vm12 = vcmp.lt.s32.totalorder %v2024_v15, 1 }
 0x229   : > { %v2026_v31 = vsub.s32 32, %v2025_v63  ;;  %vm2044_vm6 = vcmp.lt.s32.totalorder %v2024_v15, 2  ;;  %v8614_v20 = vand.u32 2147483647, %v7898_v22  ;;  %v2028_v4 = vshll.u32 %v8644_v2, %v2025_v63 }
 0x22a   : > { %v1968_v38 = vadd.s32 536870912, %v1967_v56  ;;  %v2031_v5 = vshll.u32 %v8641_v8, %v2025_v63  ;;  %v2034_v58 = vshll.u32 %v8642_v24, %v2025_v63  ;;  %v2037_v46 = vshll.u32 %v8643_v21, %v2025_v63 }
 0x22b   : > { %v2029_v0 = vshrl.u32 %v8641_v8, %v2026_v31  ;;  %v2032_v29 = vshrl.u32 %v8642_v24, %v2026_v31  ;;  %v2035_v37 = vshrl.u32 %v8643_v21, %v2026_v31  ;;  %v2038_v23 = vshrl.u32 %v8659_v60, %v2026_v31 }
 0x22c   : > { %v1969_v51 = vshrl.u32 %v1968_v38, 30  ;;  %v2040_v52 = vshll.u32 %v8659_v60, %v2025_v63  ;;  %v2041_v47 = vshrl.u32 %v8660_v11, %v2026_v31  ;;  %vm1909_vm5 = vcmp.lt.s32.totalorder %v7750_v10, 0 }
 0x22d   : > { %v2027_v53 = vshrl.u32 %v8644_v2, %v2026_v31  ;;  %v2030_v57 = vor.u32 %v2029_v0, %v2028_v4  ;;  %v2033_v6 = vor.u32 %v2032_v29, %v2031_v5  ;;  %v2036_v48 = vor.u32 %v2035_v37, %v2034_v58 }
 0x22e   : > { %v1970_v62 = vshll.u32 %v1969_v51, 30  ;;  %v2039_v50 = vor.u32 %v2038_v23, %v2037_v46  ;;  %v2042_v32 = vor.u32 %v2041_v47, %v2040_v52  ;;  %vm2046_vm13 = vcmp.lt.s32.totalorder %v2024_v15, 4 }
 0x22f   : > { %vm2045_vm8 = vcmp.lt.s32.totalorder %v2024_v15, 3  ;;  %v2047_v41 = vsel %vm2043_vm12, %v2027_v53, %v2030_v57  ;;  %v2048_v61 = vsel %vm2046_vm13, %v2036_v48, 2102212464  ;;  %v2051_v18 = vsel %vm2043_vm12, %v2030_v57, %v2033_v6 }
 0x230   : > { %v7926_v54 = vpop.eup %5965  ;;  %v7928_v63 = vsub.s32 %v1967_v56, %v1970_v62  ;;  %v2049_v38 = vsel %vm2045_vm8, %v2033_v6, %v2048_v61  ;;  %v2052_v31 = vsel %vm2046_vm13, %v2039_v50, 920167782  ;;  %v2055_v4 = vsel %vm2043_vm12, %v2033_v6, %v2036_v48 }
 0x231   : > { %v7932_v5 = vpop.eup %5967  ;;  %v1993_v58 = vsub.s32 4, %v1969_v51  ;;  %v2053_v0 = vsel %vm2045_vm8, %v2036_v48, %v2052_v31  ;;  %v2056_v29 = vsel %vm2046_vm13, %v2042_v32, 1326507024  ;;  %v2222_v37 = vand.u32 2139095040, %v7898_v22 }
 0x232   : > { %v7936_v46 = vpop.eup %5969  ;;  %v1973_v23 = vsub.s32 0, %v7928_v63  ;;  %v2050_v56 = vsel %vm2044_vm6, %v2047_v41, %v2049_v38  ;;  %v2054_v52 = vsel %vm2044_vm6, %v2051_v18, %v2053_v0  ;;  %v2057_v47 = vsel %vm2045_vm8, %v2039_v50, %v2056_v29 }
 0x233   : > { %8742 = vst [vmem:[#allocation12_spill] sm:$0xff] %v7936_v46  ;;  %v2058_v53 = vsel %vm2044_vm6, %v2055_v4, %v2057_v47  ;;  %v7944_v57 = vmul.u32.u64.low %v7904_v45, %v2054_v52  ;;  %v7945_v6 = vmul.u32.u64.high %v7904_v45, %v2054_v52, %v7944_v57  ;;  %v2223_v48 = vshrl.u32 %v2222_v37, 23 }
 0x234   : > { %v5144_v62 = vmin.u32 %v1973_v23, %v7928_v63  ;;  %v7949_v32 = vmul.u32.u64.low %v7904_v45, %v2058_v53  ;;  %v7950_v61 = vmul.u32.u64.high %v7904_v45, %v2058_v53, %v7949_v32  ;;  %v2226_v41 = vand.u32 8388607, %v8614_v20 }
 0x235   : > { %v1963_v18 = vadd.s32 %v7865_v33, %v7873_v19  ;;  %v5155_v50 = vadd.s32 4294967169, %v2223_v48  ;;  %v8613_v15 = vand.u32 2147483647, %v7908_v25  ;;  %v2118_v38 = vand.u32 2139095040, %v7908_v25 }
 0x236   : > { %5971 = vsinq.f32 %v7894_v14  ;;  %v1975_v31 = vclz %v5144_v62  ;;  %v7961_v4 = vsel %vm1909_vm5, %v1993_v58, %v1969_v51  ;;  %v2227_v0 = vor.u32 8388608, %v2226_v41 }
 0x237   : > { %8743 = vst [vmem:[#allocation10_spill] sm:$0xff] %v7961_v4  ;;  %v2066_v29 = vmul.u32 %v7904_v45, %v2050_v56  ;;  %v2069_v37 = vadd.s32 1, %v7945_v6  ;;  %v2229_v23 = vadd.s32 1, %v5155_v50  ;;  %v2119_v52 = vshrl.u32 %v2118_v38, 23 }
 0x238   : > { %v5145_v33 = vadd.s32 4294967294, %v1975_v31  ;;  %vm2068_vm4 = vc.u32 %v7950_v61, %v7944_v57  ;;  %v7970_v14 = vsel %vm7453_vm3, 0, %v7338_v35  ;;  %v7973_v51 = vadd.s32 %v7944_v57, %v7950_v61 }
 0x239   : > { %v2070_v58 = vsel %vm2068_vm4, %v2069_v37, %v7945_v6  ;;  %vm2230_vm7 = vcmp.gt.s32.totalorder %v2229_v23, 0  ;;  %v7978_v45 = vand.u32 8388607, %v8613_v15  ;;  %v7980_v53 = vshll.u32 %v2227_v0, 8 }
 0x23a   : > { %vm5146_vm10 = vcmp.lt.s32.totalorder %v5145_v33, 0  ;;  %v2071_v56 = vadd.s32 %v2070_v58, %v2066_v29  ;;  %v2231_v47 = vsel %vm2230_vm7, %v2229_v23, 0  ;;  %v7984_v1 = vadd.s32 4294967169, %v2119_v52 }
 0x23b   : > { %v1978_v48 = vsel %vm5146_vm10, 0, %v5145_v33  ;;  %v7982_v62 = vshrl.u32 %v2231_v47, 5  ;;  %v2233_v35 = vand.u32 31, %v2231_v47  ;;  %vm2013_vm3 = vcmp.lt.s32.totalorder %v7792_v16, 0 }
 0x23c   : > { %v1979_v57 = vsub.s32 32, %v1978_v48  ;;  %v1983_v32 = vsub.s32 4294967266, %v1978_v48  ;;  %v2072_v61 = vadd.s32 536870912, %v2071_v56  ;;  %v1980_v41 = vshll.u32 %v7928_v63, %v1978_v48 }
 0x23d   : > { %v2234_v50 = vsub.s32 32, %v2233_v35  ;;  %v2236_v38 = vshll.u32 %v8644_v2, %v2233_v35  ;;  %v2239_v31 = vshll.u32 %v8641_v8, %v2233_v35  ;;  %v2242_v23 = vshll.u32 %v8642_v24, %v2233_v35 }
 0x23e   : > { %v1981_v0 = vshrl.u32 %v1963_v18, %v1979_v57  ;;  %v1984_v29 = vadd.s32 127, %v1983_v32  ;;  %v2073_v37 = vshrl.u32 %v2072_v61, 30  ;;  %v2245_v47 = vshll.u32 %v8643_v21, %v2233_v35 }
 0x23f   : > { %v2237_v52 = vshrl.u32 %v8641_v8, %v2234_v50  ;;  %v2240_v33 = vshrl.u32 %v8642_v24, %v2234_v50  ;;  %v2243_v58 = vshrl.u32 %v8643_v21, %v2234_v50  ;;  %v2235_v18 = vshrl.u32 %v8644_v2, %v2234_v50 }
 0x240   : > { %v7995_v15 = vpop.eup %5971  ;;  %v1982_v63 = vor.u32 %v1981_v0, %v1980_v41  ;;  %v1985_v48 = vshll.u32 %v1984_v29, 23  ;;  %v2074_v20 = vshll.u32 %v2073_v37, 30  ;;  %v2097_v57 = vsub.s32 4, %v2073_v37 }
 0x241   : > { %8744 = vst [vmem:[#allocation11_spill] sm:$0xff] %v7995_v15  ;;  %v2238_v32 = vor.u32 %v2237_v52, %v2236_v38  ;;  %v2241_v61 = vor.u32 %v2240_v33, %v2239_v31  ;;  %v2246_v19 = vshrl.u32 %v8659_v60, %v2234_v50  ;;  %v8745_v55 = vand.u32 2147483647, %v7750_v10 }
 0x242   : > { %v1986_v4 = vor.u32 4788187, %v1985_v48  ;;  %v1989_v46 = vcvt.s32.f32 %v1982_v63  ;;  %v8006_v41 = vsub.s32 %v2071_v56, %v2074_v20  ;;  %v2244_v0 = vor.u32 %v2243_v58, %v2242_v23 }
 0x243   : > { %vm8002_vm15 = vcmp.le.f32.partialorder %v8745_v55, 0.7853982  ;;  %v2247_v29 = vor.u32 %v2246_v19, %v2245_v47  ;;  %v2248_v15 = vshll.u32 %v8659_v60, %v2233_v35  ;;  %v2249_v43 = vshrl.u32 %v8660_v11, %v2234_v50 }
 0x244   : > { %vm2251_vm9 = vcmp.lt.s32.totalorder %v7982_v62, 1  ;;  %v1987_v38 = vand.u32 2147483647, %v1986_v4  ;;  %v2077_v31 = vsub.s32 0, %v8006_v41  ;;  %vm2252_vm1 = vcmp.lt.s32.totalorder %v7982_v62, 2 }
 0x245   : > { %vm2253_vm12 = vcmp.lt.s32.totalorder %v7982_v62, 3  ;;  %v2250_v55 = vor.u32 %v2249_v43, %v2248_v15  ;;  %vm2254_vm6 = vcmp.lt.s32.totalorder %v7982_v62, 4  ;;  %v2255_v20 = vsel %vm2251_vm9, %v2235_v18, %v2238_v32 }
 0x246   : > { %v2259_v56 = vsel %vm2251_vm9, %v2238_v32, %v2241_v61  ;;  %v1990_v23 = vmul.f32 %v1989_v46, %v1987_v38  ;;  %v5148_v19 = vmin.u32 %v2077_v31, %v8006_v41  ;;  %v2256_v35 = vsel %vm2254_vm6, %v2244_v0, 2102212464 }
 0x247   : > { %v2260_v52 = vsel %vm2254_vm6, %v2247_v29, 920167782  ;;  %v2257_v50 = vsel %vm2253_vm12, %v2241_v61, %v2256_v35  ;;  %v2263_v33 = vsel %vm2251_vm9, %v2241_v61, %v2244_v0  ;;  %v2264_v58 = vsel %vm2254_vm6, %v2250_v55, 1326507024 }
 0x248   : > { %v2261_v4 = vsel %vm2253_vm12, %v2244_v0, %v2260_v52  ;;  %v1991_v47 = vxor.u32 2147483648, %v1990_v23  ;;  %v2079_v63 = vclz %v5148_v19  ;;  %v2258_v43 = vsel %vm2252_vm1, %v2255_v20, %v2257_v50  ;;  %v8767_v30 = vld [vmem:[#allocation11_spill] sm:$0xff] }
 0x249   : > { %v2262_v46 = vsel %vm2252_vm1, %v2259_v56, %v2261_v4  ;;  %v8026_v15 = vsel %vm2013_vm3, %v2097_v57, %v2073_v37  ;;  %v2265_v48 = vsel %vm2253_vm12, %v2247_v29, %v2264_v58  ;;  %v2125_v31 = vadd.s32 1, %v7984_v1 }
 0x24a   : > { %v8031_v18 = vmul.u32.u64.low %v7980_v53, %v2262_v46  ;;  %v8032_v32 = vmul.u32.u64.high %v7980_v53, %v2262_v46, %v8031_v18  ;;  %v1992_v61 = vsel %vm1909_vm5, %v1991_v47, %v1990_v23  ;;  %v5149_v0 = vadd.s32 4294967294, %v2079_v63 }
 0x24b   : > { %v2266_v38 = vsel %vm2252_vm1, %v2263_v33, %v2265_v48  ;;  %v1995_v37 = vsel %vm8002_vm15, %v7750_v10, %v1992_v61  ;;  %v2274_v55 = vmul.u32 %v7980_v53, %v2258_v43  ;;  %vm2126_vm8 = vcmp.gt.s32.totalorder %v2125_v31, 0 }
 0x24c   : > { %v8043_v57 = vmul.u32.u64.low %v7980_v53, %v2266_v38  ;;  %v8044_v29 = vmul.u32.u64.high %v7980_v53, %v2266_v38, %v8043_v57  ;;  %5973 = vcosq.f32 %v1995_v37  ;;  %vm5150_vm13 = vcmp.lt.s32.totalorder %v5149_v0, 0 }
 0x24d   : > { %v8748_v20 = vor.u32 8388608, %v7978_v45  ;;  %v2082_v62 = vsel %vm5150_vm13, 0, %v5149_v0  ;;  %v2277_v1 = vadd.s32 1, %v8032_v32  ;;  %v2127_v23 = vsel %vm2126_vm8, %v2125_v31, 0 }
 0x24e   : > { %v1484_v19 = vxor.u32 2147483648, %v7578_v40  ;;  %5975 = vsinq.f32 %v1995_v37  ;;  %v2083_v35 = vsub.s32 32, %v2082_v62  ;;  %v2084_v52 = vshll.u32 %v8006_v41, %v2082_v62 }
 0x24f   : > { %v8049_v56 = vshll.u32 %v8748_v20, 8  ;;  %v2087_v50 = vsub.s32 4294967266, %v2082_v62  ;;  %v8055_v53 = vadd.s32 %v8031_v18, %v8044_v29  ;;  %vm2276_vm5 = vc.u32 %v8044_v29, %v8031_v18 }
 0x250   : > { %v8058_v4 = vshrl.u32 %v2127_v23, 5  ;;  %v2129_v45 = vand.u32 31, %v2127_v23  ;;  %v2085_v33 = vshrl.u32 %v7973_v51, %v2083_v35  ;;  %v2278_v47 = vsel %vm2276_vm5, %v2277_v1, %v8032_v32 }
 0x251   : > { %v2088_v58 = vadd.s32 127, %v2087_v50  ;;  %v1487_v63 = vxor.u32 2147483648, %v7573_v3  ;;  %v2279_v43 = vadd.s32 %v2278_v47, %v2274_v55  ;;  %vm2221_vm4 = vcmp.lt.s32.totalorder %v7898_v22, 0 }
 0x252   : > { %v2130_v46 = vsub.s32 32, %v2129_v45  ;;  %v2132_v41 = vshll.u32 %v8644_v2, %v2129_v45  ;;  %v2135_v48 = vshll.u32 %v8641_v8, %v2129_v45  ;;  %v2086_v61 = vor.u32 %v2085_v33, %v2084_v52 }
 0x253   : > { %v2089_v0 = vshll.u32 %v2088_v58, 23  ;;  %v2138_v18 = vshll.u32 %v8642_v24, %v2129_v45  ;;  %v2141_v38 = vshll.u32 %v8643_v21, %v2129_v45  ;;  %v2280_v51 = vadd.s32 536870912, %v2279_v43 }
 0x254   : > { %v2131_v31 = vshrl.u32 %v8644_v2, %v2130_v46  ;;  %v2133_v32 = vshrl.u32 %v8641_v8, %v2130_v46  ;;  %v2136_v37 = vshrl.u32 %v8642_v24, %v2130_v46  ;;  %v8749_v57 = vand.u32 2147483647, %v7792_v16 }
 0x255   : > { %v2090_v55 = vor.u32 4788187, %v2089_v0  ;;  %v2093_v20 = vcvt.s32.f32 %v2086_v61  ;;  %v2139_v62 = vshrl.u32 %v8643_v21, %v2130_v46  ;;  %v2142_v1 = vshrl.u32 %v8659_v60, %v2130_v46 }
 0x256   : > { %vm8073_vm7 = vcmp.le.f32.partialorder %v8749_v57, 0.7853982  ;;  %v2281_v23 = vshrl.u32 %v2280_v51, 30  ;;  %v2134_v35 = vor.u32 %v2133_v32, %v2132_v41  ;;  %v2137_v52 = vor.u32 %v2136_v37, %v2135_v48  ;;  %v8080_v8 = vpop.eup %5973 }
 0x257   : > { %v2144_v2 = vshll.u32 %v8659_v60, %v2129_v45  ;;  %v2091_v24 = vand.u32 2147483647, %v2090_v55  ;;  %v2140_v50 = vor.u32 %v2139_v62, %v2138_v18  ;;  %v2143_v33 = vor.u32 %v2142_v1, %v2141_v38 }
 0x258   : > { %v2145_v58 = vshrl.u32 %v8660_v11, %v2130_v46  ;;  %v2282_v47 = vshll.u32 %v2281_v23, 30  ;;  %v2305_v57 = vsub.s32 4, %v2281_v23  ;;  %vm2147_vm10 = vcmp.lt.s32.totalorder %v8058_v4, 1  ;;  %v8085_v21 = vpop.eup %5975 }
 0x259   : > { %vm2148_vm9 = vcmp.lt.s32.totalorder %v8058_v4, 2  ;;  %v2094_v61 = vmul.f32 %v2093_v20, %v2091_v24  ;;  %vm2150_vm1 = vcmp.lt.s32.totalorder %v8058_v4, 4  ;;  %v2151_v60 = vsel %vm2147_vm10, %v2131_v31, %v2134_v35 }
 0x25a   : > { %v2146_v41 = vor.u32 %v2145_v58, %v2144_v2  ;;  %v8088_v45 = vsub.s32 %v2279_v43, %v2282_v47  ;;  %vm2149_vm12 = vcmp.lt.s32.totalorder %v8058_v4, 3  ;;  %v2152_v48 = vsel %vm2150_vm1, %v2140_v50, 2102212464 }
 0x25b   : > { %v2155_v0 = vsel %vm2147_vm10, %v2134_v35, %v2137_v52  ;;  %v2095_v11 = vxor.u32 2147483648, %v2094_v61  ;;  %v2153_v46 = vsel %vm2149_vm12, %v2137_v52, %v2152_v48  ;;  %v2156_v18 = vsel %vm2150_vm1, %v2143_v33, 920167782 }
 0x25c   : > { %v2159_v38 = vsel %vm2147_vm10, %v2137_v52, %v2140_v50  ;;  %vm1375_vm6 = vweird.f32 %v6885_v49  ;;  %v2285_v51 = vsub.s32 0, %v8088_v45  ;;  %v2154_v32 = vsel %vm2148_vm9, %v2151_v60, %v2153_v46 }
 0x25d   : > { %v2157_v37 = vsel %vm2149_vm12, %v2140_v50, %v2156_v18  ;;  %v2160_v55 = vsel %vm2150_vm1, %v2146_v41, 1326507024  ;;  %v2096_v43 = vsel %vm2013_vm3, %v2095_v11, %v2094_v61  ;;  %v8099_v31 = vsel %vm2221_vm4, %v2305_v57, %v2281_v23 }
 0x25e   : > { %v2158_v20 = vsel %vm2148_vm9, %v2155_v0, %v2157_v37  ;;  %v2161_v62 = vsel %vm2149_vm12, %v2143_v33, %v2160_v55  ;;  %v2099_v1 = vsel %vm8073_vm7, %v7792_v16, %v2096_v43  ;;  %v5156_v35 = vmin.u32 %v2285_v51, %v8088_v45  ;;  %v4166_v37 = vld [vmem:[#allocation2] sm:$0xff]  ;;  %v4167_v55 = vld [vmem:[#allocation2 + $0x8] sm:$0xff] }
 0x25f   : > { %v2162_v52 = vsel %vm2148_vm9, %v2159_v38, %v2161_v62  ;;  %v3034_v2 = vand.u32 3, %v7889_v27  ;;  %v2170_v23 = vmul.u32 %v8049_v56, %v2154_v32  ;;  %vm1479_vm3 = vweird.f32 %v6955_v7 }
 0x260   : > { %v8111_v24 = vmul.u32.u64.low %v8049_v56, %v2162_v52  ;;  %v8112_v50 = vmul.u32.u64.high %v8049_v56, %v2162_v52, %v8111_v24  ;;  %v3137_v33 = vand.u32 3, %v7970_v14  ;;  %5977 = vcosq.f32 %v2099_v1 }
 0x261   : > { %v2287_v58 = vclz %v5156_v35  ;;  %v8118_v47 = vmul.u32.u64.low %v8049_v56, %v2158_v20  ;;  %v8119_v57 = vmul.u32.u64.high %v8049_v56, %v2158_v20, %v8118_v47  ;;  %5979 = vsinq.f32 %v2099_v1 }
 0x262   : > { %vm3035_vm13 = vcmp.lt.s32.totalorder %v3034_v2, 2  ;;  %vm3036_vm8 = vcmp.eq.s32.totalorder %v3034_v2, 0  ;;  %vm3039_vm5 = vcmp.eq.s32.totalorder %v3034_v2, 2  ;;  %v8752_v61 = vxor.u32 2147483648, %v7567_v44 }
 0x263   : > { %v5157_v4 = vadd.s32 4294967294, %v2287_v58  ;;  %v8753_v60 = vxor.u32 2147483648, %v7556_v17  ;;  %vm3139_vm10 = vcmp.eq.s32.totalorder %v3137_v33, 0  ;;  %vm2172_vm9 = vc.u32 %v8112_v50, %v8118_v47 }
 0x264   : > { %v3038_v41 = vsel %vm3036_vm8, %v7556_v17, %v8752_v61  ;;  %vm3138_vm1 = vcmp.lt.s32.totalorder %v3137_v33, 2  ;;  %v3141_v56 = vsel %vm3139_vm10, %v7573_v3, %v1484_v19  ;;  %v2173_v11 = vadd.s32 1, %v8119_v57 }
 0x265   : > { %v3041_v48 = vsel %vm3039_vm5, %v8753_v60, %v7567_v44  ;;  %vm5158_vm12 = vcmp.lt.s32.totalorder %v5157_v4, 0  ;;  %vm3142_vm8 = vcmp.eq.s32.totalorder %v3137_v33, 2  ;;  %v1376_v51 = vadd.s32 3, %v7889_v27 }
 0x266   : > { %v3042_v0 = vsel %vm3035_vm13, %v3038_v41, %v3041_v48  ;;  %v2290_v18 = vsel %vm5158_vm12, 0, %v5157_v4  ;;  %v3144_v38 = vsel %vm3142_vm8, %v1487_v63, %v7578_v40  ;;  %v1480_v32 = vadd.s32 3, %v7970_v14 }
 0x267   : > { %v3043_v46 = vsel %vm1375_vm6, nan, %v3042_v0  ;;  %v2291_v43 = vsub.s32 32, %v2290_v18  ;;  %v2292_v20 = vshll.u32 %v8088_v45, %v2290_v18  ;;  %v2295_v62 = vsub.s32 4294967266, %v2290_v18 }
 0x268   : > { %vm2117_vm13 = vcmp.lt.s32.totalorder %v7908_v25, 0  ;;  %v2174_v1 = vsel %vm2172_vm9, %v2173_v11, %v8119_v57  ;;  %v3145_v52 = vsel %vm3138_vm1, %v3141_v56, %v3144_v38  ;;  %v1377_v2 = vand.u32 3, %v1376_v51  ;;  %v4168_v56 = vld [vmem:[#allocation2 + $0x10] sm:$0xff]  ;;  %v4169_v11 = vld [vmem:[#allocation2 + $0x18] sm:$0xff] }
 0x269   : > { %v2175_v35 = vadd.s32 %v2174_v1, %v2170_v23  ;;  %v1481_v24 = vand.u32 3, %v1480_v32  ;;  %v2293_v27 = vshrl.u32 %v8055_v53, %v2291_v43  ;;  %v2296_v14 = vadd.s32 127, %v2295_v62 }
 0x26a   : > { %v3146_v58 = vsel %vm1479_vm3, nan, %v3145_v52  ;;  %v5587_v4 = vpack.c.bf16 %v4167_v55, %v4166_v37  ;;  %v8149_v45 = vadd.s32 %v8118_v47, %v8112_v50  ;;  %vm1379_vm5 = vcmp.eq.s32.totalorder %v1377_v2, 0  ;;  %v8151_v60 = vpop.eup %5977 }
 0x26b   : > { %v2176_v61 = vadd.s32 536870912, %v2175_v35  ;;  %v5880_v41 = vpack.i.bf16 %v3146_v58, %v3043_v46  ;;  %v2294_v23 = vor.u32 %v2293_v27, %v2292_v20  ;;  %v2297_v33 = vshll.u32 %v2296_v14, 23  ;;  %v8156_v53 = vpop.eup %5979  ;;  %v8761_v58 = vld [vmem:[#allocation14_spill] sm:$0xff] }
 0x26c   : > { %v8754_v57 = vxor.u32 2147483648, %v7567_v44  ;;  %vm1382_vm10 = vcmp.eq.s32.totalorder %v1377_v2, 2  ;;  %5588 = vmatprep.subr.bf16.mxu0 %v5587_v4  ;;  %vm1378_vm9 = vcmp.lt.s32.totalorder %v1377_v2, 2  ;;  %v8755_v50 = vxor.u32 2147483648, %v7556_v17  ;;  %v8759_v2 = vld [vmem:[#allocation8_spill] sm:$0xff] }
 0x26d   : > { %v2177_v0 = vshrl.u32 %v2176_v61, 30  ;;  %5881 = vrot.lane.b32.xlu1 %v5880_v41, %s6126_s20  ;;  %vm1483_vm1 = vcmp.eq.s32.totalorder %v1481_v24, 0  ;;  %5590 = vmatpush3.bf16.msra.mxu0 %v5587_v4  ;;  %v8756_v46 = vand.u32 2147483647, %v7898_v22  ;;  %v2298_v38 = vor.u32 4788187, %v2297_v33 }
 0x26e   : > { %v1381_v48 = vsel %vm1379_vm5, %v7556_v17, %v8754_v57  ;;  %v1384_v47 = vsel %vm1382_vm10, %v8755_v50, %v7567_v44  ;;  %vm1482_vm8 = vcmp.lt.s32.totalorder %v1481_v24, 2  ;;  %v1485_v32 = vsel %vm1483_vm1, %v7573_v3, %v1484_v19  ;;  %v8762_v4 = vld [vmem:[#allocation15_spill] sm:$0xff] }
 0x26f   : > { %vm8164_vm12 = vcmp.le.f32.partialorder %v8756_v46, 0.7853982  ;;  %v1385_v51 = vsel %vm1378_vm9, %v1381_v48, %v1384_v47  ;;  %v2301_v37 = vcvt.s32.f32 %v2294_v23  ;;  %v2178_v17 = vshll.u32 %v2177_v0, 30 }
 0x270   : > { %v2201_v44 = vsub.s32 4, %v2177_v0  ;;  %vm1486_vm5 = vcmp.eq.s32.totalorder %v1481_v24, 2  ;;  %v2299_v55 = vand.u32 2147483647, %v2298_v38  ;;  %v1386_v43 = vsel %vm1375_vm6, nan, %v1385_v51  ;;  %v4170_v38 = vld [vmem:[#allocation2 + $0x20] sm:$0xff] }
 0x271   : > { %v1488_v20 = vsel %vm1486_vm5, %v1487_v63, %v7578_v40  ;;  %v5591_v62 = vpack.c.bf16 %v4169_v11, %v4168_v56  ;;  %v8176_v1 = vsub.s32 %v2175_v35, %v2178_v17  ;;  %v1580_v24 = vsel %vm7582_vm11, 0, %v8759_v2  ;;  %v4171_v51 = vld [vmem:[#allocation2 + $0x28] sm:$0xff]  ;;  %v4173_v17 = vld [vmem:[#allocation2 + $0x38] sm:$0xff] }
 0x272   : > { %v8180_v52 = vsel %vm2117_vm13, %v2201_v44, %v2177_v0  ;;  %v1489_v19 = vsel %vm1482_vm8, %v1485_v32, %v1488_v20  ;;  %v2302_v14 = vmul.f32 %v2301_v37, %v2299_v55  ;;  %vm1583_vm6 = vweird.f32 %v8761_v58  ;;  %v4172_v32 = vld [vmem:[#allocation2 + $0x30] sm:$0xff]  ;;  %v4174_v44 = vld [vmem:[#allocation2 + $0x40] sm:$0xff]  ;;  %v4175_v55 = vld [vmem:[#allocation2 + $0x48] sm:$0xff] }
 0x273   : > { %v1490_v49 = vsel %vm1479_vm3, nan, %v1489_v19  ;;  %5592 = vmatprep.subr.bf16.mxu0 %v5591_v62  ;;  %v1588_v3 = vxor.u32 2147483648, %v7833_v59  ;;  %v2181_v40 = vsub.s32 0, %v8176_v1  ;;  %v1591_v35 = vxor.u32 2147483648, %v7808_v9 }
 0x274   : > { %v5875_v63 = vpack.i.bf16 %v1490_v49, %v1386_v43  ;;  %5594 = vmatpush3.bf16.msra.mxu0 %v5591_v62  ;;  %v1684_v61 = vsel %vm7722_vm0, 0, %v8762_v4  ;;  %v2303_v41 = vxor.u32 2147483648, %v2302_v14  ;;  %vm1687_vm11 = vweird.f32 %v7248_v39 }
 0x275   : > { %v1692_v7 = vxor.u32 2147483648, %v7841_v42  ;;  %v1695_v23 = vxor.u32 2147483648, %v7837_v34  ;;  %v3240_v33 = vand.u32 3, %v1580_v24  ;;  %v5152_v57 = vmin.u32 %v2181_v40, %v8176_v1 }
 0x276   : > { %5876 = vrot.lane.b32.xlu0 %v5875_v63, %s6115_s29  ;;  %v3343_v48 = vand.u32 3, %v1684_v61  ;;  %v1584_v0 = vadd.s32 3, %v1580_v24  ;;  %v1688_v50 = vadd.s32 3, %v1684_v61  ;;  %v2304_v47 = vsel %vm2221_vm4, %v2303_v41, %v2302_v14 }
 0x277   : > { %vm3241_vm3 = vcmp.lt.s32.totalorder %v3240_v33, 2  ;;  %vm3242_vm0 = vcmp.eq.s32.totalorder %v3240_v33, 0  ;;  %vm3245_vm10 = vcmp.eq.s32.totalorder %v3240_v33, 2  ;;  %v2307_v12 = vsel %vm8164_vm12, %v7898_v22, %v2304_v47 }
 0x278   : > { %v2183_v56 = vclz %v5152_v57  ;;  %v3244_v11 = vsel %vm3242_vm0, %v7808_v9, %v1588_v3  ;;  %v3247_v46 = vsel %vm3245_vm10, %v1591_v35, %v7833_v59  ;;  %5981 = vcosq.f32 %v2307_v12  ;;  %v4176_v57 = vld [vmem:[#allocation2 + $0x50] sm:$0xff] }
 0x279   : > { %v3248_v37 = vsel %vm3241_vm3, %v3244_v11, %v3247_v46  ;;  %vm3344_vm9 = vcmp.lt.s32.totalorder %v3343_v48, 2  ;;  %vm3345_vm1 = vcmp.eq.s32.totalorder %v3343_v48, 0  ;;  %5983 = vsinq.f32 %v2307_v12  ;;  %v4179_v11 = vld [vmem:[#allocation2 + $0x68] sm:$0xff]  ;;  %v8221_v46 = vpop.permute.xlu1 %5851 }
 0x27a   : > { %v5153_v43 = vadd.s32 4294967294, %v2183_v56  ;;  %v3249_v20 = vsel %vm1583_vm6, nan, %v3248_v37  ;;  %v3347_v62 = vsel %vm3345_vm1, %v7837_v34, %v1692_v7  ;;  %vm3348_vm4 = vcmp.eq.s32.totalorder %v3343_v48, 2  ;;  %v4180_v37 = vld [vmem:[#allocation2 + $0x70] sm:$0xff] }
 0x27b   : > { %v1585_v19 = vand.u32 3, %v1584_v0  ;;  %v1689_v2 = vand.u32 3, %v1688_v50  ;;  %v5595_v27 = vpack.c.bf16 %v4171_v51, %v4170_v38  ;;  %v3350_v24 = vsel %vm3348_vm4, %v1695_v23, %v7841_v42  ;;  %v4177_v0 = vld [vmem:[#allocation2 + $0x58] sm:$0xff]  ;;  %v8228_v51 = vpop.permute.xlu0 %5846 }
 0x27c   : > { %vm5154_vm8 = vcmp.lt.s32.totalorder %v5153_v43, 0  ;;  %v5599_v14 = vpack.c.bf16 %v4173_v17, %v4172_v32  ;;  %v5603_v49 = vpack.c.bf16 %v4175_v55, %v4174_v44  ;;  %v3351_v63 = vsel %vm3344_vm9, %v3347_v62, %v3350_v24  ;;  %v4181_v17 = vld [vmem:[#allocation2 + $0x78] sm:$0xff] }
 0x27d   : > { %v2186_v40 = vsel %vm5154_vm8, 0, %v5153_v43  ;;  %vm1586_vm5 = vcmp.lt.s32.totalorder %v1585_v19, 2  ;;  %vm1587_vm3 = vcmp.eq.s32.totalorder %v1585_v19, 0  ;;  %5596 = vmatprep.subr.bf16.mxu0 %v5595_v27  ;;  %v3352_v33 = vsel %vm1687_vm11, nan, %v3351_v63 }
 0x27e   : > { %v2187_v4 = vsub.s32 32, %v2186_v40  ;;  %v2188_v61 = vshll.u32 %v8176_v1, %v2186_v40  ;;  %v2191_v41 = vsub.s32 4294967266, %v2186_v40  ;;  %5598 = vmatpush3.bf16.msra.mxu0 %v5595_v27  ;;  %v5890_v50 = vpack.i.bf16 %v3352_v33, %v3249_v20  ;;  %v4178_v1 = vld [vmem:[#allocation2 + $0x60] sm:$0xff] }
 0x27f   : > { %v1589_v47 = vsel %vm1587_vm3, %v7808_v9, %v1588_v3  ;;  %vm1590_vm0 = vcmp.eq.s32.totalorder %v1585_v19, 2  ;;  %vm1690_vm10 = vcmp.lt.s32.totalorder %v1689_v2, 2  ;;  %5600 = vmatprep.subr.bf16.mxu0 %v5599_v14  ;;  %vm1691_vm9 = vcmp.eq.s32.totalorder %v1689_v2, 0  ;;  %v8768_v33 = vld [vmem:[#allocation12_spill] sm:$0xff] }
 0x280   : > { %v2189_v48 = vshrl.u32 %v8149_v45, %v2187_v4  ;;  %v2192_v12 = vadd.s32 127, %v2191_v41  ;;  %v1592_v56 = vsel %vm1590_vm0, %v1591_v35, %v7833_v59  ;;  %5891 = vrot.lane.b32.xlu1 %v5890_v50, %s6126_s20  ;;  %v1693_v9 = vsel %vm1691_vm9, %v7837_v34, %v1692_v7  ;;  %v8766_v41 = vld [vmem:[#allocation13_spill] sm:$0xff] }
 0x281   : > { %v1593_v38 = vsel %vm1586_vm5, %v1589_v47, %v1592_v56  ;;  %vm1694_vm1 = vcmp.eq.s32.totalorder %v1689_v2, 2  ;;  %v5607_v3 = vpack.c.bf16 %v4177_v0, %v4176_v57  ;;  %v5611_v55 = vpack.c.bf16 %v4179_v11, %v4178_v1 }
 0x282   : > { %v2190_v45 = vor.u32 %v2189_v48, %v2188_v61  ;;  %v2193_v32 = vshll.u32 %v2192_v12, 23  ;;  %v1594_v59 = vsel %vm1583_vm6, nan, %v1593_v38  ;;  %v1696_v35 = vsel %vm1694_vm1, %v1695_v23, %v7841_v42  ;;  %5602 = vmatpush3.bf16.msra.mxu0 %v5599_v14  ;;  %v8235_v44 = vpop.eup %5981  ;;  %v5999_v12 = vld [vmem:[%s6241_s6] sm:$0xff] }
 0x283   : > { %v1697_v7 = vsel %vm1690_vm10, %v1693_v9, %v1696_v35  ;;  %5604 = vmatprep.subr.bf16.mxu0 %v5603_v49  ;;  %v5854_v43 = vunpack.i.h.bf16 %v8221_v46  ;;  %v5853_v20 = vunpack.i.l.bf16 %v8221_v46  ;;  %v8240_v62 = vpop.eup %5983  ;;  %v8763_v58 = vand.u32 2147483647, %v7908_v25 }
 0x284   : > { %v2194_v42 = vor.u32 4788187, %v2193_v32  ;;  %v2197_v23 = vcvt.s32.f32 %v2190_v45  ;;  %v1698_v19 = vsel %vm1687_vm11, nan, %v1697_v7  ;;  %v5849_v2 = vunpack.i.h.bf16 %v8228_v51 }
 0x285   : > { %vm8244_vm6 = vcmp.le.f32.partialorder %v8763_v58, 0.7853982  ;;  %v5885_v27 = vpack.i.bf16 %v1698_v19, %v1594_v59  ;;  %v5848_v24 = vunpack.i.l.bf16 %v8228_v51  ;;  %v5615_v14 = vpack.c.bf16 %v4181_v17, %v4180_v37 }
 0x286   : > { %v1788_v40 = vsel %vm7849_vm2, 0, %v7797_v36  ;;  %v2195_v63 = vand.u32 2147483647, %v2194_v42  ;;  %5606 = vmatpush3.bf16.msra.mxu0 %v5603_v49  ;;  %vm1791_vm4 = vweird.f32 %v7470_v13  ;;  %v1796_v4 = vxor.u32 2147483648, %v7932_v5 }
 0x287   : > { %v1799_v39 = vxor.u32 2147483648, %v7926_v54  ;;  %5886 = vrot.lane.b32.xlu0 %v5885_v27, %s6115_s29  ;;  %5608 = vmatprep.subr.bf16.mxu0 %v5607_v3  ;;  %v1892_v61 = vsel %vm7858_vm14, 0, %v7803_v28  ;;  %vm1895_vm11 = vweird.f32 %v8766_v41  ;;  %v1900_v36 = vxor.u32 2147483648, %v8767_v30 }
 0x288   : > { %v1903_v57 = vxor.u32 2147483648, %v8768_v33  ;;  %v2198_v49 = vmul.f32 %v2197_v23, %v2195_v63  ;;  %v3446_v0 = vand.u32 3, %v1788_v40  ;;  %v3549_v50 = vand.u32 3, %v1892_v61 }
 0x289   : > { %v1792_v47 = vadd.s32 3, %v1788_v40  ;;  %v1896_v48 = vadd.s32 3, %v1892_v61  ;;  %vm8769_vm2 = vcmask 64512   ;;  %vm4115_vm8 = vcmask 523264  }
 0x28a   : > { %v4099_v56 = vsel %vm8769_vm2, %v5999_v12, %v5848_v24  ;;  %vm4132_vm5 = vcmask 982016   ;;  %v2199_v1 = vxor.u32 2147483648, %v2198_v49  ;;  %5610 = vmatpush3.bf16.msra.mxu0 %v5607_v3  ;;  %vm3447_vm3 = vcmp.lt.s32.totalorder %v3446_v0, 2 }
 0x28b   : > { %vm3448_vm14 = vcmp.eq.s32.totalorder %v3446_v0, 0  ;;  %vm3451_vm0 = vcmp.eq.s32.totalorder %v3446_v0, 2  ;;  %5612 = vmatprep.subr.bf16.mxu0 %v5611_v55  ;;  %vm3550_vm10 = vcmp.lt.s32.totalorder %v3549_v50, 2  ;;  %vm3551_vm9 = vcmp.eq.s32.totalorder %v3549_v50, 0 }
 0x28c   : > { %v3450_v28 = vsel %vm3448_vm14, %v7926_v54, %v1796_v4  ;;  %v3453_v26 = vsel %vm3451_vm0, %v1799_v39, %v7932_v5  ;;  %v2200_v11 = vsel %vm2117_vm13, %v2199_v1, %v2198_v49  ;;  %v3553_v9 = vsel %vm3551_vm9, %v8768_v33, %v1900_v36 }
 0x28d   : > { %v3454_v38 = vsel %vm3447_vm3, %v3450_v28, %v3453_v26  ;;  %vm3554_vm1 = vcmp.eq.s32.totalorder %v3549_v50, 2  ;;  %v2203_v3 = vsel %vm8244_vm6, %v7908_v25, %v2200_v11  ;;  %v1793_v59 = vand.u32 3, %v1792_v47  ;;  %v6001_v26 = vld [vmem:[%s6241_s6 + $0x10] sm:$0xff] }
 0x28e   : > { %v3455_v45 = vsel %vm1791_vm4, nan, %v3454_v38  ;;  %v3556_v32 = vsel %vm3554_vm1, %v1903_v57, %v8767_v30  ;;  %5985 = vcosq.f32 %v2203_v3  ;;  %5614 = vmatpush3.bf16.msra.mxu0 %v5611_v55  ;;  %v1897_v37 = vand.u32 3, %v1896_v48  ;;  %v6002_v38 = vld [vmem:[%s6241_s6 + $0x18] sm:$0xff] }
 0x28f   : > { %v3557_v35 = vsel %vm3550_vm10, %v3553_v9, %v3556_v32  ;;  %v4116_v17 = vsel %vm4115_vm8, %v4099_v56, %v5853_v20  ;;  %5987 = vsinq.f32 %v2203_v3  ;;  %5616 = vmatprep.subr.bf16.mxu0 %v5615_v14  ;;  %vm1794_vm13 = vcmp.lt.s32.totalorder %v1793_v59, 2  ;;  %v8284_v20 = vpop.permute.xlu1 %5861 }
 0x290   : > { %v3558_v7 = vsel %vm1895_vm11, nan, %v3557_v35  ;;  %vm1795_vm2 = vcmp.eq.s32.totalorder %v1793_v59, 0  ;;  %vm1798_vm3 = vcmp.eq.s32.totalorder %v1793_v59, 2  ;;  %vm1898_vm14 = vcmp.lt.s32.totalorder %v1897_v37, 2 }
 0x291   : > { %v5900_v58 = vpack.i.bf16 %v3558_v7, %v3455_v45  ;;  %v1797_v42 = vsel %vm1795_vm2, %v7926_v54, %v1796_v4  ;;  %v1800_v23 = vsel %vm1798_vm3, %v1799_v39, %v7932_v5  ;;  %vm1899_vm0 = vcmp.eq.s32.totalorder %v1897_v37, 0  ;;  %v5857_v54 = vpop.permute.xlu0 %5856  ;;  %v6000_v4 = vld [vmem:[%s6241_s6 + $0x8] sm:$0xff] }
 0x292   : > { %vm1902_vm10 = vcmp.eq.s32.totalorder %v1897_v37, 2  ;;  %v4133_v55 = vsel %vm4132_vm5, %v4116_v17, 0.0  ;;  %5618 = vmatpush3.bf16.msra.mxu0 %v5615_v14  ;;  %v1801_v19 = vsel %vm1794_vm13, %v1797_v42, %v1800_v23  ;;  %v1901_v27 = vsel %vm1899_vm0, %v8768_v33, %v1900_v36 }
 0x293   : > { %5901 = vrot.lane.b32.xlu1 %v5900_v58, %s6126_s20  ;;  %v1904_v24 = vsel %vm1902_vm10, %v1903_v57, %v8767_v30  ;;  %vm4149_vm9 = vcmask 1039360   ;;  %v1802_v40 = vsel %vm1791_vm4, nan, %v1801_v19  ;;  %vm8770_vm1 = vcmask 64512  }
 0x294   : > { %v1905_v5 = vsel %vm1898_vm14, %v1901_v27, %v1904_v24  ;;  %v4150_v63 = vsel %vm4149_vm9, %v4133_v55, 1.0  ;;  %v4100_v14 = vsel %vm8770_vm1, %v6000_v4, %v5849_v2  ;;  %v5864_v30 = vunpack.i.h.bf16 %v8284_v20  ;;  %v8771_v2 = vld [vmem:[#allocation10_spill] sm:$0xff]  ;;  %vm8773_vm13 = vmmov %vm8770_vm1  ;;  %v8359_v4 = vpop.permute.xlu1 %5871 }
 0x295   : > { %v1906_v39 = vsel %vm1895_vm11, nan, %v1905_v5  ;;  %5395 = vmatprep.mubr.f32.mxu0 %v4150_v63  ;;  %v4117_v61 = vsel %vm4115_vm8, %v4100_v14, %v5854_v43  ;;  %v5863_v13 = vunpack.i.l.bf16 %v8284_v20  ;;  %v5859_v57 = vunpack.i.h.bf16 %v5857_v54  ;;  %v5867_v20 = vpop.permute.xlu0 %5866 }
 0x296   : > { %v5895_v36 = vpack.i.bf16 %v1906_v39, %v1802_v40  ;;  %v4134_v33 = vsel %vm4132_vm5, %v4117_v61, 0.0  ;;  %v5858_v49 = vunpack.i.l.bf16 %v5857_v54  ;;  %v1996_v41 = vsel %vm8002_vm15, 0, %v8771_v2  ;;  %vm8772_vm15 = vmmov %vm8770_vm1 }
 0x297   : > { %v4151_v51 = vsel %vm4149_vm9, %v4134_v33, 1.0  ;;  %vm1999_vm4 = vweird.f32 %v7750_v10  ;;  %v2004_v46 = vxor.u32 2147483648, %v8085_v21  ;;  %v2007_v43 = vxor.u32 2147483648, %v8080_v8 }
 0x298   : > { %5896 = vrot.lane.b32.xlu0 %v5895_v36, %s6115_s29  ;;  %5396 = vmatmul.mubr.f32.vlgmr.msra.gmra.mrb[0].mxu0 %v4151_v51  ;;  %v2100_v0 = vsel %vm8073_vm7, 0, %v8026_v15  ;;  %vm2103_vm11 = vweird.f32 %v7792_v16  ;;  %v2108_v6 = vxor.u32 2147483648, %v8156_v53  ;;  %v8317_v50 = vpop.eup %5985  ;;  %v2111_v47 = vxor.u32 2147483648, %v8151_v60 }
 0x299   : > { %v3652_v48 = vand.u32 3, %v1996_v41  ;;  %v3755_v12 = vand.u32 3, %v2100_v0  ;;  %v2000_v56 = vadd.s32 3, %v1996_v41  ;;  %v8320_v1 = vpop.eup %5987  ;;  %v2104_v28 = vadd.s32 3, %v2100_v0 }
 0x29a   : > { %v4101_v11 = vsel %vm8772_vm15, %v6001_v26, %v5858_v49  ;;  %v4102_v15 = vsel %vm8773_vm13, %v6002_v38, %v5859_v57  ;;  %v2204_v29 = vsel %vm8244_vm6, 0, %v8180_v52  ;;  %v2212_v5 = vxor.u32 2147483648, %v8320_v1  ;;  %v6003_v38 = vld [vmem:[%s6241_s6 + $0x20] sm:$0xff] }
 0x29b   : > { %vm3653_vm7 = vcmp.lt.s32.totalorder %v3652_v48, 2  ;;  %vm3654_vm2 = vcmp.eq.s32.totalorder %v3652_v48, 0  ;;  %vm3657_vm3 = vcmp.eq.s32.totalorder %v3652_v48, 2  ;;  %vm3756_vm14 = vcmp.lt.s32.totalorder %v3755_v12, 2 }
 0x29c   : > { %v3656_v9 = vsel %vm3654_vm2, %v8080_v8, %v2004_v46  ;;  %v3659_v3 = vsel %vm3657_vm3, %v2007_v43, %v8085_v21  ;;  %vm3757_vm0 = vcmp.eq.s32.totalorder %v3755_v12, 0  ;;  %vm3760_vm10 = vcmp.eq.s32.totalorder %v3755_v12, 2 }
 0x29d   : > { %v3660_v45 = vsel %vm3653_vm7, %v3656_v9, %v3659_v3  ;;  %v3759_v32 = vsel %vm3757_vm0, %v8151_v60, %v2108_v6  ;;  %v3762_v59 = vsel %vm3760_vm10, %v2111_v47, %v8156_v53  ;;  %v2001_v35 = vand.u32 3, %v2000_v56  ;;  %v4377_v9 = vld [vmem:[#allocation2 + $0x88] sm:$0xff]  ;;  %v4378_v3 = vld [vmem:[#allocation2 + $0x90] sm:$0xff] }
 0x29e   : > { %v3661_v34 = vsel %vm1999_vm4, nan, %v3660_v45  ;;  %v3763_v52 = vsel %vm3756_vm14, %v3759_v32, %v3762_v59  ;;  %v2105_v37 = vand.u32 3, %v2104_v28  ;;  %v4118_v17 = vsel %vm4115_vm8, %v4101_v11, %v5863_v13  ;;  %v4379_v59 = vld [vmem:[#allocation2 + $0x98] sm:$0xff] }
 0x29f   : > { %v3764_v7 = vsel %vm2103_vm11, nan, %v3763_v52  ;;  %vm2002_vm6 = vcmp.lt.s32.totalorder %v2001_v35, 2  ;;  %vm2003_vm1 = vcmp.eq.s32.totalorder %v2001_v35, 0  ;;  %vm2006_vm15 = vcmp.eq.s32.totalorder %v2001_v35, 2  ;;  %v6004_v52 = vld [vmem:[%s6241_s6 + $0x28] sm:$0xff] }
 0x2a0   : > { %v5910_v58 = vpack.i.bf16 %v3764_v7, %v3661_v34  ;;  %v2005_v42 = vsel %vm2003_vm1, %v8080_v8, %v2004_v46  ;;  %v2008_v23 = vsel %vm2006_vm15, %v2007_v43, %v8085_v21  ;;  %vm2106_vm13 = vcmp.lt.s32.totalorder %v2105_v37, 2 }
 0x2a1   : > { %v2009_v55 = vsel %vm2002_vm6, %v2005_v42, %v2008_v23  ;;  %vm2107_vm7 = vcmp.eq.s32.totalorder %v2105_v37, 0  ;;  %vm2110_vm2 = vcmp.eq.s32.totalorder %v2105_v37, 2  ;;  %v4135_v19 = vsel %vm4132_vm5, %v4118_v17, 0.0  ;;  %v4380_v42 = vld [vmem:[#allocation2 + $0xa0] sm:$0xff] }
 0x2a2   : > { %5911 = vrot.lane.b32.xlu1 %v5910_v58, %s6126_s20  ;;  %v2010_v27 = vsel %vm1999_vm4, nan, %v2009_v55  ;;  %v2109_v24 = vsel %vm2107_vm7, %v8151_v60, %v2108_v6  ;;  %v2112_v54 = vsel %vm2110_vm2, %v2111_v47, %v8156_v53  ;;  %v4152_v40 = vsel %vm4149_vm9, %v4135_v19, 1.0 }
 0x2a3   : > { %v2113_v8 = vsel %vm2106_vm13, %v2109_v24, %v2112_v54  ;;  %5398 = vmatprep.mubr.f32.mxu0 %v4152_v40  ;;  %v4119_v21 = vsel %vm4115_vm8, %v4102_v15, %v5864_v30  ;;  %vm2207_vm3 = vweird.f32 %v7908_v25  ;;  %v2215_v60 = vxor.u32 2147483648, %v8317_v50  ;;  %v4383_v24 = vld [vmem:[#allocation2 + $0xb8] sm:$0xff]  ;;  %v4384_v40 = vld [vmem:[#allocation2 + $0xc0] sm:$0xff] }
 0x2a4   : > { %v2114_v10 = vsel %vm2103_vm11, nan, %v2113_v8  ;;  %v4136_v63 = vsel %vm4132_vm5, %v4119_v21, 0.0  ;;  %v2308_v53 = vsel %vm8164_vm12, 0, %v8099_v31  ;;  %vm2311_vm4 = vweird.f32 %v7898_v22  ;;  %v4385_v8 = vld [vmem:[#allocation2 + $0xc8] sm:$0xff] }
 0x2a5   : > { %v5905_v14 = vpack.i.bf16 %v2114_v10, %v2010_v27  ;;  %v4153_v39 = vsel %vm4149_vm9, %v4136_v63, 1.0  ;;  %v2316_v61 = vxor.u32 2147483648, %v8240_v62  ;;  %v2319_v16 = vxor.u32 2147483648, %v8235_v44  ;;  %v4382_v27 = vld [vmem:[#allocation2 + $0xb0] sm:$0xff]  ;;  %v4387_v10 = vld [vmem:[#allocation2 + $0xd8] sm:$0xff] }
 0x2a6   : > { %5399 = vmatmul.mubr.f32.gmra.mrb[2].mxu0 %v4153_v39  ;;  %v3858_v30 = vand.u32 3, %v2204_v29  ;;  %v3961_v13 = vand.u32 3, %v2308_v53  ;;  %v2208_v36 = vadd.s32 3, %v2204_v29  ;;  %v2312_v18 = vadd.s32 3, %v2308_v53  ;;  %v4376_v29 = vld [vmem:[#allocation2 + $0x80] sm:$0xff]  ;;  %v4389_v53 = vld [vmem:[#allocation2 + $0xe8] sm:$0xff] }
 0x2a7   : > { %5906 = vrot.lane.b32.xlu0 %v5905_v14, %s6115_s29  ;;  %v5874_v31 = vunpack.i.h.bf16 %v8359_v4  ;;  %v5873_v33 = vunpack.i.l.bf16 %v8359_v4  ;;  %v5869_v57 = vunpack.i.h.bf16 %v5867_v20  ;;  %v5868_v48 = vunpack.i.l.bf16 %v5867_v20 }
 0x2a8   : > { %vm3859_vm12 = vcmp.lt.s32.totalorder %v3858_v30, 2  ;;  %vm3860_vm11 = vcmp.eq.s32.totalorder %v3858_v30, 0  ;;  %vm3863_vm14 = vcmp.eq.s32.totalorder %v3858_v30, 2  ;;  %vm3962_vm0 = vcmp.lt.s32.totalorder %v3961_v13, 2 }
 0x2a9   : > { %v3862_v49 = vsel %vm3860_vm11, %v8317_v50, %v2212_v5  ;;  %v3865_v51 = vsel %vm3863_vm14, %v2215_v60, %v8320_v1  ;;  %vm3963_vm10 = vcmp.eq.s32.totalorder %v3961_v13, 0  ;;  %vm3966_vm6 = vcmp.eq.s32.totalorder %v3961_v13, 2  ;;  %v6005_v13 = vld [vmem:[%s6241_s6 + $0x30] sm:$0xff] }
 0x2aa   : > { %v3866_v2 = vsel %vm3859_vm12, %v3862_v49, %v3865_v51  ;;  %v3965_v41 = vsel %vm3963_vm10, %v8235_v44, %v2316_v61  ;;  %v3968_v46 = vsel %vm3966_vm6, %v2319_v16, %v8240_v62  ;;  %v2209_v43 = vand.u32 3, %v2208_v36  ;;  %v4390_v49 = vld [vmem:[#allocation2 + $0xf0] sm:$0xff]  ;;  %v4391_v51 = vld [vmem:[#allocation2 + $0xf8] sm:$0xff] }
 0x2ab   : > { %v3867_v0 = vsel %vm2207_vm3, nan, %v3866_v2  ;;  %v3969_v6 = vsel %vm3962_vm0, %v3965_v41, %v3968_v46  ;;  %v2313_v47 = vand.u32 3, %v2312_v18  ;;  %vm8774_vm11 = vcmask 64512   ;;  %v6006_v18 = vld [vmem:[%s6241_s6 + $0x38] sm:$0xff] }
 0x2ac   : > { %v3970_v12 = vsel %vm2311_vm4, nan, %v3969_v6  ;;  %vm2210_vm1 = vcmp.lt.s32.totalorder %v2209_v43, 2  ;;  %vm2211_vm15 = vcmp.eq.s32.totalorder %v2209_v43, 0  ;;  %vm2214_vm13 = vcmp.eq.s32.totalorder %v2209_v43, 2  ;;  %vm8775_vm14 = vmmov %vm8774_vm11 }
 0x2ad   : > { %v5920_v56 = vpack.i.bf16 %v3970_v12, %v3867_v0  ;;  %v2213_v28 = vsel %vm2211_vm15, %v8317_v50, %v2212_v5  ;;  %v2216_v26 = vsel %vm2214_vm13, %v2215_v60, %v8320_v1  ;;  %vm2314_vm7 = vcmp.lt.s32.totalorder %v2313_v47, 2  ;;  %v4386_v5 = vld [vmem:[#allocation2 + $0xd0] sm:$0xff]  ;;  %v4388_v60 = vld [vmem:[#allocation2 + $0xe0] sm:$0xff] }
 0x2ae   : > { %v2217_v11 = vsel %vm2210_vm1, %v2213_v28, %v2216_v26  ;;  %vm2315_vm2 = vcmp.eq.s32.totalorder %v2313_v47, 0  ;;  %vm2318_vm12 = vcmp.eq.s32.totalorder %v2313_v47, 2  ;;  %v4103_v15 = vsel %vm8774_vm11, %v6003_v38, %v5868_v48  ;;  %v6007_v26 = vld [vmem:[%s6241_s6 + $0x40] sm:$0xff]  ;;  %v6008_v38 = vld [vmem:[%s6241_s6 + $0x48] sm:$0xff] }
 0x2af   : > { %5921 = vrot.lane.b32.xlu1 %v5920_v56, %s6126_s20  ;;  %v2218_v45 = vsel %vm2207_vm3, nan, %v2217_v11  ;;  %v2317_v50 = vsel %vm2315_vm2, %v8235_v44, %v2316_v61  ;;  %v2320_v1 = vsel %vm2318_vm12, %v2319_v16, %v8240_v62  ;;  %v4120_v32 = vsel %vm4115_vm8, %v4103_v15, %v5873_v33  ;;  %v4381_v62 = vld [vmem:[#allocation2 + $0xa8] sm:$0xff]  ;;  %vm8776_vm3 = vmmov %vm8774_vm11  ;;  %s8515_s20 = scalar_lea.hbm %s8569_s4, %s5234_s11 }
 0x2b0   : > { %v2321_v35 = vsel %vm2314_vm7, %v2317_v50, %v2320_v1  ;;  %v4137_v34 = vsel %vm4132_vm5, %v4120_v32, 0.0  ;;  %v4104_v37 = vsel %vm8775_vm14, %v6004_v52, %v5869_v57  ;;  %v5619_v17 = vpack.c.bf16 %v4377_v9, %v4376_v29  ;;  %vm8778_vm0 = vmmov %vm8776_vm3 }
 0x2b1   : > { %v2322_v7 = vsel %vm2311_vm4, nan, %v2321_v35  ;;  %v4154_v25 = vsel %vm4149_vm9, %v4137_v34, 1.0  ;;  %v4121_v58 = vsel %vm4115_vm8, %v4104_v37, %v5874_v31  ;;  %v5623_v44 = vpack.c.bf16 %v4379_v59, %v4378_v3  ;;  %vm8777_vm4 = vmmov %vm8776_vm3 }
 0x2b2   : > { %v5915_v23 = vpack.i.bf16 %v2322_v7, %v2218_v45  ;;  %5401 = vmatprep.mubr.f32.mxu0 %v4154_v25  ;;  %v4138_v55 = vsel %vm4132_vm5, %v4121_v58, 0.0  ;;  %5620 = vmatprep.subr.bf16.mxu1 %v5619_v17  ;;  %v5627_v22 = vpack.c.bf16 %v4381_v62, %v4380_v42  ;;  %v5631_v54 = vpack.c.bf16 %v4383_v24, %v4382_v27  ;;  %vm8779_vm10 = vmmov %vm8778_vm0  ;;  %v6010_v25 = vld [vmem:[%s6241_s6 + $0x58] sm:$0xff] }
 0x2b3   : > { %v4155_v19 = vsel %vm4149_vm9, %v4138_v55, 1.0  ;;  %5622 = vmatpush3.bf16.msra.mxu1 %v5619_v17  ;;  %v5635_v21 = vpack.c.bf16 %v4385_v8, %v4384_v40  ;;  %v5639_v63 = vpack.c.bf16 %v4387_v10, %v4386_v5  ;;  %v5643_v4 = vpack.c.bf16 %v4389_v53, %v4388_v60  ;;  %v6009_v17 = vld [vmem:[%s6241_s6 + $0x50] sm:$0xff]  ;;  %vm8780_vm6 = vmmov %vm8778_vm0  ;;  %v6012_v10 = vld [vmem:[%s6241_s6 + $0x68] sm:$0xff] }
 0x2b4   : > { %5916 = vrot.lane.b32.xlu0 %v5915_v23, %s6115_s29  ;;  %5402 = vmatmul.mubr.f32.gmra.mrb[4].mxu0 %v4155_v19  ;;  %v5647_v46 = vpack.c.bf16 %v4391_v51, %v4390_v49  ;;  %vm8781_vm1 = vmmov %vm8778_vm0 }
 0x2b5   : > { %5624 = vmatprep.subr.bf16.mxu1 %v5623_v44  ;;  %vm8782_vm15 = vmmov %vm8778_vm0 }
 0x2b6   : > { %vm8783_vm13 = vmmov %vm8778_vm0 }
 0x2b7   : > { %5626 = vmatpush3.bf16.msra.mxu1 %v5623_v44  ;;  %vm8784_vm7 = vmmov %vm8778_vm0 }
 0x2b8   : > { %5628 = vmatprep.subr.bf16.mxu1 %v5627_v22  ;;  %vm8785_vm2 = vmmov %vm8778_vm0 }
 0x2bb   : > { %5630 = vmatpush3.bf16.msra.mxu1 %v5627_v22 }
 0x2bc   : > { %5632 = vmatprep.subr.bf16.mxu1 %v5631_v54 }
 0x2bf   : > { %5634 = vmatpush3.bf16.msra.mxu1 %v5631_v54 }
 0x2c0   : > { %5636 = vmatprep.subr.bf16.mxu1 %v5635_v21 }
 0x2c3   : > { %5638 = vmatpush3.bf16.msra.mxu1 %v5635_v21  ;;  %v6011_v21 = vld [vmem:[%s6241_s6 + $0x60] sm:$0xff] }
 0x2c4   : > { %5640 = vmatprep.subr.bf16.mxu1 %v5639_v63 }
 0x2c7   : > { %5642 = vmatpush3.bf16.msra.mxu1 %v5639_v63 }
 0x2c8   : > { %5644 = vmatprep.subr.bf16.mxu1 %v5643_v4 }
 0x2cb   : > { %5646 = vmatpush3.bf16.msra.mxu1 %v5643_v4 }
 0x2cc   : > { %5648 = vmatprep.subr.bf16.mxu1 %v5647_v46 }
 0x2cf   : > { %5650 = vmatpush3.bf16.msra.mxu1 %v5647_v46 }
 0x2df   : > { %v5882_v20 = vpop.permute.xlu1 %5881 }
 0x2e0   : > { %v5884_v14 = vunpack.i.h.bf16 %v5882_v20  ;;  %v5883_v39 = vunpack.i.l.bf16 %v5882_v20 }
 0x2e8   : > { %v5877_v61 = vpop.permute.xlu0 %5876 }
 0x2e9   : > { %v5879_v16 = vunpack.i.h.bf16 %v5877_v61  ;;  %v5878_v30 = vunpack.i.l.bf16 %v5877_v61 }
 0x2eb   : > { %v4105_v36 = vsel %vm8776_vm3, %v6005_v13, %v5878_v30  ;;  %v4106_v31 = vsel %vm8777_vm4, %v6006_v18, %v5879_v16 }
 0x2ec   : > { %v4122_v33 = vsel %vm4115_vm8, %v4105_v36, %v5883_v39  ;;  %v4123_v57 = vsel %vm4115_vm8, %v4106_v31, %v5884_v14  ;;  %v6013_v31 = vld [vmem:[%s6241_s6 + $0x78] sm:$0xff] }
 0x2ed   : > { %v4139_v2 = vsel %vm4132_vm5, %v4122_v33, 0.0  ;;  %v4140_v41 = vsel %vm4132_vm5, %v4123_v57, 0.0  ;;  %v6014_v57 = vld [vmem:[%s6241_s6 + $0x70] sm:$0xff] }
 0x2ee   : > { %v4156_v43 = vsel %vm4149_vm9, %v4139_v2, 1.0  ;;  %v4157_v0 = vsel %vm4149_vm9, %v4140_v41, 1.0 }
 0x2ef   : > { %5404 = vmatprep.mubr.f32.mxu0 %v4156_v43 }
 0x2f0   : > { %5405 = vmatmul.mubr.f32.gmra.mrb[6].mxu0 %v4157_v0 }
 0x2f2   : > { %v5892_v6 = vpop.permute.xlu1 %5891 }
 0x2f3   : > { %v5894_v47 = vunpack.i.h.bf16 %v5892_v6  ;;  %v5893_v48 = vunpack.i.l.bf16 %v5892_v6 }
 0x2f9   : > { %v5887_v12 = vpop.permute.xlu0 %5886 }
 0x2fa   : > { %v5889_v56 = vunpack.i.h.bf16 %v5887_v12  ;;  %v5888_v28 = vunpack.i.l.bf16 %v5887_v12 }
 0x2fc   : > { %v4107_v11 = vsel %vm8778_vm0, %v6007_v26, %v5888_v28  ;;  %v4108_v15 = vsel %vm8779_vm10, %v6008_v38, %v5889_v56 }
 0x2fd   : > { %v4124_v29 = vsel %vm4115_vm8, %v4107_v11, %v5893_v48  ;;  %v4125_v9 = vsel %vm4115_vm8, %v4108_v15, %v5894_v47 }
 0x2fe   : > { %v4141_v3 = vsel %vm4132_vm5, %v4124_v29, 0.0  ;;  %v4142_v45 = vsel %vm4132_vm5, %v4125_v9, 0.0 }
 0x2ff   : > { %v4158_v50 = vsel %vm4149_vm9, %v4141_v3, 1.0  ;;  %v4159_v1 = vsel %vm4149_vm9, %v4142_v45, 1.0  ;;  %v4594_v45 = vld [vmem:[#allocation2 + $0x100] sm:$0xff] }
 0x300   : > { %5407 = vmatprep.mubr.f32.mxu0 %v4158_v50  ;;  %v4595_v50 = vld [vmem:[#allocation2 + $0x108] sm:$0xff] }
 0x301   : > { %5408 = vmatmul.mubr.f32.gmra.mrb[8].mxu0 %v4159_v1  ;;  %v4596_v1 = vld [vmem:[#allocation2 + $0x110] sm:$0xff] }
 0x305   : > { %v5902_v32 = vpop.permute.xlu1 %5901 }
 0x306   : > { %v5904_v59 = vunpack.i.h.bf16 %v5902_v32  ;;  %v5903_v35 = vunpack.i.l.bf16 %v5902_v32 }
 0x30a   : > { %v5897_v34 = vpop.permute.xlu0 %5896 }
 0x30b   : > { %v5899_v52 = vunpack.i.h.bf16 %v5897_v34  ;;  %v5898_v37 = vunpack.i.l.bf16 %v5897_v34  ;;  %v4597_v34 = vld [vmem:[#allocation2 + $0x118] sm:$0xff] }
 0x30d   : > { %v4109_v7 = vsel %vm8780_vm6, %v6009_v17, %v5898_v37  ;;  %v4110_v58 = vsel %vm8781_vm1, %v6010_v25, %v5899_v52  ;;  %v5655_v37 = vpack.c.bf16 %v4597_v34, %v4596_v1  ;;  %v4598_v17 = vld [vmem:[#allocation2 + $0x120] sm:$0xff] }
 0x30e   : > { %v4126_v44 = vsel %vm4115_vm8, %v4109_v7, %v5903_v35  ;;  %v4127_v42 = vsel %vm4115_vm8, %v4110_v58, %v5904_v59  ;;  %v5651_v35 = vpack.c.bf16 %v4595_v50, %v4594_v45  ;;  %v4599_v7 = vld [vmem:[#allocation2 + $0x128] sm:$0xff] }
 0x30f   : > { %v4143_v62 = vsel %vm4132_vm5, %v4126_v44, 0.0  ;;  %v4144_v23 = vsel %vm4132_vm5, %v4127_v42, 0.0  ;;  %v5659_v44 = vpack.c.bf16 %v4599_v7, %v4598_v17  ;;  %v4600_v42 = vld [vmem:[#allocation2 + $0x130] sm:$0xff] }
 0x310   : > { %v4160_v55 = vsel %vm4149_vm9, %v4143_v62, 1.0  ;;  %v4161_v19 = vsel %vm4149_vm9, %v4144_v23, 1.0  ;;  %5652 = vmatprep.subr.bf16.mxu0 %v5651_v35  ;;  %v4601_v62 = vld [vmem:[#allocation2 + $0x138] sm:$0xff] }
 0x311   : > { %5410 = vmatprep.mubr.f32.mxu0 %v4160_v55  ;;  %5654 = vmatpush3.bf16.msra.mxu0 %v5651_v35  ;;  %v5663_v23 = vpack.c.bf16 %v4601_v62, %v4600_v42  ;;  %v4602_v55 = vld [vmem:[#allocation2 + $0x140] sm:$0xff] }
 0x312   : > { %5411 = vmatmul.mubr.f32.gmra.mrb[10].mxu0 %v4161_v19  ;;  %5656 = vmatprep.subr.bf16.mxu0 %v5655_v37  ;;  %v4603_v19 = vld [vmem:[#allocation2 + $0x148] sm:$0xff] }
 0x314   : > { %v5912_v22 = vpop.permute.xlu1 %5911 }
 0x315   : > { %v5914_v27 = vunpack.i.h.bf16 %v5912_v22  ;;  %v5913_v24 = vunpack.i.l.bf16 %v5912_v22  ;;  %5658 = vmatpush3.bf16.msra.mxu0 %v5655_v37  ;;  %v5667_v22 = vpack.c.bf16 %v4603_v19, %v4602_v55  ;;  %v4813_v55 = vld [vmem:[#allocation2 + $0x188] sm:$0xff]  ;;  %v4814_v19 = vld [vmem:[#allocation2 + $0x190] sm:$0xff] }
 0x316   : > { %5660 = vmatprep.subr.bf16.mxu0 %v5659_v44 }
 0x319   : > { %v5907_v54 = vpop.permute.xlu0 %5906  ;;  %5662 = vmatpush3.bf16.msra.mxu0 %v5659_v44 }
 0x31a   : > { %v5909_v40 = vunpack.i.h.bf16 %v5907_v54  ;;  %v5908_v8 = vunpack.i.l.bf16 %v5907_v54  ;;  %5664 = vmatprep.subr.bf16.mxu0 %v5663_v23 }
 0x31c   : > { %v4111_v5 = vsel %vm8782_vm15, %v6011_v21, %v5908_v8  ;;  %v4112_v63 = vsel %vm8783_vm13, %v6012_v10, %v5909_v40 }
 0x31d   : > { %v4128_v60 = vsel %vm4115_vm8, %v4111_v5, %v5913_v24  ;;  %v4129_v53 = vsel %vm4115_vm8, %v4112_v63, %v5914_v27  ;;  %v4604_v27 = vld [vmem:[#allocation2 + $0x150] sm:$0xff]  ;;  %v4605_v24 = vld [vmem:[#allocation2 + $0x158] sm:$0xff]  ;;  %5666 = vmatpush3.bf16.msra.mxu0 %v5663_v23  ;;  %v4812_v23 = vld [vmem:[#allocation2 + $0x180] sm:$0xff] }
 0x31e   : > { %v4145_v4 = vsel %vm4132_vm5, %v4128_v60, 0.0  ;;  %v4146_v20 = vsel %vm4132_vm5, %v4129_v53, 0.0  ;;  %5668 = vmatprep.subr.bf16.mxu0 %v5667_v22  ;;  %v5671_v54 = vpack.c.bf16 %v4605_v24, %v4604_v27  ;;  %v4606_v60 = vld [vmem:[#allocation2 + $0x160] sm:$0xff]  ;;  %v4607_v53 = vld [vmem:[#allocation2 + $0x168] sm:$0xff]  ;;  %v5683_v27 = vpack.c.bf16 %v4813_v55, %v4812_v23  ;;  %v4815_v24 = vld [vmem:[#allocation2 + $0x198] sm:$0xff] }
 0x31f   : > { %v4162_v14 = vsel %vm4149_vm9, %v4145_v4, 1.0  ;;  %v4163_v39 = vsel %vm4149_vm9, %v4146_v20, 1.0  ;;  %v4608_v4 = vld [vmem:[#allocation2 + $0x170] sm:$0xff]  ;;  %v5675_v20 = vpack.c.bf16 %v4607_v53, %v4606_v60  ;;  %v4819_v53 = vld [vmem:[#allocation2 + $0x1b8] sm:$0xff] }
 0x320   : > { %5413 = vmatprep.mubr.f32.mxu0 %v4162_v14  ;;  %v4609_v14 = vld [vmem:[#allocation2 + $0x178] sm:$0xff]  ;;  %5684 = vmatprep.subr.bf16.mxu1 %v5683_v27  ;;  %v4818_v60 = vld [vmem:[#allocation2 + $0x1b0] sm:$0xff] }
 0x321   : > { %5414 = vmatmul.mubr.f32.gmra.mrb[12].mxu0 %v4163_v39  ;;  %v5922_v61 = vpop.permute.xlu1 %5921  ;;  %v5679_v39 = vpack.c.bf16 %v4609_v14, %v4608_v4  ;;  %v5695_v4 = vpack.c.bf16 %v4819_v53, %v4818_v60  ;;  %v4821_v14 = vld [vmem:[#allocation2 + $0x1c8] sm:$0xff] }
 0x322   : > { %v5924_v16 = vunpack.i.h.bf16 %v5922_v61  ;;  %v5923_v30 = vunpack.i.l.bf16 %v5922_v61  ;;  %5670 = vmatpush3.bf16.msra.mxu0 %v5667_v22 }
 0x323   : > { %5672 = vmatprep.subr.bf16.mxu0 %v5671_v54 }
 0x326   : > { %v5917_v13 = vpop.permute.xlu0 %5916  ;;  %5674 = vmatpush3.bf16.msra.mxu0 %v5671_v54 }
 0x327   : > { %v5919_v36 = vunpack.i.h.bf16 %v5917_v13  ;;  %v5918_v18 = vunpack.i.l.bf16 %v5917_v13  ;;  %5676 = vmatprep.subr.bf16.mxu0 %v5675_v20 }
 0x329   : > { %v4114_v33 = vsel %vm8784_vm7, %v6013_v31, %v5919_v36  ;;  %v4113_v49 = vsel %vm8785_vm2, %v6014_v57, %v5918_v18 }
 0x32a   : > { %v4130_v51 = vsel %vm4115_vm8, %v4113_v49, %v5923_v30  ;;  %v4131_v2 = vsel %vm4115_vm8, %v4114_v33, %v5924_v16  ;;  %5678 = vmatpush3.bf16.msra.mxu0 %v5675_v20  ;;  %v4820_v20 = vld [vmem:[#allocation2 + $0x1c0] sm:$0xff] }
 0x32b   : > { %v4147_v41 = vsel %vm4132_vm5, %v4130_v51, 0.0  ;;  %v4148_v46 = vsel %vm4132_vm5, %v4131_v2, 0.0  ;;  %5680 = vmatprep.subr.bf16.mxu0 %v5679_v39 }
 0x32c   : > { %v4164_v43 = vsel %vm4149_vm9, %v4147_v41, 1.0  ;;  %v4165_v0 = vsel %vm4149_vm9, %v4148_v46, 1.0 }
 0x32d   : > { %5416 = vmatprep.mubr.f32.mxu0 %v4164_v43 }
 0x32e   : > { %5417 = vmatmul.mubr.f32.gmra.mrb[14].mxu0 %v4165_v0 }
 0x32f   : > { %5682 = vmatpush3.bf16.msra.mxu0 %v5679_v39  ;;  %v5699_v39 = vpack.c.bf16 %v4821_v14, %v4820_v20 }
 0x36b   : > { %v5397_v6 = vpop.f32.mrb[0].mxu0 }
 0x36c   : > { %v4344_v47 = vmul.f32 0.2, %v5397_v6  ;;  %v4248_v48 = vpop.f32.mrb[1].mxu0  ;;  %vm4328_vm12 = vcmp.gt.f32.partialorder %v5397_v6, 0.0 }
 0x36d   : > { %v4343_v12 = vmul.f32 0.2, %v4248_v48  ;;  %vm4327_vm11 = vcmp.gt.f32.partialorder %v4248_v48, 0.0 }
 0x36e   : > { %v4360_v28 = vsel %vm4328_vm12, %v5397_v6, %v4344_v47 }
 0x36f   : > { %v4359_v56 = vsel %vm4327_vm11, %v4248_v48, %v4343_v12 }
 0x370   : > { %5451 = vmatprep.mubr.f32.mxu1 %v4359_v56 }
 0x371   : > { %5452 = vmatmul.mubr.f32.vlgmr.msra.gmra.mrb[0].mxu1 %v4360_v28 }
 0x372   : > { %5686 = vmatpush3.bf16.msra.mxu1 %v5683_v27 }
 0x379   : > { %v5400_v26 = vpop.f32.mrb[2].mxu0 }
 0x37a   : > { %v4346_v11 = vmul.f32 0.2, %v5400_v26  ;;  %v4258_v38 = vpop.f32.mrb[3].mxu0  ;;  %vm4330_vm8 = vcmp.gt.f32.partialorder %v5400_v26, 0.0 }
 0x37b   : > { %vm4329_vm5 = vcmp.gt.f32.partialorder %v4258_v38, 0.0  ;;  %v4345_v15 = vmul.f32 0.2, %v4258_v38 }
 0x37c   : > { %v4362_v9 = vsel %vm4330_vm8, %v5400_v26, %v4346_v11 }
 0x37d   : > { %v4361_v29 = vsel %vm4329_vm5, %v4258_v38, %v4345_v15  ;;  %v8449_v38 = vld [vmem:[%s8568_s3 + $0x1] ss:$0 sm:$0xff] }
 0x37e   : > { %5454 = vmatprep.mubr.f32.mxu1 %v4361_v29 }
 0x37f   : > { %5455 = vmatmul.mubr.f32.gmra.mrb[2].mxu1 %v4362_v9 }
 0x387   : > { %v5403_v3 = vpop.f32.mrb[4].mxu0 }
 0x388   : > { %v4348_v32 = vmul.f32 0.2, %v5403_v3  ;;  %v4268_v59 = vpop.f32.mrb[5].mxu0  ;;  %vm4332_vm9 = vcmp.gt.f32.partialorder %v5403_v3, 0.0 }
 0x389   : > { %vm4331_vm14 = vcmp.gt.f32.partialorder %v4268_v59, 0.0  ;;  %v4347_v52 = vmul.f32 0.2, %v4268_v59 }
 0x38a   : > { %v4364_v58 = vsel %vm4332_vm9, %v5403_v3, %v4348_v32 }
 0x38b   : > { %v4363_v25 = vsel %vm4331_vm14, %v4268_v59, %v4347_v52 }
 0x38c   : > { %5457 = vmatprep.mubr.f32.mxu1 %v4363_v25 }
 0x38d   : > { %5458 = vmatmul.mubr.f32.gmra.mrb[4].mxu1 %v4364_v58 }
 0x3c3   : > { %v5406_v40 = vpop.f32.mrb[6].mxu0 }
 0x3c4   : > { %v4350_v8 = vmul.f32 0.2, %v5406_v40  ;;  %v4278_v21 = vpop.f32.mrb[7].mxu0  ;;  %vm4334_vm3 = vcmp.gt.f32.partialorder %v5406_v40, 0.0 }
 0x3c5   : > { %vm4333_vm4 = vcmp.gt.f32.partialorder %v4278_v21, 0.0  ;;  %v4349_v5 = vmul.f32 0.2, %v4278_v21 }
 0x3c6   : > { %v4366_v63 = vsel %vm4334_vm3, %v5406_v40, %v4350_v8  ;;  %v5687_v40 = vpack.c.bf16 %v4815_v24, %v4814_v19  ;;  %v4816_v8 = vld [vmem:[#allocation2 + $0x1a0] sm:$0xff] }
 0x3c7   : > { %v4365_v10 = vsel %vm4333_vm4, %v4278_v21, %v4349_v5  ;;  %v4817_v21 = vld [vmem:[#allocation2 + $0x1a8] sm:$0xff]  ;;  %v8470_v24 = vld [vmem:[%s8568_s3 + $0x2] ss:$0 sm:$0xff] }
 0x3c8   : > { %5460 = vmatprep.mubr.f32.mxu1 %v4365_v10  ;;  %5688 = vmatprep.subr.bf16.mxu1 %v5687_v40 }
 0x3c9   : > { %5461 = vmatmul.mubr.f32.gmra.mrb[6].mxu1 %v4366_v63  ;;  %v5691_v63 = vpack.c.bf16 %v4817_v21, %v4816_v8 }
 0x3ca   : > { %5690 = vmatpush3.bf16.msra.mxu1 %v5687_v40 }
 0x3cb   : > { %5692 = vmatprep.subr.bf16.mxu1 %v5691_v63 }
 0x3ce   : > { %5694 = vmatpush3.bf16.msra.mxu1 %v5691_v63 }
 0x3cf   : > { %5696 = vmatprep.subr.bf16.mxu1 %v5695_v4 }
 0x3d2   : > { %5698 = vmatpush3.bf16.msra.mxu1 %v5695_v4 }
 0x3d3   : > { %5700 = vmatprep.subr.bf16.mxu1 %v5699_v39 }
 0x3d4   : > { %v5409_v61 = vpop.f32.mrb[8].mxu0 }
 0x3d5   : > { %v4352_v16 = vmul.f32 0.2, %v5409_v61  ;;  %v4288_v30 = vpop.f32.mrb[9].mxu0  ;;  %vm4336_vm0 = vcmp.gt.f32.partialorder %v5409_v61, 0.0 }
 0x3d6   : > { %vm4335_vm10 = vcmp.gt.f32.partialorder %v4288_v30, 0.0  ;;  %v4351_v13 = vmul.f32 0.2, %v4288_v30  ;;  %5702 = vmatpush3.bf16.msra.mxu1 %v5699_v39 }
 0x3d7   : > { %v4368_v18 = vsel %vm4336_vm0, %v5409_v61, %v4352_v16  ;;  %v4822_v61 = vld [vmem:[#allocation2 + $0x1d0] sm:$0xff]  ;;  %v4823_v16 = vld [vmem:[#allocation2 + $0x1d8] sm:$0xff] }
 0x3d8   : > { %v4367_v36 = vsel %vm4335_vm10, %v4288_v30, %v4351_v13  ;;  %v5703_v30 = vpack.c.bf16 %v4823_v16, %v4822_v61 }
 0x3d9   : > { %5463 = vmatprep.mubr.f32.mxu1 %v4367_v36 }
 0x3da   : > { %5464 = vmatmul.mubr.f32.gmra.mrb[8].mxu1 %v4368_v18  ;;  %5704 = vmatprep.subr.bf16.mxu1 %v5703_v30 }
 0x3db   : > { %5706 = vmatpush3.bf16.msra.mxu1 %v5703_v30 }
 0x3e5   : > { %v5412_v31 = vpop.f32.mrb[10].mxu0 }
 0x3e6   : > { %v4354_v33 = vmul.f32 0.2, %v5412_v31  ;;  %v4298_v57 = vpop.f32.mrb[11].mxu0  ;;  %vm4338_vm6 = vcmp.gt.f32.partialorder %v5412_v31, 0.0 }
 0x3e7   : > { %vm4337_vm1 = vcmp.gt.f32.partialorder %v4298_v57, 0.0  ;;  %v4353_v49 = vmul.f32 0.2, %v4298_v57 }
 0x3e8   : > { %v4370_v2 = vsel %vm4338_vm6, %v5412_v31, %v4354_v33 }
 0x3e9   : > { %v4369_v51 = vsel %vm4337_vm1, %v4298_v57, %v4353_v49 }
 0x3ea   : > { %5466 = vmatprep.mubr.f32.mxu1 %v4369_v51 }
 0x3eb   : > { %5467 = vmatmul.mubr.f32.gmra.mrb[10].mxu1 %v4370_v2  ;;  %v4824_v2 = vld [vmem:[#allocation2 + $0x1e0] sm:$0xff] }
 0x3f4   : > { %v5415_v41 = vpop.f32.mrb[12].mxu0 }
 0x3f5   : > { %v4356_v46 = vmul.f32 0.2, %v5415_v41  ;;  %v4308_v43 = vpop.f32.mrb[13].mxu0  ;;  %vm4340_vm15 = vcmp.gt.f32.partialorder %v5415_v41, 0.0 }
 0x3f6   : > { %vm4339_vm13 = vcmp.gt.f32.partialorder %v4308_v43, 0.0  ;;  %v4355_v0 = vmul.f32 0.2, %v4308_v43 }
 0x3f7   : > { %v4372_v47 = vsel %vm4340_vm15, %v5415_v41, %v4356_v46  ;;  %v4825_v41 = vld [vmem:[#allocation2 + $0x1e8] sm:$0xff]  ;;  %v4826_v46 = vld [vmem:[#allocation2 + $0x1f0] sm:$0xff] }
 0x3f8   : > { %v4371_v6 = vsel %vm4339_vm13, %v4308_v43, %v4355_v0  ;;  %v5707_v43 = vpack.c.bf16 %v4825_v41, %v4824_v2  ;;  %v4827_v0 = vld [vmem:[#allocation2 + $0x1f8] sm:$0xff] }
 0x3f9   : > { %5469 = vmatprep.mubr.f32.mxu1 %v4371_v6  ;;  %v5711_v6 = vpack.c.bf16 %v4827_v0, %v4826_v46 }
 0x3fa   : > { %5470 = vmatmul.mubr.f32.gmra.mrb[12].mxu1 %v4372_v47  ;;  %5708 = vmatprep.subr.bf16.mxu1 %v5707_v43 }
 0x3fb   : > { %5710 = vmatpush3.bf16.msra.mxu1 %v5707_v43 }
 0x3fc   : > { %5712 = vmatprep.subr.bf16.mxu1 %v5711_v6 }
 0x3ff   : > { %5714 = vmatpush3.bf16.msra.mxu1 %v5711_v6 }
 0x401   : > { %v5418_v48 = vpop.f32.mrb[14].mxu0 }
 0x402   : > { %v4358_v12 = vmul.f32 0.2, %v5418_v48  ;;  %v4318_v56 = vpop.f32.mrb[15].mxu0  ;;  %vm4342_vm7 = vcmp.gt.f32.partialorder %v5418_v48, 0.0 }
 0x403   : > { %vm4341_vm2 = vcmp.gt.f32.partialorder %v4318_v56, 0.0  ;;  %v4357_v28 = vmul.f32 0.2, %v4318_v56 }
 0x404   : > { %v4374_v11 = vsel %vm4342_vm7, %v5418_v48, %v4358_v12 }
 0x405   : > { %v4373_v26 = vsel %vm4341_vm2, %v4318_v56, %v4357_v28 }
 0x406   : > { %5472 = vmatprep.mubr.f32.mxu1 %v4373_v26 }
 0x407   : > { %5473 = vmatmul.mubr.f32.gmra.mrb[14].mxu1 %v4374_v11 }
 0x444   : > { %v5453_v15 = vpop.f32.mrb[0].mxu1 }
 0x445   : > { %v4472_v29 = vadd.f32 %v5453_v15, %v8449_v38  ;;  %v4466_v9 = vpop.f32.mrb[1].mxu1 }
 0x446   : > { %v4467_v3 = vadd.f32 %v8449_v38, %v4466_v9 }
 0x447   : > { %v4562_v45 = vmul.f32 0.2, %v4472_v29  ;;  %vm4546_vm12 = vcmp.gt.f32.partialorder %v4472_v29, 0.0 }
 0x448   : > { %v4561_v50 = vmul.f32 0.2, %v4467_v3  ;;  %vm4545_vm11 = vcmp.gt.f32.partialorder %v4467_v3, 0.0 }
 0x449   : > { %v4578_v32 = vsel %vm4546_vm12, %v4472_v29, %v4562_v45 }
 0x44a   : > { %v4577_v1 = vsel %vm4545_vm11, %v4467_v3, %v4561_v50 }
 0x44b   : > { %5507 = vmatprep.mubr.f32.mxu0 %v4577_v1 }
 0x44c   : > { %5508 = vmatmul.mubr.f32.vlgmr.msra.gmra.mrb[16].mxu0 %v4578_v32 }
 0x452   : > { %v5456_v59 = vpop.f32.mrb[2].mxu1 }
 0x453   : > { %v4482_v35 = vadd.f32 %v5456_v59, %v8449_v38  ;;  %v4476_v34 = vpop.f32.mrb[3].mxu1 }
 0x454   : > { %v4477_v52 = vadd.f32 %v8449_v38, %v4476_v34 }
 0x455   : > { %v4564_v37 = vmul.f32 0.2, %v4482_v35  ;;  %vm4548_vm5 = vcmp.gt.f32.partialorder %v4482_v35, 0.0 }
 0x456   : > { %v4563_v17 = vmul.f32 0.2, %v4477_v52  ;;  %vm4547_vm8 = vcmp.gt.f32.partialorder %v4477_v52, 0.0 }
 0x457   : > { %v4580_v25 = vsel %vm4548_vm5, %v4482_v35, %v4564_v37 }
 0x458   : > { %v4579_v7 = vsel %vm4547_vm8, %v4477_v52, %v4563_v17 }
 0x459   : > { %5510 = vmatprep.mubr.f32.mxu0 %v4579_v7 }
 0x45a   : > { %5511 = vmatmul.mubr.f32.gmra.mrb[18].mxu0 %v4580_v25 }
 0x460   : > { %v5459_v58 = vpop.f32.mrb[4].mxu1 }
 0x461   : > { %v4492_v44 = vadd.f32 %v5459_v58, %v8449_v38  ;;  %v4486_v42 = vpop.f32.mrb[5].mxu1 }
 0x462   : > { %v4487_v62 = vadd.f32 %v8449_v38, %v4486_v42 }
 0x463   : > { %v4566_v22 = vmul.f32 0.2, %v4492_v44  ;;  %vm4550_vm14 = vcmp.gt.f32.partialorder %v4492_v44, 0.0 }
 0x464   : > { %v4565_v54 = vmul.f32 0.2, %v4487_v62  ;;  %vm4549_vm9 = vcmp.gt.f32.partialorder %v4487_v62, 0.0 }
 0x465   : > { %v4582_v10 = vsel %vm4550_vm14, %v4492_v44, %v4566_v22 }
 0x466   : > { %v4581_v5 = vsel %vm4549_vm9, %v4487_v62, %v4565_v54 }
 0x467   : > { %5513 = vmatprep.mubr.f32.mxu0 %v4581_v5 }
 0x468   : > { %5514 = vmatmul.mubr.f32.gmra.mrb[20].mxu0 %v4582_v10 }
 0x49c   : > { %v5462_v13 = vpop.f32.mrb[6].mxu1 }
 0x49d   : > { %v4502_v36 = vadd.f32 %v5462_v13, %v8449_v38  ;;  %v4496_v18 = vpop.f32.mrb[7].mxu1 }
 0x49e   : > { %v4497_v31 = vadd.f32 %v8449_v38, %v4496_v18 }
 0x49f   : > { %v4568_v33 = vmul.f32 0.2, %v4502_v36  ;;  %vm4552_vm4 = vcmp.gt.f32.partialorder %v4502_v36, 0.0 }
 0x4a0   : > { %v4567_v57 = vmul.f32 0.2, %v4497_v31  ;;  %vm4551_vm3 = vcmp.gt.f32.partialorder %v4497_v31, 0.0 }
 0x4a1   : > { %v4584_v51 = vsel %vm4552_vm4, %v4502_v36, %v4568_v33 }
 0x4a2   : > { %v4583_v49 = vsel %vm4551_vm3, %v4497_v31, %v4567_v57 }
 0x4a3   : > { %5516 = vmatprep.mubr.f32.mxu0 %v4583_v49 }
 0x4a4   : > { %5517 = vmatmul.mubr.f32.gmra.mrb[22].mxu0 %v4584_v51 }
 0x4ad   : > { %v5465_v47 = vpop.f32.mrb[8].mxu1 }
 0x4ae   : > { %v4512_v48 = vadd.f32 %v5465_v47, %v8449_v38  ;;  %v4506_v12 = vpop.f32.mrb[9].mxu1 }
 0x4af   : > { %v4507_v56 = vadd.f32 %v8449_v38, %v4506_v12 }
 0x4b0   : > { %v4570_v28 = vmul.f32 0.2, %v4512_v48  ;;  %vm4554_vm10 = vcmp.gt.f32.partialorder %v4512_v48, 0.0 }
 0x4b1   : > { %v4569_v26 = vmul.f32 0.2, %v4507_v56  ;;  %vm4553_vm0 = vcmp.gt.f32.partialorder %v4507_v56, 0.0 }
 0x4b2   : > { %v4586_v15 = vsel %vm4554_vm10, %v4512_v48, %v4570_v28 }
 0x4b3   : > { %v4585_v11 = vsel %vm4553_vm0, %v4507_v56, %v4569_v26 }
 0x4b4   : > { %5519 = vmatprep.mubr.f32.mxu0 %v4585_v11 }
 0x4b5   : > { %5520 = vmatmul.mubr.f32.gmra.mrb[24].mxu0 %v4586_v15 }
 0x4be   : > { %v5468_v29 = vpop.f32.mrb[10].mxu1 }
 0x4bf   : > { %v4522_v9 = vadd.f32 %v5468_v29, %v8449_v38  ;;  %v4516_v3 = vpop.f32.mrb[11].mxu1 }
 0x4c0   : > { %v4517_v45 = vadd.f32 %v8449_v38, %v4516_v3 }
 0x4c1   : > { %v4572_v50 = vmul.f32 0.2, %v4522_v9  ;;  %vm4556_vm1 = vcmp.gt.f32.partialorder %v4522_v9, 0.0 }
 0x4c2   : > { %v4571_v1 = vmul.f32 0.2, %v4517_v45  ;;  %vm4555_vm6 = vcmp.gt.f32.partialorder %v4517_v45, 0.0 }
 0x4c3   : > { %v4588_v59 = vsel %vm4556_vm1, %v4522_v9, %v4572_v50 }
 0x4c4   : > { %v4587_v32 = vsel %vm4555_vm6, %v4517_v45, %v4571_v1 }
 0x4c5   : > { %5522 = vmatprep.mubr.f32.mxu0 %v4587_v32 }
 0x4c6   : > { %5523 = vmatmul.mubr.f32.gmra.mrb[26].mxu0 %v4588_v59 }
 0x4cd   : > { %v5471_v35 = vpop.f32.mrb[12].mxu1 }
 0x4ce   : > { %v4532_v34 = vadd.f32 %v5471_v35, %v8449_v38  ;;  %v4526_v52 = vpop.f32.mrb[13].mxu1 }
 0x4cf   : > { %v4527_v37 = vadd.f32 %v8449_v38, %v4526_v52 }
 0x4d0   : > { %v4574_v17 = vmul.f32 0.2, %v4532_v34  ;;  %vm4558_vm13 = vcmp.gt.f32.partialorder %v4532_v34, 0.0 }
 0x4d1   : > { %v4573_v7 = vmul.f32 0.2, %v4527_v37  ;;  %vm4557_vm15 = vcmp.gt.f32.partialorder %v4527_v37, 0.0 }
 0x4d2   : > { %v4590_v58 = vsel %vm4558_vm13, %v4532_v34, %v4574_v17 }
 0x4d3   : > { %v4589_v25 = vsel %vm4557_vm15, %v4527_v37, %v4573_v7 }
 0x4d4   : > { %5525 = vmatprep.mubr.f32.mxu0 %v4589_v25 }
 0x4d5   : > { %5526 = vmatmul.mubr.f32.gmra.mrb[28].mxu0 %v4590_v58 }
 0x4da   : > { %v5474_v44 = vpop.f32.mrb[14].mxu1 }
 0x4db   : > { %v4542_v42 = vadd.f32 %v5474_v44, %v8449_v38  ;;  %v4536_v62 = vpop.f32.mrb[15].mxu1 }
 0x4dc   : > { %v4537_v23 = vadd.f32 %v8449_v38, %v4536_v62 }
 0x4dd   : > { %v4576_v55 = vmul.f32 0.2, %v4542_v42  ;;  %vm4560_vm2 = vcmp.gt.f32.partialorder %v4542_v42, 0.0 }
 0x4de   : > { %v4575_v19 = vmul.f32 0.2, %v4537_v23  ;;  %vm4559_vm7 = vcmp.gt.f32.partialorder %v4537_v23, 0.0 }
 0x4df   : > { %v4592_v27 = vsel %vm4560_vm2, %v4542_v42, %v4576_v55 }
 0x4e0   : > { %v4591_v22 = vsel %vm4559_vm7, %v4537_v23, %v4575_v19 }
 0x4e1   : > { %5528 = vmatprep.mubr.f32.mxu0 %v4591_v22 }
 0x4e2   : > { %5529 = vmatmul.mubr.f32.gmra.mrb[30].mxu0 %v4592_v27 }
 0x51f   : > { %v5509_v54 = vpop.f32.mrb[16].mxu0 }
 0x520   : > { %v4690_v40 = vadd.f32 %v5509_v54, %v8470_v24  ;;  %v4684_v8 = vpop.f32.mrb[17].mxu0 }
 0x521   : > { %v4685_v21 = vadd.f32 %v8470_v24, %v4684_v8 }
 0x522   : > { %v4780_v38 = vmul.f32 0.2, %v4690_v40  ;;  %vm4764_vm12 = vcmp.gt.f32.partialorder %v4690_v40, 0.0 }
 0x523   : > { %v4779_v5 = vmul.f32 0.2, %v4685_v21  ;;  %vm4763_vm11 = vcmp.gt.f32.partialorder %v4685_v21, 0.0 }
 0x524   : > { %v4796_v63 = vsel %vm4764_vm12, %v4690_v40, %v4780_v38  ;;  %v5228_v40 = vld [vmem:[%s8568_s3 + $0x3] ss:$0 sm:$0xff] }
 0x525   : > { %v4795_v10 = vsel %vm4763_vm11, %v4685_v21, %v4779_v5 }
 0x526   : > { %5563 = vmatprep.mubr.f32.mxu1 %v4795_v10 }
 0x527   : > { %5564 = vmatmul.mubr.f32.vlgmr.msra.gmra.mrb[16].mxu1 %v4796_v63 }
 0x52d   : > { %v5512_v60 = vpop.f32.mrb[18].mxu0 }
 0x52e   : > { %v4700_v53 = vadd.f32 %v5512_v60, %v8470_v24  ;;  %v4694_v4 = vpop.f32.mrb[19].mxu0 }
 0x52f   : > { %v4695_v20 = vadd.f32 %v8470_v24, %v4694_v4 }
 0x530   : > { %v4782_v14 = vmul.f32 0.2, %v4700_v53  ;;  %vm4766_vm5 = vcmp.gt.f32.partialorder %v4700_v53, 0.0 }
 0x531   : > { %v4781_v39 = vmul.f32 0.2, %v4695_v20  ;;  %vm4765_vm8 = vcmp.gt.f32.partialorder %v4695_v20, 0.0 }
 0x532   : > { %v4798_v16 = vsel %vm4766_vm5, %v4700_v53, %v4782_v14 }
 0x533   : > { %v4797_v61 = vsel %vm4765_vm8, %v4695_v20, %v4781_v39 }
 0x534   : > { %5566 = vmatprep.mubr.f32.mxu1 %v4797_v61 }
 0x535   : > { %5567 = vmatmul.mubr.f32.gmra.mrb[18].mxu1 %v4798_v16 }
 0x53b   : > { %v5515_v30 = vpop.f32.mrb[20].mxu0 }
 0x53c   : > { %v4710_v13 = vadd.f32 %v5515_v30, %v8470_v24  ;;  %v4704_v36 = vpop.f32.mrb[21].mxu0 }
 0x53d   : > { %v4705_v18 = vadd.f32 %v8470_v24, %v4704_v36 }
 0x53e   : > { %v4784_v31 = vmul.f32 0.2, %v4710_v13  ;;  %vm4768_vm14 = vcmp.gt.f32.partialorder %v4710_v13, 0.0 }
 0x53f   : > { %v4783_v33 = vmul.f32 0.2, %v4705_v18  ;;  %vm4767_vm9 = vcmp.gt.f32.partialorder %v4705_v18, 0.0 }
 0x540   : > { %v4800_v49 = vsel %vm4768_vm14, %v4710_v13, %v4784_v31 }
 0x541   : > { %v4799_v57 = vsel %vm4767_vm9, %v4705_v18, %v4783_v33 }
 0x542   : > { %5569 = vmatprep.mubr.f32.mxu1 %v4799_v57 }
 0x543   : > { %5570 = vmatmul.mubr.f32.gmra.mrb[20].mxu1 %v4800_v49 }
 0x577   : > { %v5518_v51 = vpop.f32.mrb[22].mxu0 }
 0x578   : > { %v4720_v2 = vadd.f32 %v5518_v51, %v8470_v24  ;;  %v4714_v41 = vpop.f32.mrb[23].mxu0 }
 0x579   : > { %v4715_v46 = vadd.f32 %v8470_v24, %v4714_v41 }
 0x57a   : > { %v4786_v43 = vmul.f32 0.2, %v4720_v2  ;;  %vm4770_vm4 = vcmp.gt.f32.partialorder %v4720_v2, 0.0 }
 0x57b   : > { %v4785_v0 = vmul.f32 0.2, %v4715_v46  ;;  %vm4769_vm3 = vcmp.gt.f32.partialorder %v4715_v46, 0.0 }
 0x57c   : > { %v4802_v47 = vsel %vm4770_vm4, %v4720_v2, %v4786_v43 }
 0x57d   : > { %v4801_v6 = vsel %vm4769_vm3, %v4715_v46, %v4785_v0 }
 0x57e   : > { %5572 = vmatprep.mubr.f32.mxu1 %v4801_v6 }
 0x57f   : > { %5573 = vmatmul.mubr.f32.gmra.mrb[22].mxu1 %v4802_v47 }
 0x588   : > { %v5521_v48 = vpop.f32.mrb[24].mxu0 }
 0x589   : > { %v4730_v12 = vadd.f32 %v5521_v48, %v8470_v24  ;;  %v4724_v56 = vpop.f32.mrb[25].mxu0 }
 0x58a   : > { %v4725_v28 = vadd.f32 %v8470_v24, %v4724_v56 }
 0x58b   : > { %v4788_v26 = vmul.f32 0.2, %v4730_v12  ;;  %vm4772_vm10 = vcmp.gt.f32.partialorder %v4730_v12, 0.0 }
 0x58c   : > { %v4787_v11 = vmul.f32 0.2, %v4725_v28  ;;  %vm4771_vm0 = vcmp.gt.f32.partialorder %v4725_v28, 0.0 }
 0x58d   : > { %v4804_v29 = vsel %vm4772_vm10, %v4730_v12, %v4788_v26 }
 0x58e   : > { %v4803_v15 = vsel %vm4771_vm0, %v4725_v28, %v4787_v11 }
 0x58f   : > { %5575 = vmatprep.mubr.f32.mxu1 %v4803_v15 }
 0x590   : > { %5576 = vmatmul.mubr.f32.gmra.mrb[24].mxu1 %v4804_v29 }
 0x599   : > { %v5524_v9 = vpop.f32.mrb[26].mxu0 }
 0x59a   : > { %v4740_v3 = vadd.f32 %v5524_v9, %v8470_v24  ;;  %v4734_v45 = vpop.f32.mrb[27].mxu0 }
 0x59b   : > { %v4735_v50 = vadd.f32 %v8470_v24, %v4734_v45 }
 0x59c   : > { %v4790_v1 = vmul.f32 0.2, %v4740_v3  ;;  %vm4774_vm1 = vcmp.gt.f32.partialorder %v4740_v3, 0.0 }
 0x59d   : > { %v4789_v32 = vmul.f32 0.2, %v4735_v50  ;;  %vm4773_vm6 = vcmp.gt.f32.partialorder %v4735_v50, 0.0 }
 0x59e   : > { %v4806_v35 = vsel %vm4774_vm1, %v4740_v3, %v4790_v1 }
 0x59f   : > { %v4805_v59 = vsel %vm4773_vm6, %v4735_v50, %v4789_v32 }
 0x5a0   : > { %5578 = vmatprep.mubr.f32.mxu1 %v4805_v59 }
 0x5a1   : > { %5579 = vmatmul.mubr.f32.gmra.mrb[26].mxu1 %v4806_v35 }
 0x5a8   : > { %v5527_v34 = vpop.f32.mrb[28].mxu0 }
 0x5a9   : > { %v4750_v52 = vadd.f32 %v5527_v34, %v8470_v24  ;;  %v4744_v37 = vpop.f32.mrb[29].mxu0 }
 0x5aa   : > { %v4745_v17 = vadd.f32 %v8470_v24, %v4744_v37 }
 0x5ab   : > { %v4792_v7 = vmul.f32 0.2, %v4750_v52  ;;  %vm4776_vm13 = vcmp.gt.f32.partialorder %v4750_v52, 0.0 }
 0x5ac   : > { %v4791_v25 = vmul.f32 0.2, %v4745_v17  ;;  %vm4775_vm15 = vcmp.gt.f32.partialorder %v4745_v17, 0.0 }
 0x5ad   : > { %v4808_v44 = vsel %vm4776_vm13, %v4750_v52, %v4792_v7 }
 0x5ae   : > { %v4807_v58 = vsel %vm4775_vm15, %v4745_v17, %v4791_v25 }
 0x5af   : > { %5581 = vmatprep.mubr.f32.mxu1 %v4807_v58 }
 0x5b0   : > { %5582 = vmatmul.mubr.f32.gmra.mrb[28].mxu1 %v4808_v44 }
 0x5b5   : > { %v5530_v42 = vpop.f32.mrb[30].mxu0 }
 0x5b6   : > { %v4760_v62 = vadd.f32 %v5530_v42, %v8470_v24  ;;  %v4754_v23 = vpop.f32.mrb[31].mxu0 }
 0x5b7   : > { %v4755_v55 = vadd.f32 %v8470_v24, %v4754_v23 }
 0x5b8   : > { %v4794_v19 = vmul.f32 0.2, %v4760_v62  ;;  %vm4778_vm2 = vcmp.gt.f32.partialorder %v4760_v62, 0.0 }
 0x5b9   : > { %v4793_v22 = vmul.f32 0.2, %v4755_v55  ;;  %vm4777_vm7 = vcmp.gt.f32.partialorder %v4755_v55, 0.0 }
 0x5ba   : > { %v4810_v54 = vsel %vm4778_vm2, %v4760_v62, %v4794_v19 }
 0x5bb   : > { %v4809_v27 = vsel %vm4777_vm7, %v4755_v55, %v4793_v22 }
 0x5bc   : > { %5584 = vmatprep.mubr.f32.mxu1 %v4809_v27 }
 0x5bd   : > { %5585 = vmatmul.mubr.f32.gmra.mrb[30].mxu1 %v4810_v54 }
 0x5fa   : > { %v5565_v8 = vpop.f32.mrb[16].mxu1 }
 0x5fb   : > { %v4908_v21 = vadd.f32 %v5565_v8, %v5228_v40  ;;  %v4902_v38 = vpop.f32.mrb[17].mxu1 }
 0x5fc   : > { %v4903_v5 = vadd.f32 %v5228_v40, %v4902_v38 }
 0x5fd   : > { %4982 = vst [vmem:[%s8494_s10 + $0x8] sm:$0xff] %v4908_v21 }
 0x5fe   : > { %4981 = vst [vmem:[%s8494_s10] sm:$0xff] %v4903_v5 }
 0x608   : > { %v5568_v24 = vpop.f32.mrb[18].mxu1 }
 0x609   : > { %v4918_v10 = vadd.f32 %v5568_v24, %v5228_v40  ;;  %v4912_v63 = vpop.f32.mrb[19].mxu1 }
 0x60a   : > { %v4913_v60 = vadd.f32 %v5228_v40, %v4912_v63 }
 0x60b   : > { %4984 = vst [vmem:[%s8494_s10 + $0x18] sm:$0xff] %v4918_v10 }
 0x60c   : > { %4983 = vst [vmem:[%s8494_s10 + $0x10] sm:$0xff] %v4913_v60 }
 0x616   : > { %v5571_v53 = vpop.f32.mrb[20].mxu1 }
 0x617   : > { %v4928_v4 = vadd.f32 %v5571_v53, %v5228_v40  ;;  %v4922_v20 = vpop.f32.mrb[21].mxu1 }
 0x618   : > { %v4923_v14 = vadd.f32 %v5228_v40, %v4922_v20 }
 0x619   : > { %4986 = vst [vmem:[%s8494_s10 + $0x28] sm:$0xff] %v4928_v4 }
 0x61a   : > { %4985 = vst [vmem:[%s8494_s10 + $0x20] sm:$0xff] %v4923_v14 }
 0x652   : > { %v5574_v39 = vpop.f32.mrb[22].mxu1 }
 0x653   : > { %v4938_v61 = vadd.f32 %v5574_v39, %v5228_v40  ;;  %v4932_v16 = vpop.f32.mrb[23].mxu1 }
 0x654   : > { %v4933_v30 = vadd.f32 %v5228_v40, %v4932_v16 }
 0x655   : > { %4988 = vst [vmem:[%s8494_s10 + $0x38] sm:$0xff] %v4938_v61 }
 0x656   : > { %4987 = vst [vmem:[%s8494_s10 + $0x30] sm:$0xff] %v4933_v30 }
 0x663   : > { %v5577_v13 = vpop.f32.mrb[24].mxu1 }
 0x664   : > { %v4948_v36 = vadd.f32 %v5577_v13, %v5228_v40  ;;  %v4942_v18 = vpop.f32.mrb[25].mxu1 }
 0x665   : > { %v4943_v31 = vadd.f32 %v5228_v40, %v4942_v18 }
 0x666   : > { %4990 = vst [vmem:[%s8494_s10 + $0x48] sm:$0xff] %v4948_v36 }
 0x667   : > { %4989 = vst [vmem:[%s8494_s10 + $0x40] sm:$0xff] %v4943_v31 }
 0x674   : > { %v5580_v33 = vpop.f32.mrb[26].mxu1 }
 0x675   : > { %v4958_v57 = vadd.f32 %v5580_v33, %v5228_v40  ;;  %v4952_v49 = vpop.f32.mrb[27].mxu1 }
 0x676   : > { %v4953_v51 = vadd.f32 %v5228_v40, %v4952_v49 }
 0x677   : > { %4992 = vst [vmem:[%s8494_s10 + $0x58] sm:$0xff] %v4958_v57 }
 0x678   : > { %4991 = vst [vmem:[%s8494_s10 + $0x50] sm:$0xff] %v4953_v51 }
 0x683   : > { %v5583_v2 = vpop.f32.mrb[28].mxu1 }
 0x684   : > { %v4968_v41 = vadd.f32 %v5583_v2, %v5228_v40  ;;  %v4962_v46 = vpop.f32.mrb[29].mxu1 }
 0x685   : > { %v4963_v43 = vadd.f32 %v5228_v40, %v4962_v46 }
 0x686   : > { %4994 = vst [vmem:[%s8494_s10 + $0x68] sm:$0xff] %v4968_v41 }
 0x687   : > { %4993 = vst [vmem:[%s8494_s10 + $0x60] sm:$0xff] %v4963_v43 }
 0x690   : > { %v5586_v0 = vpop.f32.mrb[30].mxu1 }
 0x691   : > { %v4978_v6 = vadd.f32 %v5586_v0, %v5228_v40  ;;  %v4972_v47 = vpop.f32.mrb[31].mxu1 }
 0x692   : > { %v4973_v48 = vadd.f32 %v5228_v40, %v4972_v47 }
 0x693   : > { %4996 = vst [vmem:[%s8494_s10 + $0x78] sm:$0xff] %v4978_v6 }
 0x694   : > { %4995 = vst [vmem:[%s8494_s10 + $0x70] sm:$0xff] %v4973_v48 }
 0x695   : > { %6056 = shalt.err (!%p6053_p7)
}
 0x696   : > { %s6057_s30 = scalar_lea.hbm %s8515_s20, 2048  ;;  %s6061_s7 = scalar_lea.hbm %s8569_s4, 4096 }
 0x697   : > { %p6058_p8 = scmp.ne.s32.totalorder %s8515_s20, %s6057_s30  ;;  %p6062_p1 = scmp.lt.u32.totalorder %s8515_s20, %s8569_s4 }
 0x698   : > { %p6063_p0 = scmp.lt.u32.totalorder %s6061_s7, %s6057_s30  ;;  %p6065_p6 = scmp.lt.u32.totalorder %s6057_s30, %s8515_s20 }
 0x699   : > { %p6059_p11 = pnand %p6058_p8, %p8786_p9 }
 0x69a   : > { %p6064_p5 = por %p6063_p0, %p6062_p1 }
 0x69b   : > { %p6060_p13 = pneg %p6059_p11 }
 0x69c   : > { %p6066_p10 = por %p6065_p6, %p6064_p5 }
 0x69e   : > { %p6067_p12 = pnand %p6066_p10, %p6060_p13 }
 0x6a0   : > { %6070 = shalt.err (!%p6067_p12)
}
 0x6a1   : > { %s6128_s10 = smov 128  }
 0x6a2   : > { %5783 = dma.vmem_to_hbm [thread:$0]  (%p8786_p9), %s8517_s12, 2048, %s8515_s20, %s8523_s22, %s6128_s10, %s6128_s10, %s6115_s29  }
 0x6a3 PF: > { %p5795_p2 = scmp.ge.s32.totalorder %s6109_s18, 2  ;;  %s5026_s11 = sand.u32 1, %s6097_s15  }
 0x6a4   : > { %p8787_p3 = scmp.ne.s32.totalorder %s8620_s26, 0  ;;  %s5027_s13 = scalar_lea.sflag [#allocation4], %s5026_s11 }
 0x6a6   : > { %p5790_p4 = pnand %p5795_p2, %p8787_p3 }
 0x6a8   : > { %6092 = dma.done.wait (!%p5790_p4), %s5027_s13, 2048  }
 0x6a9   : > { %6094 = vsyncadd (!%p5790_p4), %s5027_s13, 4294965248  ;;  %p15_p7 = scmp.ge.s32.totalorder %s6179_s21, 4   ;;  %s8788_s15 = smov %s6101_s16 }
 0x6aa   : > { %s8789_s16 = smov %s6105_s17  ;;  %s8790_s17 = smov %s6190_s24 }
 0x6ab   : > { %s8791_s18 = smov %s6179_s21  ;;  %17 = sbr.rel (!%p15_p7) target bundleno = 4 (0x4), region = 82 }
 0x6b2   :  { %5032 = vsyncpa [#allocation3], 1 }
 0x6b3   :  { %5034 = vsyncpa [#allocation3 + $0x1], 1 }
 0x6b4   :  { %5035 = vsyncpa [#allocation4], 1 }
 0x6b5   :  { %5037 = vsyncpa [#allocation4 + $0x1], 1 }

</bundles_post_ra>
